<compile_context>
chip_gen: v6e
topology: v6e:2x2x1
jax: 0.10.0
libtpu: 0.0.40
codegen_flags: <defaults>
</compile_context>

<pallas_src>
import functools

import jax
import jax.numpy as jnp
from jax.experimental import pallas as pl
from jax.experimental.pallas import tpu as pltpu

LANE = 128  # TPU lane width; output channels / FC widths are padded to this.

# Scaled-down AlexNet config (logical widths).  Padded lanes carry exact zeros.
C1, C2, C3, C4, C5 = 16, 32, 64, 48, 48
FC_H, NUM_CLASSES = 128, 10


# -----------------------------------------------------------------------------
# Pallas kernels
# -----------------------------------------------------------------------------
def _conv_image_kernel(x_ref, w_ref, b_ref, o_ref, *, tap_rows, M):
    """Whole-image conv:  out = ReLU( sum_t x[tap_rows[t]:+M, :] @ w[t]  + b ).

    x_ref: (HF, K)      flat (phase-regrouped H x OW) K-folded image, bf16, VMEM-resident
    w_ref: (T, K, COUT) one (K, COUT) weight matrix per H-tap, bf16
    b_ref: (1, COUT)    f32 bias row
    o_ref: (M, COUT)    bf16, M = OH*OW (lane-dense COUT = 128)
    """
    cout = o_ref.shape[-1]
    acc = jnp.zeros((M, cout), jnp.float32)
    for t, row0 in enumerate(tap_rows):              # static, fully unrolled
        acc += jnp.dot(x_ref[pl.ds(row0, M), :], w_ref[t],
                       preferred_element_type=jnp.float32)
    acc = jnp.maximum(acc + b_ref[...], 0.0)         # f32 epilogue (v5e-friendly)
    o_ref[...] = acc.astype(o_ref.dtype)


def _conv5_tail_kernel(x_ref, w5_ref, b5_ref, w1_ref, b1_ref, w2_ref, b2_ref,
                       w3_ref, b3_ref, o_ref, *, tap_rows, M):
    """conv5 + ReLU + maxpool(3,2) + adaptive-avg-pool(6,6) + flatten + fc1/ReLU +
    fc2/ReLU + fc3 for one image.  Valid because the pre-pool map is 3x3, so the pool
    is a global max and the (6,6) avg pool replicates one pixel (folded into fc1_w).
    Dropout layers are identity in eval mode."""
    cout = w5_ref.shape[-1]
    acc = jnp.zeros((M, cout), jnp.float32)
    for t, row0 in enumerate(tap_rows):
        acc += jnp.dot(x_ref[pl.ds(row0, M), :], w5_ref[t],
                       preferred_element_type=jnp.float32)
    acc = jnp.maximum(acc + b5_ref[...], 0.0)
    h = jnp.max(acc, axis=0, keepdims=True)          # maxpool3 over the whole 3x3 map -> (1,128)
    h = jnp.dot(h.astype(jnp.bfloat16), w1_ref[...],
                preferred_element_type=jnp.float32) + b1_ref[...]
    h = jnp.maximum(h, 0.0)
    h = jnp.dot(h.astype(jnp.bfloat16), w2_ref[...],
                preferred_element_type=jnp.float32) + b2_ref[...]
    h = jnp.maximum(h, 0.0)
    h = jnp.dot(h.astype(jnp.bfloat16), w3_ref[...],
                preferred_element_type=jnp.float32) + b3_ref[...]
    o_ref[...] = h                                   # (1, 128) f32 padded logits


# -----------------------------------------------------------------------------
# Glue (plain JAX, fused by XLA): pad + W-direction im2col/K-fold + H regroup/flatten
# -----------------------------------------------------------------------------
def _wfold_hflatten(x, *, KH, KW, stride, pad, cin_real, k_pad):
    """Returns (xflat, tap_rows, OH, OW).

    xflat: (N, HF, k_pad) bf16 where row (h, ow) holds the KW taps' REAL channels of
    output column ow at (regrouped) input row h, zero-padded to k_pad lanes.  The H dim
    is regrouped by stride phase so every H-tap reads a single contiguous run of OH*OW
    rows; tap_rows[di] is that run's start row.
    """
    N, H, W = x.shape[:3]
    OH = (H + 2 * pad - KH) // stride + 1
    OW = (W + 2 * pad - KW) // stride + 1
    xp = jnp.pad(x[..., :cin_real], ((0, 0), (pad, pad), (pad, pad), (0, 0)))
    HP = xp.shape[1]
    # W-direction im2col / K-fold (real channels only -- no CIN->128 zero padding).
    cols = [xp[:, :, dj:dj + stride * (OW - 1) + 1:stride, :] for dj in range(KW)]
    g = jnp.concatenate(cols, axis=-1)                       # (N, HP, OW, KW*cin_real)
    if g.shape[-1] < k_pad:
        g = jnp.pad(g, ((0, 0), (0, 0), (0, 0), (0, k_pad - g.shape[-1])))
    # H stride-phase regroup so rows oh*stride + di are contiguous for each tap di.
    if stride == 1:
        PH, gr = HP, g
    else:
        PH = -(-HP // stride)
        phases = []
        for q in range(stride):
            ph = g[:, q::stride]
            if ph.shape[1] < PH:
                ph = jnp.pad(ph, ((0, 0), (0, PH - ph.shape[1]), (0, 0), (0, 0)))
            phases.append(ph)
        gr = jnp.concatenate(phases, axis=1)                 # (N, stride*PH, OW, k_pad)
    xflat = gr.reshape(N, gr.shape[1] * OW, k_pad).astype(jnp.bfloat16)
    tap_rows = tuple(((di % stride) * PH + di // stride) * OW for di in range(KH))
    return xflat, tap_rows, OH, OW


def maxpool2d_nhwc(x, k, stride):
    """9-way max of strided slices; fuses with the next conv's im2col glue in XLA."""
    N, H, W, C = x.shape
    OH = (H - k) // stride + 1
    OW = (W - k) // stride + 1
    out = None
    for di in range(k):
        for dj in range(k):
            sl = x[:, di:di + stride * (OH - 1) + 1:stride,
                     dj:dj + stride * (OW - 1) + 1:stride, :]
            out = sl if out is None else jnp.maximum(out, sl)
    return out


# -----------------------------------------------------------------------------
# Pallas wrappers
# -----------------------------------------------------------------------------
def conv2d_relu(x_nhwc, w_taps, b_row, *, KH, KW, stride, pad, cin_real):
    """x: (N,H,W,C) with >= cin_real real channels; one pallas_call, grid=(N,)."""
    N = x_nhwc.shape[0]
    k_pad, cout = w_taps.shape[1], w_taps.shape[2]
    xflat, tap_rows, OH, OW = _wfold_hflatten(
        x_nhwc, KH=KH, KW=KW, stride=stride, pad=pad, cin_real=cin_real, k_pad=k_pad)
    HF, M = xflat.shape[1], OH * OW
    kernel = functools.partial(_conv_image_kernel, tap_rows=tap_rows, M=M)
    out = pl.pallas_call(
        kernel,
        out_shape=jax.ShapeDtypeStruct((N, M, cout), jnp.bfloat16),
        grid=(N,),
        in_specs=[
            pl.BlockSpec((None, HF, k_pad), lambda n: (n, 0, 0)),
            # NOTE: constant-index weight/bias blocks; at real AlexNet widths these
            # should be single-buffered (pl.Buffered(1)) -- irrelevant at ~0.4 MiB.
            pl.BlockSpec(w_taps.shape, lambda n: (0, 0, 0)),
            pl.BlockSpec((1, cout), lambda n: (0, 0)),
        ],
        out_specs=pl.BlockSpec((None, M, cout), lambda n: (n, 0, 0)),
        compiler_params=pltpu.CompilerParams(dimension_semantics=("parallel",)),
    )(xflat, w_taps, b_row)
    return out.reshape(N, OH, OW, cout)


def conv5_classifier(x_nhwc, pp):
    """conv5 + maxpool3 + avgpool(6,6) + flatten + fc1/fc2/fc3 fused, grid=(N,)."""
    N, H, W, _ = x_nhwc.shape
    # TODO(synk): general adaptive_avg_pool((6,6)) + unsummed-fc1 path for inputs whose
    #             pre-pool map is not 1x1 (64x64 AlexNet input always yields 3x3 here).
    assert H == 3 and W == 3, "fused tail assumes a 3x3 pre-pool3 feature map"
    w5 = pp["c5_w"]
    k_pad = w5.shape[1]
    xflat, tap_rows, OH, OW = _wfold_hflatten(
        x_nhwc, KH=3, KW=3, stride=1, pad=1, cin_real=C4, k_pad=k_pad)
    HF, M = xflat.shape[1], OH * OW
    kernel = functools.partial(_conv5_tail_kernel, tap_rows=tap_rows, M=M)
    out = pl.pallas_call(
        kernel,
        out_shape=jax.ShapeDtypeStruct((N, 1, LANE), jnp.float32),
        grid=(N,),
        in_specs=[
            pl.BlockSpec((None, HF, k_pad), lambda n: (n, 0, 0)),
            pl.BlockSpec(w5.shape, lambda n: (0, 0, 0)),
            pl.BlockSpec((1, LANE), lambda n: (0, 0)),
            pl.BlockSpec((LANE, LANE), lambda n: (0, 0)),
            pl.BlockSpec((1, LANE), lambda n: (0, 0)),
            pl.BlockSpec((LANE, LANE), lambda n: (0, 0)),
            pl.BlockSpec((1, LANE), lambda n: (0, 0)),
            pl.BlockSpec((LANE, LANE), lambda n: (0, 0)),
            pl.BlockSpec((1, LANE), lambda n: (0, 0)),
        ],
        out_specs=pl.BlockSpec((None, 1, LANE), lambda n: (n, 0, 0)),
        compiler_params=pltpu.CompilerParams(dimension_semantics=("parallel",)),
    )(xflat, w5, pp["c5_b"], pp["fc1_w"], pp["fc1_b"],
      pp["fc2_w"], pp["fc2_b"], pp["fc3_w"], pp["fc3_b"])
    return out.reshape(N, LANE)


# -----------------------------------------------------------------------------
# Parameters: deterministic init (PyTorch layout) + one-time hoisted re-layout
# -----------------------------------------------------------------------------
def init_params(key):
    ks = jax.random.split(key, 16)

    def conv_p(kw_, kb_, cout, cin, kh, kwd):
        fan_in = cin * kh * kwd
        w = jax.random.normal(kw_, (cout, cin, kh, kwd), jnp.float32) * (2.0 / fan_in) ** 0.5
        b = jax.random.normal(kb_, (cout,), jnp.float32) * 0.01
        return w, b

    def fc_p(kw_, kb_, nout, nin):
        w = jax.random.normal(kw_, (nout, nin), jnp.float32) * (2.0 / nin) ** 0.5
        b = jax.random.normal(kb_, (nout,), jnp.float32) * 0.01
        return w, b

    p = {}
    p["c1_w"], p["c1_b"] = conv_p(ks[0], ks[1], C1, 3, 11, 11)
    p["c2_w"], p["c2_b"] = conv_p(ks[2], ks[3], C2, C1, 5, 5)
    p["c3_w"], p["c3_b"] = conv_p(ks[4], ks[5], C3, C2, 3, 3)
    p["c4_w"], p["c4_b"] = conv_p(ks[6], ks[7], C4, C3, 3, 3)
    p["c5_w"], p["c5_b"] = conv_p(ks[8], ks[9], C5, C4, 3, 3)
    p["fc1_w"], p["fc1_b"] = fc_p(ks[10], ks[11], FC_H, C5 * 6 * 6)
    p["fc2_w"], p["fc2_b"] = fc_p(ks[12], ks[13], FC_H, FC_H)
    p["fc3_w"], p["fc3_b"] = fc_p(ks[14], ks[15], NUM_CLASSES, FC_H)
    return p


def _pad_axis_to(x, target, axis):
    if x.shape[axis] == target:
        return x
    padc = [(0, 0)] * x.ndim
    padc[axis] = (0, target - x.shape[axis])
    return jnp.pad(x, padc)


def _prep_conv(w, b, k_pad):
    """PyTorch (COUT,CIN,KH,KW) -> per-H-tap (KH, k_pad, 128) with K = dj*CIN + cin."""
    cout, cin, kh, kw = w.shape
    wt = jnp.transpose(w, (2, 3, 1, 0)).reshape(kh, kw * cin, cout)
    wt = _pad_axis_to(wt, k_pad, 1)      # K  -> k_pad (zeros)
    wt = _pad_axis_to(wt, LANE, 2)       # COUT -> 128 (padded lanes stay exactly 0)
    bt = _pad_axis_to(b, LANE, 0).reshape(1, LANE)
    return wt.astype(jnp.bfloat16), bt.astype(jnp.float32)


def _prep_fc(w, b):
    wt = _pad_axis_to(_pad_axis_to(w.T, LANE, 0), LANE, 1)
    bt = _pad_axis_to(b, LANE, 0).reshape(1, LANE)
    return wt.astype(jnp.bfloat16), bt.astype(jnp.float32)


def prepare_params(p):
    """Hoisted, one-time weight re-layout (runs once, outside the jitted forward)."""
    q = {}
    # K per H-tap = KW * CIN_real; K=128 groups for conv1-3, K=256 for conv4/5
    # (fills the 256-wide v6e/v7x MXU; still correct/efficient on v5e).
    q["c1_w"], q["c1_b"] = _prep_conv(p["c1_w"], p["c1_b"], 128)   # 11*3  = 33  -> 128
    q["c2_w"], q["c2_b"] = _prep_conv(p["c2_w"], p["c2_b"], 128)   # 5*16  = 80  -> 128
    q["c3_w"], q["c3_b"] = _prep_conv(p["c3_w"], p["c3_b"], 128)   # 3*32  = 96  -> 128
    q["c4_w"], q["c4_b"] = _prep_conv(p["c4_w"], p["c4_b"], 256)   # 3*64  = 192 -> 256
    q["c5_w"], q["c5_b"] = _prep_conv(p["c5_w"], p["c5_b"], 256)   # 3*48  = 144 -> 256
    # fc1: with a 1x1 pre-avgpool map the 36 spatial copies are identical, so pre-sum
    # fc1 weight rows over spatial positions (PyTorch flatten order c*36 + i*6 + j).
    w1 = p["fc1_w"].reshape(FC_H, C5, 36).sum(axis=2).T            # (C5, FC_H)
    q["fc1_w"] = _pad_axis_to(_pad_axis_to(w1, LANE, 0), LANE, 1).astype(jnp.bfloat16)
    q["fc1_b"] = _pad_axis_to(p["fc1_b"], LANE, 0).reshape(1, LANE).astype(jnp.float32)
    q["fc2_w"], q["fc2_b"] = _prep_fc(p["fc2_w"], p["fc2_b"])
    q["fc3_w"], q["fc3_b"] = _prep_fc(p["fc3_w"], p["fc3_b"])
    return q


# -----------------------------------------------------------------------------
# Forward pass
# -----------------------------------------------------------------------------
def quantized_alexnet_forward(pp, x_nchw):
    # self.quant(x): identity for the fp32 (un-converted) QuantStub wrapper.
    x = jnp.transpose(x_nchw, (0, 2, 3, 1))                         # NCHW -> NHWC (3 real ch)

    # features: one pallas_call per conv (grid=(N,), whole image per step);
    # maxpools fuse into the next conv's im2col glue (single XLA fusion between calls).
    x = conv2d_relu(x, pp["c1_w"], pp["c1_b"], KH=11, KW=11, stride=4, pad=2, cin_real=3)
    x = maxpool2d_nhwc(x, 3, 2)
    x = conv2d_relu(x, pp["c2_w"], pp["c2_b"], KH=5, KW=5, stride=1, pad=2, cin_real=C1)
    x = maxpool2d_nhwc(x, 3, 2)
    x = conv2d_relu(x, pp["c3_w"], pp["c3_b"], KH=3, KW=3, stride=1, pad=1, cin_real=C2)
    x = conv2d_relu(x, pp["c4_w"], pp["c4_b"], KH=3, KW=3, stride=1, pad=1, cin_real=C3)

    # conv5 + ReLU + maxpool3 + avgpool(6,6) + flatten + classifier, fused (Dropout=eval id).
    logits_padded = conv5_classifier(x, pp)                         # (N, 128) f32

    # self.dequant(x): identity.
    return logits_padded[:, :NUM_CLASSES]


if __name__ == "__main__":
    key = jax.random.PRNGKey(0)
    k_param, k_x = jax.random.split(key)
    params = init_params(k_param)
    pp = prepare_params(params)   # hoisted one-time weight re-layout

    # Small input consistent with AlexNet's 11x11/4 conv + three 3x3/2 pools.
    x = jax.random.normal(k_x, (2, 3, 64, 64), jnp.float32)

    fwd = jax.jit(quantized_alexnet_forward)
    out = jax.block_until_ready(fwd(pp, x))

    assert out.shape == (2, NUM_CLASSES), out.shape
    assert out.dtype == jnp.float32
    assert bool(jnp.all(jnp.isfinite(out)))
    print("KERNEL_OK")
</pallas_src>

<mosaic_0001>
module attributes {stable_mosaic.version = 11 : i64} {
  func.func @_conv_image_kernel(%arg0: i32, %arg1: memref<1x1020x128xbf16, #tpu.memory_space<vmem>>, %arg2: memref<11x128x128xbf16, #tpu.memory_space<vmem>>, %arg3: memref<1x128xf32, #tpu.memory_space<vmem>>, %arg4: memref<1x225x128xbf16, #tpu.memory_space<vmem>>) attributes {dimension_semantics = [#tpu.dimension_semantics<parallel>], iteration_bounds = array<i64: 2>, scalar_prefetch = 0 : i64, scratch_operands = 0 : i64, tpu.core_type = #tpu.core_type<tc>, window_params = [{transform_indices = @transform_0, window_bounds = array<i64: 1, 1020, 128>}, {pipeline_mode = #tpu.pipeline_mode<synchronous>, transform_indices = @transform_1, window_bounds = array<i64: 11, 128, 128>}, {pipeline_mode = #tpu.pipeline_mode<synchronous>, transform_indices = @transform_2, window_bounds = array<i64: 1, 128>}, {transform_indices = @transform_3, window_bounds = array<i64: 1, 225, 128>}]} {
    %cst = arith.constant 0.000000e+00 : f32
    %0 = vector.broadcast %cst : f32 to vector<225x128xf32>
    %c0 = arith.constant 0 : index
    %c0_0 = arith.constant 0 : index
    %c0_1 = arith.constant 0 : index
    %1 = vector.load %arg1[%c0, %c0_0, %c0_1] : memref<1x1020x128xbf16, #tpu.memory_space<vmem>>, vector<1x225x128xbf16>
    %2 = vector.shape_cast %1 : vector<1x225x128xbf16> to vector<225x128xbf16>
    %c0_2 = arith.constant 0 : index
    %c0_3 = arith.constant 0 : index
    %c0_4 = arith.constant 0 : index
    %3 = vector.load %arg2[%c0_2, %c0_3, %c0_4] : memref<11x128x128xbf16, #tpu.memory_space<vmem>>, vector<1x128x128xbf16>
    %4 = vector.shape_cast %3 : vector<1x128x128xbf16> to vector<128x128xbf16>
    %cst_5 = arith.constant dense<0.000000e+00> : vector<225x128xf32>
    %5 = tpu.matmul %2, %4, %cst_5 {dimension_numbers = #tpu.dot_dimension_numbers<[1], [0], [0], [1], [0, 0, 1, 1], [], []>} : vector<225x128xbf16>, vector<128x128xbf16>, vector<225x128xf32> -> vector<225x128xf32>
    %6 = arith.addf %0, %5 : vector<225x128xf32>
    %c0_6 = arith.constant 0 : index
    %c255 = arith.constant 255 : index
    %c0_7 = arith.constant 0 : index
    %7 = vector.load %arg1[%c0_6, %c255, %c0_7] : memref<1x1020x128xbf16, #tpu.memory_space<vmem>>, vector<1x225x128xbf16>
    %8 = vector.shape_cast %7 : vector<1x225x128xbf16> to vector<225x128xbf16>
    %c1 = arith.constant 1 : index
    %c0_8 = arith.constant 0 : index
    %c0_9 = arith.constant 0 : index
    %9 = vector.load %arg2[%c1, %c0_8, %c0_9] : memref<11x128x128xbf16, #tpu.memory_space<vmem>>, vector<1x128x128xbf16>
    %10 = vector.shape_cast %9 : vector<1x128x128xbf16> to vector<128x128xbf16>
    %cst_10 = arith.constant dense<0.000000e+00> : vector<225x128xf32>
    %11 = tpu.matmul %8, %10, %cst_10 {dimension_numbers = #tpu.dot_dimension_numbers<[1], [0], [0], [1], [0, 0, 1, 1], [], []>} : vector<225x128xbf16>, vector<128x128xbf16>, vector<225x128xf32> -> vector<225x128xf32>
    %12 = arith.addf %6, %11 : vector<225x128xf32>
    %c0_11 = arith.constant 0 : index
    %c510 = arith.constant 510 : index
    %c0_12 = arith.constant 0 : index
    %13 = vector.load %arg1[%c0_11, %c510, %c0_12] : memref<1x1020x128xbf16, #tpu.memory_space<vmem>>, vector<1x225x128xbf16>
    %14 = vector.shape_cast %13 : vector<1x225x128xbf16> to vector<225x128xbf16>
    %c2 = arith.constant 2 : index
    %c0_13 = arith.constant 0 : index
    %c0_14 = arith.constant 0 : index
    %15 = vector.load %arg2[%c2, %c0_13, %c0_14] : memref<11x128x128xbf16, #tpu.memory_space<vmem>>, vector<1x128x128xbf16>
    %16 = vector.shape_cast %15 : vector<1x128x128xbf16> to vector<128x128xbf16>
    %cst_15 = arith.constant dense<0.000000e+00> : vector<225x128xf32>
    %17 = tpu.matmul %14, %16, %cst_15 {dimension_numbers = #tpu.dot_dimension_numbers<[1], [0], [0], [1], [0, 0, 1, 1], [], []>} : vector<225x128xbf16>, vector<128x128xbf16>, vector<225x128xf32> -> vector<225x128xf32>
    %18 = arith.addf %12, %17 : vector<225x128xf32>
    %c0_16 = arith.constant 0 : index
    %c765 = arith.constant 765 : index
    %c0_17 = arith.constant 0 : index
    %19 = vector.load %arg1[%c0_16, %c765, %c0_17] : memref<1x1020x128xbf16, #tpu.memory_space<vmem>>, vector<1x225x128xbf16>
    %20 = vector.shape_cast %19 : vector<1x225x128xbf16> to vector<225x128xbf16>
    %c3 = arith.constant 3 : index
    %c0_18 = arith.constant 0 : index
    %c0_19 = arith.constant 0 : index
    %21 = vector.load %arg2[%c3, %c0_18, %c0_19] : memref<11x128x128xbf16, #tpu.memory_space<vmem>>, vector<1x128x128xbf16>
    %22 = vector.shape_cast %21 : vector<1x128x128xbf16> to vector<128x128xbf16>
    %cst_20 = arith.constant dense<0.000000e+00> : vector<225x128xf32>
    %23 = tpu.matmul %20, %22, %cst_20 {dimension_numbers = #tpu.dot_dimension_numbers<[1], [0], [0], [1], [0, 0, 1, 1], [], []>} : vector<225x128xbf16>, vector<128x128xbf16>, vector<225x128xf32> -> vector<225x128xf32>
    %24 = arith.addf %18, %23 : vector<225x128xf32>
    %c0_21 = arith.constant 0 : index
    %c15 = arith.constant 15 : index
    %c0_22 = arith.constant 0 : index
    %25 = vector.load %arg1[%c0_21, %c15, %c0_22] : memref<1x1020x128xbf16, #tpu.memory_space<vmem>>, vector<1x225x128xbf16>
    %26 = vector.shape_cast %25 : vector<1x225x128xbf16> to vector<225x128xbf16>
    %c4 = arith.constant 4 : index
    %c0_23 = arith.constant 0 : index
    %c0_24 = arith.constant 0 : index
    %27 = vector.load %arg2[%c4, %c0_23, %c0_24] : memref<11x128x128xbf16, #tpu.memory_space<vmem>>, vector<1x128x128xbf16>
    %28 = vector.shape_cast %27 : vector<1x128x128xbf16> to vector<128x128xbf16>
    %cst_25 = arith.constant dense<0.000000e+00> : vector<225x128xf32>
    %29 = tpu.matmul %26, %28, %cst_25 {dimension_numbers = #tpu.dot_dimension_numbers<[1], [0], [0], [1], [0, 0, 1, 1], [], []>} : vector<225x128xbf16>, vector<128x128xbf16>, vector<225x128xf32> -> vector<225x128xf32>
    %30 = arith.addf %24, %29 : vector<225x128xf32>
    %c0_26 = arith.constant 0 : index
    %c270 = arith.constant 270 : index
    %c0_27 = arith.constant 0 : index
    %31 = vector.load %arg1[%c0_26, %c270, %c0_27] : memref<1x1020x128xbf16, #tpu.memory_space<vmem>>, vector<1x225x128xbf16>
    %32 = vector.shape_cast %31 : vector<1x225x128xbf16> to vector<225x128xbf16>
    %c5 = arith.constant 5 : index
    %c0_28 = arith.constant 0 : index
    %c0_29 = arith.constant 0 : index
    %33 = vector.load %arg2[%c5, %c0_28, %c0_29] : memref<11x128x128xbf16, #tpu.memory_space<vmem>>, vector<1x128x128xbf16>
    %34 = vector.shape_cast %33 : vector<1x128x128xbf16> to vector<128x128xbf16>
    %cst_30 = arith.constant dense<0.000000e+00> : vector<225x128xf32>
    %35 = tpu.matmul %32, %34, %cst_30 {dimension_numbers = #tpu.dot_dimension_numbers<[1], [0], [0], [1], [0, 0, 1, 1], [], []>} : vector<225x128xbf16>, vector<128x128xbf16>, vector<225x128xf32> -> vector<225x128xf32>
    %36 = arith.addf %30, %35 : vector<225x128xf32>
    %c0_31 = arith.constant 0 : index
    %c525 = arith.constant 525 : index
    %c0_32 = arith.constant 0 : index
    %37 = vector.load %arg1[%c0_31, %c525, %c0_32] : memref<1x1020x128xbf16, #tpu.memory_space<vmem>>, vector<1x225x128xbf16>
    %38 = vector.shape_cast %37 : vector<1x225x128xbf16> to vector<225x128xbf16>
    %c6 = arith.constant 6 : index
    %c0_33 = arith.constant 0 : index
    %c0_34 = arith.constant 0 : index
    %39 = vector.load %arg2[%c6, %c0_33, %c0_34] : memref<11x128x128xbf16, #tpu.memory_space<vmem>>, vector<1x128x128xbf16>
    %40 = vector.shape_cast %39 : vector<1x128x128xbf16> to vector<128x128xbf16>
    %cst_35 = arith.constant dense<0.000000e+00> : vector<225x128xf32>
    %41 = tpu.matmul %38, %40, %cst_35 {dimension_numbers = #tpu.dot_dimension_numbers<[1], [0], [0], [1], [0, 0, 1, 1], [], []>} : vector<225x128xbf16>, vector<128x128xbf16>, vector<225x128xf32> -> vector<225x128xf32>
    %42 = arith.addf %36, %41 : vector<225x128xf32>
    %c0_36 = arith.constant 0 : index
    %c780 = arith.constant 780 : index
    %c0_37 = arith.constant 0 : index
    %43 = vector.load %arg1[%c0_36, %c780, %c0_37] : memref<1x1020x128xbf16, #tpu.memory_space<vmem>>, vector<1x225x128xbf16>
    %44 = vector.shape_cast %43 : vector<1x225x128xbf16> to vector<225x128xbf16>
    %c7 = arith.constant 7 : index
    %c0_38 = arith.constant 0 : index
    %c0_39 = arith.constant 0 : index
    %45 = vector.load %arg2[%c7, %c0_38, %c0_39] : memref<11x128x128xbf16, #tpu.memory_space<vmem>>, vector<1x128x128xbf16>
    %46 = vector.shape_cast %45 : vector<1x128x128xbf16> to vector<128x128xbf16>
    %cst_40 = arith.constant dense<0.000000e+00> : vector<225x128xf32>
    %47 = tpu.matmul %44, %46, %cst_40 {dimension_numbers = #tpu.dot_dimension_numbers<[1], [0], [0], [1], [0, 0, 1, 1], [], []>} : vector<225x128xbf16>, vector<128x128xbf16>, vector<225x128xf32> -> vector<225x128xf32>
    %48 = arith.addf %42, %47 : vector<225x128xf32>
    %c0_41 = arith.constant 0 : index
    %c30 = arith.constant 30 : index
    %c0_42 = arith.constant 0 : index
    %49 = vector.load %arg1[%c0_41, %c30, %c0_42] : memref<1x1020x128xbf16, #tpu.memory_space<vmem>>, vector<1x225x128xbf16>
    %50 = vector.shape_cast %49 : vector<1x225x128xbf16> to vector<225x128xbf16>
    %c8 = arith.constant 8 : index
    %c0_43 = arith.constant 0 : index
    %c0_44 = arith.constant 0 : index
    %51 = vector.load %arg2[%c8, %c0_43, %c0_44] : memref<11x128x128xbf16, #tpu.memory_space<vmem>>, vector<1x128x128xbf16>
    %52 = vector.shape_cast %51 : vector<1x128x128xbf16> to vector<128x128xbf16>
    %cst_45 = arith.constant dense<0.000000e+00> : vector<225x128xf32>
    %53 = tpu.matmul %50, %52, %cst_45 {dimension_numbers = #tpu.dot_dimension_numbers<[1], [0], [0], [1], [0, 0, 1, 1], [], []>} : vector<225x128xbf16>, vector<128x128xbf16>, vector<225x128xf32> -> vector<225x128xf32>
    %54 = arith.addf %48, %53 : vector<225x128xf32>
    %c0_46 = arith.constant 0 : index
    %c285 = arith.constant 285 : index
    %c0_47 = arith.constant 0 : index
    %55 = vector.load %arg1[%c0_46, %c285, %c0_47] : memref<1x1020x128xbf16, #tpu.memory_space<vmem>>, vector<1x225x128xbf16>
    %56 = vector.shape_cast %55 : vector<1x225x128xbf16> to vector<225x128xbf16>
    %c9 = arith.constant 9 : index
    %c0_48 = arith.constant 0 : index
    %c0_49 = arith.constant 0 : index
    %57 = vector.load %arg2[%c9, %c0_48, %c0_49] : memref<11x128x128xbf16, #tpu.memory_space<vmem>>, vector<1x128x128xbf16>
    %58 = vector.shape_cast %57 : vector<1x128x128xbf16> to vector<128x128xbf16>
    %cst_50 = arith.constant dense<0.000000e+00> : vector<225x128xf32>
    %59 = tpu.matmul %56, %58, %cst_50 {dimension_numbers = #tpu.dot_dimension_numbers<[1], [0], [0], [1], [0, 0, 1, 1], [], []>} : vector<225x128xbf16>, vector<128x128xbf16>, vector<225x128xf32> -> vector<225x128xf32>
    %60 = arith.addf %54, %59 : vector<225x128xf32>
    %c0_51 = arith.constant 0 : index
    %c540 = arith.constant 540 : index
    %c0_52 = arith.constant 0 : index
    %61 = vector.load %arg1[%c0_51, %c540, %c0_52] : memref<1x1020x128xbf16, #tpu.memory_space<vmem>>, vector<1x225x128xbf16>
    %62 = vector.shape_cast %61 : vector<1x225x128xbf16> to vector<225x128xbf16>
    %c10 = arith.constant 10 : index
    %c0_53 = arith.constant 0 : index
    %c0_54 = arith.constant 0 : index
    %63 = vector.load %arg2[%c10, %c0_53, %c0_54] : memref<11x128x128xbf16, #tpu.memory_space<vmem>>, vector<1x128x128xbf16>
    %64 = vector.shape_cast %63 : vector<1x128x128xbf16> to vector<128x128xbf16>
    %cst_55 = arith.constant dense<0.000000e+00> : vector<225x128xf32>
    %65 = tpu.matmul %62, %64, %cst_55 {dimension_numbers = #tpu.dot_dimension_numbers<[1], [0], [0], [1], [0, 0, 1, 1], [], []>} : vector<225x128xbf16>, vector<128x128xbf16>, vector<225x128xf32> -> vector<225x128xf32>
    %66 = arith.addf %60, %65 : vector<225x128xf32>
    %c0_56 = arith.constant 0 : index
    %c0_57 = arith.constant 0 : index
    %67 = vector.load %arg3[%c0_56, %c0_57] : memref<1x128xf32, #tpu.memory_space<vmem>>, vector<1x128xf32>
    %68 = vector.broadcast %67 : vector<1x128xf32> to vector<225x128xf32>
    %69 = arith.addf %66, %68 : vector<225x128xf32>
    %cst_58 = arith.constant 0.000000e+00 : f32
    %70 = vector.broadcast %cst_58 : f32 to vector<225x128xf32>
    %71 = arith.maximumf %69, %70 : vector<225x128xf32>
    %72 = arith.truncf %71 : vector<225x128xf32> to vector<225x128xbf16>
    %c0_59 = arith.constant 0 : index
    %c0_60 = arith.constant 0 : index
    %c0_61 = arith.constant 0 : index
    %73 = vector.load %arg4[%c0_59, %c0_60, %c0_61] : memref<1x225x128xbf16, #tpu.memory_space<vmem>>, vector<1x225x128xbf16>
    %74 = vector.shape_cast %73 : vector<1x225x128xbf16> to vector<225x128xbf16>
    %75 = vector.shape_cast %72 : vector<225x128xbf16> to vector<1x225x128xbf16>
    tpu.vector_store %arg4[%c0_59, %c0_60, %c0_61], %75 {strides = array<i32>} : memref<1x225x128xbf16, #tpu.memory_space<vmem>>, vector<1x225x128xbf16>,
    return
  }
  func.func @transform_0(%arg0: i32) -> (i32, i32, i32) {
    %c0_i32 = arith.constant 0 : i32
    %c0_i32_0 = arith.constant 0 : i32
    %c0_i32_1 = arith.constant 0 : i32
    return %arg0, %c0_i32, %c0_i32_0 : i32, i32, i32
  }
  func.func @transform_1(%arg0: i32) -> (i32, i32, i32) {
    %c0_i32 = arith.constant 0 : i32
    %c0_i32_0 = arith.constant 0 : i32
    %c0_i32_1 = arith.constant 0 : i32
    %c0_i32_2 = arith.constant 0 : i32
    return %c0_i32, %c0_i32_0, %c0_i32_1 : i32, i32, i32
  }
  func.func @transform_2(%arg0: i32) -> (i32, i32) {
    %c0_i32 = arith.constant 0 : i32
    %c0_i32_0 = arith.constant 0 : i32
    %c0_i32_1 = arith.constant 0 : i32
    return %c0_i32, %c0_i32_0 : i32, i32
  }
  func.func @transform_3(%arg0: i32) -> (i32, i32, i32) {
    %c0_i32 = arith.constant 0 : i32
    %c0_i32_0 = arith.constant 0 : i32
    %c0_i32_1 = arith.constant 0 : i32
    return %arg0, %c0_i32, %c0_i32_0 : i32, i32, i32
  }
}

module attributes {stable_mosaic.version = 11 : i64} {
  func.func @_conv_image_kernel(%arg0: i32, %arg1: memref<1x77x128xbf16, #tpu.memory_space<vmem>>, %arg2: memref<5x128x128xbf16, #tpu.memory_space<vmem>>, %arg3: memref<1x128xf32, #tpu.memory_space<vmem>>, %arg4: memref<1x49x128xbf16, #tpu.memory_space<vmem>>) attributes {dimension_semantics = [#tpu.dimension_semantics<parallel>], iteration_bounds = array<i64: 2>, scalar_prefetch = 0 : i64, scratch_operands = 0 : i64, tpu.core_type = #tpu.core_type<tc>, window_params = [{transform_indices = @transform_0, window_bounds = array<i64: 1, 77, 128>}, {pipeline_mode = #tpu.pipeline_mode<synchronous>, transform_indices = @transform_1, window_bounds = array<i64: 5, 128, 128>}, {pipeline_mode = #tpu.pipeline_mode<synchronous>, transform_indices = @transform_2, window_bounds = array<i64: 1, 128>}, {transform_indices = @transform_3, window_bounds = array<i64: 1, 49, 128>}]} {
    %cst = arith.constant 0.000000e+00 : f32
    %0 = vector.broadcast %cst : f32 to vector<49x128xf32>
    %c0 = arith.constant 0 : index
    %c0_0 = arith.constant 0 : index
    %c0_1 = arith.constant 0 : index
    %1 = vector.load %arg1[%c0, %c0_0, %c0_1] : memref<1x77x128xbf16, #tpu.memory_space<vmem>>, vector<1x49x128xbf16>
    %2 = vector.shape_cast %1 : vector<1x49x128xbf16> to vector<49x128xbf16>
    %c0_2 = arith.constant 0 : index
    %c0_3 = arith.constant 0 : index
    %c0_4 = arith.constant 0 : index
    %3 = vector.load %arg2[%c0_2, %c0_3, %c0_4] : memref<5x128x128xbf16, #tpu.memory_space<vmem>>, vector<1x128x128xbf16>
    %4 = vector.shape_cast %3 : vector<1x128x128xbf16> to vector<128x128xbf16>
    %cst_5 = arith.constant dense<0.000000e+00> : vector<49x128xf32>
    %5 = tpu.matmul %2, %4, %cst_5 {dimension_numbers = #tpu.dot_dimension_numbers<[1], [0], [0], [1], [0, 0, 1, 1], [], []>} : vector<49x128xbf16>, vector<128x128xbf16>, vector<49x128xf32> -> vector<49x128xf32>
    %6 = arith.addf %0, %5 : vector<49x128xf32>
    %c0_6 = arith.constant 0 : index
    %c7 = arith.constant 7 : index
    %c0_7 = arith.constant 0 : index
    %7 = vector.load %arg1[%c0_6, %c7, %c0_7] : memref<1x77x128xbf16, #tpu.memory_space<vmem>>, vector<1x49x128xbf16>
    %8 = vector.shape_cast %7 : vector<1x49x128xbf16> to vector<49x128xbf16>
    %c1 = arith.constant 1 : index
    %c0_8 = arith.constant 0 : index
    %c0_9 = arith.constant 0 : index
    %9 = vector.load %arg2[%c1, %c0_8, %c0_9] : memref<5x128x128xbf16, #tpu.memory_space<vmem>>, vector<1x128x128xbf16>
    %10 = vector.shape_cast %9 : vector<1x128x128xbf16> to vector<128x128xbf16>
    %cst_10 = arith.constant dense<0.000000e+00> : vector<49x128xf32>
    %11 = tpu.matmul %8, %10, %cst_10 {dimension_numbers = #tpu.dot_dimension_numbers<[1], [0], [0], [1], [0, 0, 1, 1], [], []>} : vector<49x128xbf16>, vector<128x128xbf16>, vector<49x128xf32> -> vector<49x128xf32>
    %12 = arith.addf %6, %11 : vector<49x128xf32>
    %c0_11 = arith.constant 0 : index
    %c14 = arith.constant 14 : index
    %c0_12 = arith.constant 0 : index
    %13 = vector.load %arg1[%c0_11, %c14, %c0_12] : memref<1x77x128xbf16, #tpu.memory_space<vmem>>, vector<1x49x128xbf16>
    %14 = vector.shape_cast %13 : vector<1x49x128xbf16> to vector<49x128xbf16>
    %c2 = arith.constant 2 : index
    %c0_13 = arith.constant 0 : index
    %c0_14 = arith.constant 0 : index
    %15 = vector.load %arg2[%c2, %c0_13, %c0_14] : memref<5x128x128xbf16, #tpu.memory_space<vmem>>, vector<1x128x128xbf16>
    %16 = vector.shape_cast %15 : vector<1x128x128xbf16> to vector<128x128xbf16>
    %cst_15 = arith.constant dense<0.000000e+00> : vector<49x128xf32>
    %17 = tpu.matmul %14, %16, %cst_15 {dimension_numbers = #tpu.dot_dimension_numbers<[1], [0], [0], [1], [0, 0, 1, 1], [], []>} : vector<49x128xbf16>, vector<128x128xbf16>, vector<49x128xf32> -> vector<49x128xf32>
    %18 = arith.addf %12, %17 : vector<49x128xf32>
    %c0_16 = arith.constant 0 : index
    %c21 = arith.constant 21 : index
    %c0_17 = arith.constant 0 : index
    %19 = vector.load %arg1[%c0_16, %c21, %c0_17] : memref<1x77x128xbf16, #tpu.memory_space<vmem>>, vector<1x49x128xbf16>
    %20 = vector.shape_cast %19 : vector<1x49x128xbf16> to vector<49x128xbf16>
    %c3 = arith.constant 3 : index
    %c0_18 = arith.constant 0 : index
    %c0_19 = arith.constant 0 : index
    %21 = vector.load %arg2[%c3, %c0_18, %c0_19] : memref<5x128x128xbf16, #tpu.memory_space<vmem>>, vector<1x128x128xbf16>
    %22 = vector.shape_cast %21 : vector<1x128x128xbf16> to vector<128x128xbf16>
    %cst_20 = arith.constant dense<0.000000e+00> : vector<49x128xf32>
    %23 = tpu.matmul %20, %22, %cst_20 {dimension_numbers = #tpu.dot_dimension_numbers<[1], [0], [0], [1], [0, 0, 1, 1], [], []>} : vector<49x128xbf16>, vector<128x128xbf16>, vector<49x128xf32> -> vector<49x128xf32>
    %24 = arith.addf %18, %23 : vector<49x128xf32>
    %c0_21 = arith.constant 0 : index
    %c28 = arith.constant 28 : index
    %c0_22 = arith.constant 0 : index
    %25 = vector.load %arg1[%c0_21, %c28, %c0_22] : memref<1x77x128xbf16, #tpu.memory_space<vmem>>, vector<1x49x128xbf16>
    %26 = vector.shape_cast %25 : vector<1x49x128xbf16> to vector<49x128xbf16>
    %c4 = arith.constant 4 : index
    %c0_23 = arith.constant 0 : index
    %c0_24 = arith.constant 0 : index
    %27 = vector.load %arg2[%c4, %c0_23, %c0_24] : memref<5x128x128xbf16, #tpu.memory_space<vmem>>, vector<1x128x128xbf16>
    %28 = vector.shape_cast %27 : vector<1x128x128xbf16> to vector<128x128xbf16>
    %cst_25 = arith.constant dense<0.000000e+00> : vector<49x128xf32>
    %29 = tpu.matmul %26, %28, %cst_25 {dimension_numbers = #tpu.dot_dimension_numbers<[1], [0], [0], [1], [0, 0, 1, 1], [], []>} : vector<49x128xbf16>, vector<128x128xbf16>, vector<49x128xf32> -> vector<49x128xf32>
    %30 = arith.addf %24, %29 : vector<49x128xf32>
    %c0_26 = arith.constant 0 : index
    %c0_27 = arith.constant 0 : index
    %31 = vector.load %arg3[%c0_26, %c0_27] : memref<1x128xf32, #tpu.memory_space<vmem>>, vector<1x128xf32>
    %32 = vector.broadcast %31 : vector<1x128xf32> to vector<49x128xf32>
    %33 = arith.addf %30, %32 : vector<49x128xf32>
    %cst_28 = arith.constant 0.000000e+00 : f32
    %34 = vector.broadcast %cst_28 : f32 to vector<49x128xf32>
    %35 = arith.maximumf %33, %34 : vector<49x128xf32>
    %36 = arith.truncf %35 : vector<49x128xf32> to vector<49x128xbf16>
    %c0_29 = arith.constant 0 : index
    %c0_30 = arith.constant 0 : index
    %c0_31 = arith.constant 0 : index
    %37 = vector.load %arg4[%c0_29, %c0_30, %c0_31] : memref<1x49x128xbf16, #tpu.memory_space<vmem>>, vector<1x49x128xbf16>
    %38 = vector.shape_cast %37 : vector<1x49x128xbf16> to vector<49x128xbf16>
    %39 = vector.shape_cast %36 : vector<49x128xbf16> to vector<1x49x128xbf16>
    tpu.vector_store %arg4[%c0_29, %c0_30, %c0_31], %39 {strides = array<i32>} : memref<1x49x128xbf16, #tpu.memory_space<vmem>>, vector<1x49x128xbf16>,
    return
  }
  func.func @transform_0(%arg0: i32) -> (i32, i32, i32) {
    %c0_i32 = arith.constant 0 : i32
    %c0_i32_0 = arith.constant 0 : i32
    %c0_i32_1 = arith.constant 0 : i32
    return %arg0, %c0_i32, %c0_i32_0 : i32, i32, i32
  }
  func.func @transform_1(%arg0: i32) -> (i32, i32, i32) {
    %c0_i32 = arith.constant 0 : i32
    %c0_i32_0 = arith.constant 0 : i32
    %c0_i32_1 = arith.constant 0 : i32
    %c0_i32_2 = arith.constant 0 : i32
    return %c0_i32, %c0_i32_0, %c0_i32_1 : i32, i32, i32
  }
  func.func @transform_2(%arg0: i32) -> (i32, i32) {
    %c0_i32 = arith.constant 0 : i32
    %c0_i32_0 = arith.constant 0 : i32
    %c0_i32_1 = arith.constant 0 : i32
    return %c0_i32, %c0_i32_0 : i32, i32
  }
  func.func @transform_3(%arg0: i32) -> (i32, i32, i32) {
    %c0_i32 = arith.constant 0 : i32
    %c0_i32_0 = arith.constant 0 : i32
    %c0_i32_1 = arith.constant 0 : i32
    return %arg0, %c0_i32, %c0_i32_0 : i32, i32, i32
  }
}

module attributes {stable_mosaic.version = 11 : i64} {
  func.func @_conv_image_kernel(%arg0: i32, %arg1: memref<1x15x128xbf16, #tpu.memory_space<vmem>>, %arg2: memref<3x128x128xbf16, #tpu.memory_space<vmem>>, %arg3: memref<1x128xf32, #tpu.memory_space<vmem>>, %arg4: memref<1x9x128xbf16, #tpu.memory_space<vmem>>) attributes {dimension_semantics = [#tpu.dimension_semantics<parallel>], iteration_bounds = array<i64: 2>, scalar_prefetch = 0 : i64, scratch_operands = 0 : i64, tpu.core_type = #tpu.core_type<tc>, window_params = [{transform_indices = @transform_0, window_bounds = array<i64: 1, 15, 128>}, {pipeline_mode = #tpu.pipeline_mode<synchronous>, transform_indices = @transform_1, window_bounds = array<i64: 3, 128, 128>}, {pipeline_mode = #tpu.pipeline_mode<synchronous>, transform_indices = @transform_2, window_bounds = array<i64: 1, 128>}, {transform_indices = @transform_3, window_bounds = array<i64: 1, 9, 128>}]} {
    %cst = arith.constant 0.000000e+00 : f32
    %0 = vector.broadcast %cst : f32 to vector<9x128xf32>
    %c0 = arith.constant 0 : index
    %c0_0 = arith.constant 0 : index
    %c0_1 = arith.constant 0 : index
    %1 = vector.load %arg1[%c0, %c0_0, %c0_1] : memref<1x15x128xbf16, #tpu.memory_space<vmem>>, vector<1x9x128xbf16>
    %2 = vector.shape_cast %1 : vector<1x9x128xbf16> to vector<9x128xbf16>
    %c0_2 = arith.constant 0 : index
    %c0_3 = arith.constant 0 : index
    %c0_4 = arith.constant 0 : index
    %3 = vector.load %arg2[%c0_2, %c0_3, %c0_4] : memref<3x128x128xbf16, #tpu.memory_space<vmem>>, vector<1x128x128xbf16>
    %4 = vector.shape_cast %3 : vector<1x128x128xbf16> to vector<128x128xbf16>
    %cst_5 = arith.constant dense<0.000000e+00> : vector<9x128xf32>
    %5 = tpu.matmul %2, %4, %cst_5 {dimension_numbers = #tpu.dot_dimension_numbers<[1], [0], [0], [1], [0, 0, 1, 1], [], []>} : vector<9x128xbf16>, vector<128x128xbf16>, vector<9x128xf32> -> vector<9x128xf32>
    %6 = arith.addf %0, %5 : vector<9x128xf32>
    %c0_6 = arith.constant 0 : index
    %c3 = arith.constant 3 : index
    %c0_7 = arith.constant 0 : index
    %7 = vector.load %arg1[%c0_6, %c3, %c0_7] : memref<1x15x128xbf16, #tpu.memory_space<vmem>>, vector<1x9x128xbf16>
    %8 = vector.shape_cast %7 : vector<1x9x128xbf16> to vector<9x128xbf16>
    %c1 = arith.constant 1 : index
    %c0_8 = arith.constant 0 : index
    %c0_9 = arith.constant 0 : index
    %9 = vector.load %arg2[%c1, %c0_8, %c0_9] : memref<3x128x128xbf16, #tpu.memory_space<vmem>>, vector<1x128x128xbf16>
    %10 = vector.shape_cast %9 : vector<1x128x128xbf16> to vector<128x128xbf16>
    %cst_10 = arith.constant dense<0.000000e+00> : vector<9x128xf32>
    %11 = tpu.matmul %8, %10, %cst_10 {dimension_numbers = #tpu.dot_dimension_numbers<[1], [0], [0], [1], [0, 0, 1, 1], [], []>} : vector<9x128xbf16>, vector<128x128xbf16>, vector<9x128xf32> -> vector<9x128xf32>
    %12 = arith.addf %6, %11 : vector<9x128xf32>
    %c0_11 = arith.constant 0 : index
    %c6 = arith.constant 6 : index
    %c0_12 = arith.constant 0 : index
    %13 = vector.load %arg1[%c0_11, %c6, %c0_12] : memref<1x15x128xbf16, #tpu.memory_space<vmem>>, vector<1x9x128xbf16>
    %14 = vector.shape_cast %13 : vector<1x9x128xbf16> to vector<9x128xbf16>
    %c2 = arith.constant 2 : index
    %c0_13 = arith.constant 0 : index
    %c0_14 = arith.constant 0 : index
    %15 = vector.load %arg2[%c2, %c0_13, %c0_14] : memref<3x128x128xbf16, #tpu.memory_space<vmem>>, vector<1x128x128xbf16>
    %16 = vector.shape_cast %15 : vector<1x128x128xbf16> to vector<128x128xbf16>
    %cst_15 = arith.constant dense<0.000000e+00> : vector<9x128xf32>
    %17 = tpu.matmul %14, %16, %cst_15 {dimension_numbers = #tpu.dot_dimension_numbers<[1], [0], [0], [1], [0, 0, 1, 1], [], []>} : vector<9x128xbf16>, vector<128x128xbf16>, vector<9x128xf32> -> vector<9x128xf32>
    %18 = arith.addf %12, %17 : vector<9x128xf32>
    %c0_16 = arith.constant 0 : index
    %c0_17 = arith.constant 0 : index
    %19 = vector.load %arg3[%c0_16, %c0_17] : memref<1x128xf32, #tpu.memory_space<vmem>>, vector<1x128xf32>
    %20 = vector.broadcast %19 : vector<1x128xf32> to vector<9x128xf32>
    %21 = arith.addf %18, %20 : vector<9x128xf32>
    %cst_18 = arith.constant 0.000000e+00 : f32
    %22 = vector.broadcast %cst_18 : f32 to vector<9x128xf32>
    %23 = arith.maximumf %21, %22 : vector<9x128xf32>
    %24 = arith.truncf %23 : vector<9x128xf32> to vector<9x128xbf16>
    %c0_19 = arith.constant 0 : index
    %c0_20 = arith.constant 0 : index
    %c0_21 = arith.constant 0 : index
    %25 = vector.load %arg4[%c0_19, %c0_20, %c0_21] : memref<1x9x128xbf16, #tpu.memory_space<vmem>>, vector<1x9x128xbf16>
    %26 = vector.shape_cast %25 : vector<1x9x128xbf16> to vector<9x128xbf16>
    %27 = vector.shape_cast %24 : vector<9x128xbf16> to vector<1x9x128xbf16>
    tpu.vector_store %arg4[%c0_19, %c0_20, %c0_21], %27 {strides = array<i32>} : memref<1x9x128xbf16, #tpu.memory_space<vmem>>, vector<1x9x128xbf16>,
    return
  }
  func.func @transform_0(%arg0: i32) -> (i32, i32, i32) {
    %c0_i32 = arith.constant 0 : i32
    %c0_i32_0 = arith.constant 0 : i32
    %c0_i32_1 = arith.constant 0 : i32
    return %arg0, %c0_i32, %c0_i32_0 : i32, i32, i32
  }
  func.func @transform_1(%arg0: i32) -> (i32, i32, i32) {
    %c0_i32 = arith.constant 0 : i32
    %c0_i32_0 = arith.constant 0 : i32
    %c0_i32_1 = arith.constant 0 : i32
    %c0_i32_2 = arith.constant 0 : i32
    return %c0_i32, %c0_i32_0, %c0_i32_1 : i32, i32, i32
  }
  func.func @transform_2(%arg0: i32) -> (i32, i32) {
    %c0_i32 = arith.constant 0 : i32
    %c0_i32_0 = arith.constant 0 : i32
    %c0_i32_1 = arith.constant 0 : i32
    return %c0_i32, %c0_i32_0 : i32, i32
  }
  func.func @transform_3(%arg0: i32) -> (i32, i32, i32) {
    %c0_i32 = arith.constant 0 : i32
    %c0_i32_0 = arith.constant 0 : i32
    %c0_i32_1 = arith.constant 0 : i32
    return %arg0, %c0_i32, %c0_i32_0 : i32, i32, i32
  }
}

module attributes {stable_mosaic.version = 11 : i64} {
  func.func @_conv_image_kernel(%arg0: i32, %arg1: memref<1x15x256xbf16, #tpu.memory_space<vmem>>, %arg2: memref<3x256x128xbf16, #tpu.memory_space<vmem>>, %arg3: memref<1x128xf32, #tpu.memory_space<vmem>>, %arg4: memref<1x9x128xbf16, #tpu.memory_space<vmem>>) attributes {dimension_semantics = [#tpu.dimension_semantics<parallel>], iteration_bounds = array<i64: 2>, scalar_prefetch = 0 : i64, scratch_operands = 0 : i64, tpu.core_type = #tpu.core_type<tc>, window_params = [{transform_indices = @transform_0, window_bounds = array<i64: 1, 15, 256>}, {pipeline_mode = #tpu.pipeline_mode<synchronous>, transform_indices = @transform_1, window_bounds = array<i64: 3, 256, 128>}, {pipeline_mode = #tpu.pipeline_mode<synchronous>, transform_indices = @transform_2, window_bounds = array<i64: 1, 128>}, {transform_indices = @transform_3, window_bounds = array<i64: 1, 9, 128>}]} {
    %cst = arith.constant 0.000000e+00 : f32
    %0 = vector.broadcast %cst : f32 to vector<9x128xf32>
    %c0 = arith.constant 0 : index
    %c0_0 = arith.constant 0 : index
    %c0_1 = arith.constant 0 : index
    %1 = vector.load %arg1[%c0, %c0_0, %c0_1] : memref<1x15x256xbf16, #tpu.memory_space<vmem>>, vector<1x9x256xbf16>
    %2 = vector.shape_cast %1 : vector<1x9x256xbf16> to vector<9x256xbf16>
    %c0_2 = arith.constant 0 : index
    %c0_3 = arith.constant 0 : index
    %c0_4 = arith.constant 0 : index
    %3 = vector.load %arg2[%c0_2, %c0_3, %c0_4] : memref<3x256x128xbf16, #tpu.memory_space<vmem>>, vector<1x256x128xbf16>
    %4 = vector.shape_cast %3 : vector<1x256x128xbf16> to vector<256x128xbf16>
    %cst_5 = arith.constant dense<0.000000e+00> : vector<9x128xf32>
    %5 = tpu.matmul %2, %4, %cst_5 {dimension_numbers = #tpu.dot_dimension_numbers<[1], [0], [0], [1], [0, 0, 1, 1], [], []>} : vector<9x256xbf16>, vector<256x128xbf16>, vector<9x128xf32> -> vector<9x128xf32>
    %6 = arith.addf %0, %5 : vector<9x128xf32>
    %c0_6 = arith.constant 0 : index
    %c3 = arith.constant 3 : index
    %c0_7 = arith.constant 0 : index
    %7 = vector.load %arg1[%c0_6, %c3, %c0_7] : memref<1x15x256xbf16, #tpu.memory_space<vmem>>, vector<1x9x256xbf16>
    %8 = vector.shape_cast %7 : vector<1x9x256xbf16> to vector<9x256xbf16>
    %c1 = arith.constant 1 : index
    %c0_8 = arith.constant 0 : index
    %c0_9 = arith.constant 0 : index
    %9 = vector.load %arg2[%c1, %c0_8, %c0_9] : memref<3x256x128xbf16, #tpu.memory_space<vmem>>, vector<1x256x128xbf16>
    %10 = vector.shape_cast %9 : vector<1x256x128xbf16> to vector<256x128xbf16>
    %cst_10 = arith.constant dense<0.000000e+00> : vector<9x128xf32>
    %11 = tpu.matmul %8, %10, %cst_10 {dimension_numbers = #tpu.dot_dimension_numbers<[1], [0], [0], [1], [0, 0, 1, 1], [], []>} : vector<9x256xbf16>, vector<256x128xbf16>, vector<9x128xf32> -> vector<9x128xf32>
    %12 = arith.addf %6, %11 : vector<9x128xf32>
    %c0_11 = arith.constant 0 : index
    %c6 = arith.constant 6 : index
    %c0_12 = arith.constant 0 : index
    %13 = vector.load %arg1[%c0_11, %c6, %c0_12] : memref<1x15x256xbf16, #tpu.memory_space<vmem>>, vector<1x9x256xbf16>
    %14 = vector.shape_cast %13 : vector<1x9x256xbf16> to vector<9x256xbf16>
    %c2 = arith.constant 2 : index
    %c0_13 = arith.constant 0 : index
    %c0_14 = arith.constant 0 : index
    %15 = vector.load %arg2[%c2, %c0_13, %c0_14] : memref<3x256x128xbf16, #tpu.memory_space<vmem>>, vector<1x256x128xbf16>
    %16 = vector.shape_cast %15 : vector<1x256x128xbf16> to vector<256x128xbf16>
    %cst_15 = arith.constant dense<0.000000e+00> : vector<9x128xf32>
    %17 = tpu.matmul %14, %16, %cst_15 {dimension_numbers = #tpu.dot_dimension_numbers<[1], [0], [0], [1], [0, 0, 1, 1], [], []>} : vector<9x256xbf16>, vector<256x128xbf16>, vector<9x128xf32> -> vector<9x128xf32>
    %18 = arith.addf %12, %17 : vector<9x128xf32>
    %c0_16 = arith.constant 0 : index
    %c0_17 = arith.constant 0 : index
    %19 = vector.load %arg3[%c0_16, %c0_17] : memref<1x128xf32, #tpu.memory_space<vmem>>, vector<1x128xf32>
    %20 = vector.broadcast %19 : vector<1x128xf32> to vector<9x128xf32>
    %21 = arith.addf %18, %20 : vector<9x128xf32>
    %cst_18 = arith.constant 0.000000e+00 : f32
    %22 = vector.broadcast %cst_18 : f32 to vector<9x128xf32>
    %23 = arith.maximumf %21, %22 : vector<9x128xf32>
    %24 = arith.truncf %23 : vector<9x128xf32> to vector<9x128xbf16>
    %c0_19 = arith.constant 0 : index
    %c0_20 = arith.constant 0 : index
    %c0_21 = arith.constant 0 : index
    %25 = vector.load %arg4[%c0_19, %c0_20, %c0_21] : memref<1x9x128xbf16, #tpu.memory_space<vmem>>, vector<1x9x128xbf16>
    %26 = vector.shape_cast %25 : vector<1x9x128xbf16> to vector<9x128xbf16>
    %27 = vector.shape_cast %24 : vector<9x128xbf16> to vector<1x9x128xbf16>
    tpu.vector_store %arg4[%c0_19, %c0_20, %c0_21], %27 {strides = array<i32>} : memref<1x9x128xbf16, #tpu.memory_space<vmem>>, vector<1x9x128xbf16>,
    return
  }
  func.func @transform_0(%arg0: i32) -> (i32, i32, i32) {
    %c0_i32 = arith.constant 0 : i32
    %c0_i32_0 = arith.constant 0 : i32
    %c0_i32_1 = arith.constant 0 : i32
    return %arg0, %c0_i32, %c0_i32_0 : i32, i32, i32
  }
  func.func @transform_1(%arg0: i32) -> (i32, i32, i32) {
    %c0_i32 = arith.constant 0 : i32
    %c0_i32_0 = arith.constant 0 : i32
    %c0_i32_1 = arith.constant 0 : i32
    %c0_i32_2 = arith.constant 0 : i32
    return %c0_i32, %c0_i32_0, %c0_i32_1 : i32, i32, i32
  }
  func.func @transform_2(%arg0: i32) -> (i32, i32) {
    %c0_i32 = arith.constant 0 : i32
    %c0_i32_0 = arith.constant 0 : i32
    %c0_i32_1 = arith.constant 0 : i32
    return %c0_i32, %c0_i32_0 : i32, i32
  }
  func.func @transform_3(%arg0: i32) -> (i32, i32, i32) {
    %c0_i32 = arith.constant 0 : i32
    %c0_i32_0 = arith.constant 0 : i32
    %c0_i32_1 = arith.constant 0 : i32
    return %arg0, %c0_i32, %c0_i32_0 : i32, i32, i32
  }
}

module attributes {stable_mosaic.version = 11 : i64} {
  func.func @_conv5_tail_kernel(%arg0: i32, %arg1: memref<1x15x256xbf16, #tpu.memory_space<vmem>>, %arg2: memref<3x256x128xbf16, #tpu.memory_space<vmem>>, %arg3: memref<1x128xf32, #tpu.memory_space<vmem>>, %arg4: memref<128x128xbf16, #tpu.memory_space<vmem>>, %arg5: memref<1x128xf32, #tpu.memory_space<vmem>>, %arg6: memref<128x128xbf16, #tpu.memory_space<vmem>>, %arg7: memref<1x128xf32, #tpu.memory_space<vmem>>, %arg8: memref<128x128xbf16, #tpu.memory_space<vmem>>, %arg9: memref<1x128xf32, #tpu.memory_space<vmem>>, %arg10: memref<1x1x128xf32, #tpu.memory_space<vmem>>) attributes {dimension_semantics = [#tpu.dimension_semantics<parallel>], iteration_bounds = array<i64: 2>, scalar_prefetch = 0 : i64, scratch_operands = 0 : i64, tpu.core_type = #tpu.core_type<tc>, window_params = [{transform_indices = @transform_0, window_bounds = array<i64: 1, 15, 256>}, {pipeline_mode = #tpu.pipeline_mode<synchronous>, transform_indices = @transform_1, window_bounds = array<i64: 3, 256, 128>}, {pipeline_mode = #tpu.pipeline_mode<synchronous>, transform_indices = @transform_2, window_bounds = array<i64: 1, 128>}, {pipeline_mode = #tpu.pipeline_mode<synchronous>, transform_indices = @transform_3, window_bounds = array<i64: 128, 128>}, {pipeline_mode = #tpu.pipeline_mode<synchronous>, transform_indices = @transform_4, window_bounds = array<i64: 1, 128>}, {pipeline_mode = #tpu.pipeline_mode<synchronous>, transform_indices = @transform_5, window_bounds = array<i64: 128, 128>}, {pipeline_mode = #tpu.pipeline_mode<synchronous>, transform_indices = @transform_6, window_bounds = array<i64: 1, 128>}, {pipeline_mode = #tpu.pipeline_mode<synchronous>, transform_indices = @transform_7, window_bounds = array<i64: 128, 128>}, {pipeline_mode = #tpu.pipeline_mode<synchronous>, transform_indices = @transform_8, window_bounds = array<i64: 1, 128>}, {transform_indices = @transform_9, window_bounds = array<i64: 1, 1, 128>}]} {
    %cst = arith.constant 0.000000e+00 : f32
    %0 = vector.broadcast %cst : f32 to vector<9x128xf32>
    %c0 = arith.constant 0 : index
    %c0_0 = arith.constant 0 : index
    %c0_1 = arith.constant 0 : index
    %1 = vector.load %arg1[%c0, %c0_0, %c0_1] : memref<1x15x256xbf16, #tpu.memory_space<vmem>>, vector<1x9x256xbf16>
    %2 = vector.shape_cast %1 : vector<1x9x256xbf16> to vector<9x256xbf16>
    %c0_2 = arith.constant 0 : index
    %c0_3 = arith.constant 0 : index
    %c0_4 = arith.constant 0 : index
    %3 = vector.load %arg2[%c0_2, %c0_3, %c0_4] : memref<3x256x128xbf16, #tpu.memory_space<vmem>>, vector<1x256x128xbf16>
    %4 = vector.shape_cast %3 : vector<1x256x128xbf16> to vector<256x128xbf16>
    %cst_5 = arith.constant dense<0.000000e+00> : vector<9x128xf32>
    %5 = tpu.matmul %2, %4, %cst_5 {dimension_numbers = #tpu.dot_dimension_numbers<[1], [0], [0], [1], [0, 0, 1, 1], [], []>} : vector<9x256xbf16>, vector<256x128xbf16>, vector<9x128xf32> -> vector<9x128xf32>
    %6 = arith.addf %0, %5 : vector<9x128xf32>
    %c0_6 = arith.constant 0 : index
    %c3 = arith.constant 3 : index
    %c0_7 = arith.constant 0 : index
    %7 = vector.load %arg1[%c0_6, %c3, %c0_7] : memref<1x15x256xbf16, #tpu.memory_space<vmem>>, vector<1x9x256xbf16>
    %8 = vector.shape_cast %7 : vector<1x9x256xbf16> to vector<9x256xbf16>
    %c1 = arith.constant 1 : index
    %c0_8 = arith.constant 0 : index
    %c0_9 = arith.constant 0 : index
    %9 = vector.load %arg2[%c1, %c0_8, %c0_9] : memref<3x256x128xbf16, #tpu.memory_space<vmem>>, vector<1x256x128xbf16>
    %10 = vector.shape_cast %9 : vector<1x256x128xbf16> to vector<256x128xbf16>
    %cst_10 = arith.constant dense<0.000000e+00> : vector<9x128xf32>
    %11 = tpu.matmul %8, %10, %cst_10 {dimension_numbers = #tpu.dot_dimension_numbers<[1], [0], [0], [1], [0, 0, 1, 1], [], []>} : vector<9x256xbf16>, vector<256x128xbf16>, vector<9x128xf32> -> vector<9x128xf32>
    %12 = arith.addf %6, %11 : vector<9x128xf32>
    %c0_11 = arith.constant 0 : index
    %c6 = arith.constant 6 : index
    %c0_12 = arith.constant 0 : index
    %13 = vector.load %arg1[%c0_11, %c6, %c0_12] : memref<1x15x256xbf16, #tpu.memory_space<vmem>>, vector<1x9x256xbf16>
    %14 = vector.shape_cast %13 : vector<1x9x256xbf16> to vector<9x256xbf16>
    %c2 = arith.constant 2 : index
    %c0_13 = arith.constant 0 : index
    %c0_14 = arith.constant 0 : index
    %15 = vector.load %arg2[%c2, %c0_13, %c0_14] : memref<3x256x128xbf16, #tpu.memory_space<vmem>>, vector<1x256x128xbf16>
    %16 = vector.shape_cast %15 : vector<1x256x128xbf16> to vector<256x128xbf16>
    %cst_15 = arith.constant dense<0.000000e+00> : vector<9x128xf32>
    %17 = tpu.matmul %14, %16, %cst_15 {dimension_numbers = #tpu.dot_dimension_numbers<[1], [0], [0], [1], [0, 0, 1, 1], [], []>} : vector<9x256xbf16>, vector<256x128xbf16>, vector<9x128xf32> -> vector<9x128xf32>
    %18 = arith.addf %12, %17 : vector<9x128xf32>
    %c0_16 = arith.constant 0 : index
    %c0_17 = arith.constant 0 : index
    %19 = vector.load %arg3[%c0_16, %c0_17] : memref<1x128xf32, #tpu.memory_space<vmem>>, vector<1x128xf32>
    %20 = vector.broadcast %19 : vector<1x128xf32> to vector<9x128xf32>
    %21 = arith.addf %18, %20 : vector<9x128xf32>
    %cst_18 = arith.constant 0.000000e+00 : f32
    %22 = vector.broadcast %cst_18 : f32 to vector<9x128xf32>
    %23 = arith.maximumf %21, %22 : vector<9x128xf32>
    %cst_19 = arith.constant dense<0xFF800000> : vector<128xf32>
    %24 = vector.multi_reduction <maximumf>, %23, %cst_19 [0] : vector<9x128xf32> to vector<128xf32>
    %25 = vector.shape_cast %24 : vector<128xf32> to vector<1x128xf32>
    %26 = arith.truncf %25 : vector<1x128xf32> to vector<1x128xbf16>
    %c0_20 = arith.constant 0 : index
    %c0_21 = arith.constant 0 : index
    %27 = vector.load %arg4[%c0_20, %c0_21] : memref<128x128xbf16, #tpu.memory_space<vmem>>, vector<128x128xbf16>
    %cst_22 = arith.constant dense<0.000000e+00> : vector<1x128xf32>
    %28 = tpu.matmul %26, %27, %cst_22 {dimension_numbers = #tpu.dot_dimension_numbers<[1], [0], [0], [1], [0, 0, 1, 1], [], []>} : vector<1x128xbf16>, vector<128x128xbf16>, vector<1x128xf32> -> vector<1x128xf32>
    %c0_23 = arith.constant 0 : index
    %c0_24 = arith.constant 0 : index
    %29 = vector.load %arg5[%c0_23, %c0_24] : memref<1x128xf32, #tpu.memory_space<vmem>>, vector<1x128xf32>
    %30 = arith.addf %28, %29 : vector<1x128xf32>
    %cst_25 = arith.constant 0.000000e+00 : f32
    %31 = vector.broadcast %cst_25 : f32 to vector<1x128xf32>
    %32 = arith.maximumf %30, %31 : vector<1x128xf32>
    %33 = arith.truncf %32 : vector<1x128xf32> to vector<1x128xbf16>
    %c0_26 = arith.constant 0 : index
    %c0_27 = arith.constant 0 : index
    %34 = vector.load %arg6[%c0_26, %c0_27] : memref<128x128xbf16, #tpu.memory_space<vmem>>, vector<128x128xbf16>
    %cst_28 = arith.constant dense<0.000000e+00> : vector<1x128xf32>
    %35 = tpu.matmul %33, %34, %cst_28 {dimension_numbers = #tpu.dot_dimension_numbers<[1], [0], [0], [1], [0, 0, 1, 1], [], []>} : vector<1x128xbf16>, vector<128x128xbf16>, vector<1x128xf32> -> vector<1x128xf32>
    %c0_29 = arith.constant 0 : index
    %c0_30 = arith.constant 0 : index
    %36 = vector.load %arg7[%c0_29, %c0_30] : memref<1x128xf32, #tpu.memory_space<vmem>>, vector<1x128xf32>
    %37 = arith.addf %35, %36 : vector<1x128xf32>
    %cst_31 = arith.constant 0.000000e+00 : f32
    %38 = vector.broadcast %cst_31 : f32 to vector<1x128xf32>
    %39 = arith.maximumf %37, %38 : vector<1x128xf32>
    %40 = arith.truncf %39 : vector<1x128xf32> to vector<1x128xbf16>
    %c0_32 = arith.constant 0 : index
    %c0_33 = arith.constant 0 : index
    %41 = vector.load %arg8[%c0_32, %c0_33] : memref<128x128xbf16, #tpu.memory_space<vmem>>, vector<128x128xbf16>
    %cst_34 = arith.constant dense<0.000000e+00> : vector<1x128xf32>
    %42 = tpu.matmul %40, %41, %cst_34 {dimension_numbers = #tpu.dot_dimension_numbers<[1], [0], [0], [1], [0, 0, 1, 1], [], []>} : vector<1x128xbf16>, vector<128x128xbf16>, vector<1x128xf32> -> vector<1x128xf32>
    %c0_35 = arith.constant 0 : index
    %c0_36 = arith.constant 0 : index
    %43 = vector.load %arg9[%c0_35, %c0_36] : memref<1x128xf32, #tpu.memory_space<vmem>>, vector<1x128xf32>
    %44 = arith.addf %42, %43 : vector<1x128xf32>
    %c0_37 = arith.constant 0 : index
    %c0_38 = arith.constant 0 : index
    %c0_39 = arith.constant 0 : index
    %45 = vector.load %arg10[%c0_37, %c0_38, %c0_39] : memref<1x1x128xf32, #tpu.memory_space<vmem>>, vector<1x1x128xf32>
    %46 = vector.shape_cast %45 : vector<1x1x128xf32> to vector<1x128xf32>
    %47 = vector.shape_cast %44 : vector<1x128xf32> to vector<1x1x128xf32>
    tpu.vector_store %arg10[%c0_37, %c0_38, %c0_39], %47 {strides = array<i32>} : memref<1x1x128xf32, #tpu.memory_space<vmem>>, vector<1x1x128xf32>,
    return
  }
  func.func @transform_0(%arg0: i32) -> (i32, i32, i32) {
    %c0_i32 = arith.constant 0 : i32
    %c0_i32_0 = arith.constant 0 : i32
    %c0_i32_1 = arith.constant 0 : i32
    return %arg0, %c0_i32, %c0_i32_0 : i32, i32, i32
  }
  func.func @transform_1(%arg0: i32) -> (i32, i32, i32) {
    %c0_i32 = arith.constant 0 : i32
    %c0_i32_0 = arith.constant 0 : i32
    %c0_i32_1 = arith.constant 0 : i32
    %c0_i32_2 = arith.constant 0 : i32
    return %c0_i32, %c0_i32_0, %c0_i32_1 : i32, i32, i32
  }
  func.func @transform_2(%arg0: i32) -> (i32, i32) {
    %c0_i32 = arith.constant 0 : i32
    %c0_i32_0 = arith.constant 0 : i32
    %c0_i32_1 = arith.constant 0 : i32
    return %c0_i32, %c0_i32_0 : i32, i32
  }
  func.func @transform_3(%arg0: i32) -> (i32, i32) {
    %c0_i32 = arith.constant 0 : i32
    %c0_i32_0 = arith.constant 0 : i32
    %c0_i32_1 = arith.constant 0 : i32
    return %c0_i32, %c0_i32_0 : i32, i32
  }
  func.func @transform_4(%arg0: i32) -> (i32, i32) {
    %c0_i32 = arith.constant 0 : i32
    %c0_i32_0 = arith.constant 0 : i32
    %c0_i32_1 = arith.constant 0 : i32
    return %c0_i32, %c0_i32_0 : i32, i32
  }
  func.func @transform_5(%arg0: i32) -> (i32, i32) {
    %c0_i32 = arith.constant 0 : i32
    %c0_i32_0 = arith.constant 0 : i32
    %c0_i32_1 = arith.constant 0 : i32
    return %c0_i32, %c0_i32_0 : i32, i32
  }
  func.func @transform_6(%arg0: i32) -> (i32, i32) {
    %c0_i32 = arith.constant 0 : i32
    %c0_i32_0 = arith.constant 0 : i32
    %c0_i32_1 = arith.constant 0 : i32
    return %c0_i32, %c0_i32_0 : i32, i32
  }
  func.func @transform_7(%arg0: i32) -> (i32, i32) {
    %c0_i32 = arith.constant 0 : i32
    %c0_i32_0 = arith.constant 0 : i32
    %c0_i32_1 = arith.constant 0 : i32
    return %c0_i32, %c0_i32_0 : i32, i32
  }
  func.func @transform_8(%arg0: i32) -> (i32, i32) {
    %c0_i32 = arith.constant 0 : i32
    %c0_i32_0 = arith.constant 0 : i32
    %c0_i32_1 = arith.constant 0 : i32
    return %c0_i32, %c0_i32_0 : i32, i32
  }
  func.func @transform_9(%arg0: i32) -> (i32, i32, i32) {
    %c0_i32 = arith.constant 0 : i32
    %c0_i32_0 = arith.constant 0 : i32
    %c0_i32_1 = arith.constant 0 : i32
    return %arg0, %c0_i32, %c0_i32_0 : i32, i32, i32
  }
}

</mosaic_0001>

<bundles_post_ra>
// kernel: quantized_alexnet_forward.5
= control target key start
LH: loop header
LB: loop body
LE: loop exit
PB: predicated region body
PF: predicated region fallthrough
CT: control target
= control target key end

     0   :  { %s7161_s12 = smov 0   ;;  %s8712_s0 = inlined_call_operand.vmem [shape: bf16[2,1020,128], index: 0, kind: input, shape index: {}]   ;;  %s8713_s1 = inlined_call_operand.vmem [shape: bf16[11,128,128], index: 1, kind: input, shape index: {}]   ;;  %s8714_s2 = inlined_call_operand.vmem [shape: f32[1,128], index: 2, kind: input, shape index: {}]   ;;  %s8715_s3 = inlined_call_operand.vmem [shape: bf16[2,225,128], index: 3, kind: output, shape index: {}]  }
   0x1 LB: > { %s5196_s13 = sadd.s32 4294967295, %s7137_s12   ;;  %p5200_p0 = scmp.ge.s32.totalorder %s7137_s12, 1  ;;  %s7137_s12 = sphi %s7161_s12, %s13_s12  }
   0x2   : > { %p137_p1 = scmp.lt.s32.totalorder %s7137_s12, 3 }
   0x4   : > { %p138_p2 = pnand %p5200_p0, %p137_p1 }
   0x5   : > { %p161_p3 = scmp.lt.s32.totalorder (!%p138_p2), %s5196_s13, 1 }
   0x6   : > { %141 = sbr.rel (%p138_p2) target bundleno = 903 (0x387), region = 32 }
   0xb   : > { %v6878_v0 = vld [vmem:[%s8713_s1 + $0x78] sm:$0xff]   ;;  %v7139_v1 = vmov 0.0   ;;  %v6879_v2 = vld [vmem:[%s8713_s1 + $0x70] sm:$0xff]   ;;  %vm7140_vm0 = vmmov 0   ;;  %s8717_s13 = smov (!%p161_p3, %s5196_s13), 1  ;;  %v6880_v3 = vld [vmem:[%s8713_s1 + $0x68] sm:$0xff]  }
   0xc   : > { %6015 = vmatprep.subr.bf16.mxu0 %v7139_v1  ;;  %6851 = vmatprep.subr.bf16.mxu1 %v7139_v1  ;;  %s5649_s20 = sshll.u32 %s8717_s13, 9  ;;  %v6881_v4 = vld [vmem:[%s8713_s1 + $0x60] sm:$0xff]   ;;  %v6882_v9 = vld [vmem:[%s8713_s1 + $0x58] sm:$0xff]   ;;  %v6883_v17 = vld [vmem:[%s8713_s1 + $0x50] sm:$0xff]   ;;  %vm336_vm1 = vsmask.f32 4352 }
   0xd   : > { %6016 = vmatpush3.bf16.msra.mxu0 %v6878_v0  ;;  %6859 = vmatpush3.bf16.msra.mxu1 %v6878_v0  ;;  %s7194_s23 = scalar_lea.vmem %s8712_s0, %s5649_s20  ;;  %v6884_v21 = vld [vmem:[%s8713_s1 + $0x48] sm:$0xff]   ;;  %v6885_v30 = vld [vmem:[%s8713_s1 + $0x40] sm:$0xff]   ;;  %v6890_v40 = vld [vmem:[%s8713_s1 + $0xb8] sm:$0xff]   ;;  %vm1093_vm2 = vcmask 1044480   ;;  %vm1486_vm3 = vsmask.f32 5376 }
   0xe   : > { %6017 = vmatprep.subr.bf16.mxu0 %v7139_v1  ;;  %6852 = vmatprep.subr.bf16.mxu1 %v7139_v1  ;;  %v6886_v5 = vld [vmem:[%s7194_s23 + $0x7c] sm:$0xf8]   ;;  %v6887_v6 = vld [vmem:[%s7194_s23 + $0x84] sm:$0xff]   ;;  %v6892_v27 = vld [vmem:[%s7194_s23 + $0x8c] sm:$0xff]   ;;  %vm3370_vm4 = vcmask 1045504   ;;  %s6867_s27 = smul.u32 116, %s8717_s13 }
   0xf   : > { %6031 = vmatprep.mubr.msk.bf16.mxu0 %vm7140_vm0, %v7139_v1  ;;  %6063 = vmatprep.mubr.msk.bf16.mxu1 %vm7140_vm0, %v7139_v1  ;;  %v6888_v7 = vld [vmem:[%s7194_s23 + $0xbc] sm:$0xff]   ;;  %v6889_v8 = vld [vmem:[%s7194_s23 + $0xc4] sm:$0xff]   ;;  %v338_v10 = vshrl.u32 %v6886_v5, 16  ;;  %v341_v11 = vshll.u32 %v6886_v5, 16  ;;  %v346_v12 = vshrl.u32 %v6887_v6, 16  ;;  %v349_v13 = vshll.u32 %v6887_v6, 16 }
  0x10   : > { %v409_v14 = vshrl.u32 %v6888_v7, 16  ;;  %v412_v15 = vshll.u32 %v6888_v7, 16  ;;  %v418_v16 = vshrl.u32 %v6889_v8, 16  ;;  %v421_v20 = vshll.u32 %v6889_v8, 16  ;;  %v6893_v29 = vld [vmem:[%s7194_s23 + $0xcc] sm:$0xff]   ;;  %v6896_v39 = vld [vmem:[%s7194_s23 + $0x94] sm:$0xff]   ;;  %s8638_s30 = scalar_lea.vmem %s8715_s3, %s6867_s27 }
  0x11   : > { %6018 = vmatpush3.bf16.msra.mxu0 %v6879_v2  ;;  %6860 = vmatpush3.bf16.msra.mxu1 %v6879_v2  ;;  %v340_v18 = vrot.slane %v338_v10, 3  ;;  %v343_v19 = vrot.slane %v341_v11, 4  ;;  %v348_v22 = vrot.slane %v346_v12, 3  ;;  %v351_v23 = vrot.slane %v349_v13, 4  ;;  %v6897_v43 = vld [vmem:[%s7194_s23 + $0xd4] sm:$0xff]   ;;  %v6900_v56 = vld [vmem:[%s7194_s23 + $0x9c] sm:$0xff]  }
  0x12   : > { %6019 = vmatprep.subr.bf16.mxu0 %v7139_v1  ;;  %6853 = vmatprep.subr.bf16.mxu1 %v7139_v1  ;;  %v411_v24 = vrot.slane %v409_v14, 3  ;;  %v414_v25 = vrot.slane %v412_v15, 4  ;;  %v420_v26 = vrot.slane %v418_v16, 3  ;;  %v423_v28 = vrot.slane %v421_v20, 4  ;;  %v6891_v48 = vld [vmem:[%s8713_s1 + $0x38] sm:$0xff]   ;;  %v6894_v49 = vld [vmem:[%s8713_s1 + $0xb0] sm:$0xff]  }
  0x13   : > { %v344_v31 = vor.u32 %v343_v19, %v340_v18  ;;  %v352_v32 = vor.u32 %v351_v23, %v348_v22  ;;  %v355_v33 = vshrl.u32 %v6892_v27, 16  ;;  %v358_v34 = vshll.u32 %v6892_v27, 16  ;;  %v6895_v57 = vld [vmem:[%s8713_s1 + $0x30] sm:$0xff]   ;;  %v6901_v58 = vld [vmem:[%s7194_s23 + $0xdc] sm:$0xff]   ;;  %v6904_v13 = vld [vmem:[%s7194_s23 + $0xa4] sm:$0xff]  }
  0x14   : > { %v7225_v35 = vor.u32 %v414_v25, %v411_v24  ;;  %v424_v36 = vor.u32 %v423_v28, %v420_v26  ;;  %v427_v37 = vshrl.u32 %v6893_v29, 16  ;;  %v430_v38 = vshll.u32 %v6893_v29, 16  ;;  %v6902_v8 = vld [vmem:[%s8713_s1 + $0xa0] sm:$0xff]   ;;  %v6907_v23 = vld [vmem:[%s8713_s1 + $0x18] sm:$0xff]   ;;  %v6910_v29 = vld [vmem:[%s8713_s1 + $0x90] sm:$0xff]  }
  0x15   : > { %6020 = vmatpush3.bf16.msra.mxu0 %v6880_v3  ;;  %6861 = vmatpush3.bf16.msra.mxu1 %v6880_v3  ;;  %v357_v41 = vrot.slane %v355_v33, 3  ;;  %v360_v42 = vrot.slane %v358_v34, 4  ;;  %v353_v44 = vsel %vm336_vm1, %v344_v31, %v352_v32  ;;  %v364_v50 = vshrl.u32 %v6896_v39, 16  ;;  %v6898_v3 = vld [vmem:[%s8713_s1 + $0xa8] sm:$0xff]   ;;  %v6903_v12 = vld [vmem:[%s8713_s1 + $0x20] sm:$0xff]   ;;  %v6911_v31 = vld [vmem:[%s8713_s1 + $0x10] sm:$0xff]  }
  0x16   : > { %6021 = vmatprep.subr.bf16.mxu0 %v7139_v1  ;;  %6854 = vmatprep.subr.bf16.mxu1 %v7139_v1  ;;  %v425_v45 = vsel %vm336_vm1, %v7225_v35, %v424_v36  ;;  %v429_v46 = vrot.slane %v427_v37, 3  ;;  %v432_v47 = vrot.slane %v430_v38, 4  ;;  %v367_v51 = vshll.u32 %v6896_v39, 16  ;;  %v6908_v33 = vld [vmem:[%s7194_s23 + $0xac] sm:$0xff]  }
  0x17   : > { %v436_v52 = vshrl.u32 %v6897_v43, 16  ;;  %v361_v53 = vor.u32 %v360_v42, %v357_v41  ;;  %v439_v55 = vshll.u32 %v6897_v43, 16  ;;  %v366_v59 = vrot.slane %v364_v50, 3  ;;  %v6909_v34 = vld [vmem:[%s7194_s23 + $0xec] ss:$0 sps:$4 sm:$0xff]  }
  0x18   : > { %v433_v54 = vor.u32 %v432_v47, %v429_v46  ;;  %v369_v60 = vrot.slane %v367_v51, 4  ;;  %v373_v2 = vshrl.u32 %v6900_v56, 16  ;;  %v376_v5 = vshll.u32 %v6900_v56, 16  ;;  %v6913_v39 = vld [vmem:[%s8713_s1 + $0x8] sm:$0xff]   ;;  %v6915_v47 = vld [vmem:[%s8713_s1] sm:$0xff]   ;;  %v6912_v51 = vld [vmem:[%s7194_s23 + $0xb4] sm:$0xff]  }
  0x19   : > { %6022 = vmatpush3.bf16.msra.mxu0 %v6881_v4  ;;  %6862 = vmatpush3.bf16.msra.mxu1 %v6881_v4  ;;  %v438_v61 = vrot.slane %v436_v52, 3  ;;  %v362_v62 = vsel %vm336_vm1, %v352_v32, %v361_v53  ;;  %v441_v0 = vrot.slane %v439_v55, 4  ;;  %v6899_v4 = vld [vmem:[%s8713_s1 + $0x28] sm:$0xff]   ;;  %v445_v6 = vshrl.u32 %v6901_v58, 16 }
  0x1a   : > { %6023 = vmatprep.subr.bf16.mxu0 %v7139_v1  ;;  %6855 = vmatprep.subr.bf16.mxu1 %v7139_v1  ;;  %v434_v63 = vsel %vm336_vm1, %v424_v36, %v433_v54  ;;  %v448_v7 = vshll.u32 %v6901_v58, 16  ;;  %v375_v11 = vrot.slane %v373_v2, 3  ;;  %v378_v14 = vrot.slane %v376_v5, 4 }
  0x1b   : > { %v442_v10 = vor.u32 %v441_v0, %v438_v61  ;;  %v447_v15 = vrot.slane %v445_v6, 3  ;;  %v382_v20 = vshrl.u32 %v6904_v13, 16  ;;  %v385_v22 = vshll.u32 %v6904_v13, 16  ;;  %v6921_v6 = vld [vmem:[%s7194_s23 + $0x104] sm:$0xff]   ;;  %v6924_v13 = vld [vmem:[%s7194_s23 + $0x10c] sm:$0xff]  }
  0x1c   : > { %v450_v16 = vrot.slane %v448_v7, 4  ;;  %v379_v26 = vor.u32 %v378_v14, %v375_v11  ;;  %v391_v41 = vshrl.u32 %v6908_v33, 16  ;;  %v394_v42 = vshll.u32 %v6908_v33, 16  ;;  %v6918_v7 = vld [vmem:[%s8713_s1 + $0xf8] sm:$0xff]   ;;  %v6931_v14 = vld [vmem:[%s8713_s1 + $0xe8] sm:$0xff]   ;;  %v6961_v33 = vld [vmem:[%s8713_s1 + $0xc0] sm:$0xff]  }
  0x1d   : > { %6024 = vmatpush3.bf16.msra.mxu0 %v6882_v9  ;;  %6863 = vmatpush3.bf16.msra.mxu1 %v6882_v9  ;;  %v370_v9 = vor.u32 %v369_v60, %v366_v59  ;;  %v443_v19 = vsel %vm336_vm1, %v433_v54, %v442_v10  ;;  %v384_v28 = vrot.slane %v382_v20, 3  ;;  %v463_v43 = vshrl.u32 %v6909_v34, 16  ;;  %v6927_v20 = vld [vmem:[%s7194_s23 + $0x114] sm:$0xff]  }
  0x1e   : > { %6025 = vmatprep.subr.bf16.mxu0 %v7139_v1  ;;  %6856 = vmatprep.subr.bf16.mxu1 %v7139_v1  ;;  %v451_v27 = vor.u32 %v450_v16, %v447_v15  ;;  %v466_v46 = vshll.u32 %v6909_v34, 16  ;;  %v396_v50 = vrot.slane %v394_v42, 4  ;;  %v400_v58 = vshrl.u32 %v6912_v51, 16  ;;  %v6928_v16 = vld [vmem:[%s8713_s1 + $0x130] sm:$0xff]   ;;  %v6929_v34 = vld [vmem:[%s7194_s23 + $0x20] sm:$0xff]  }
  0x1f   : > { %v371_v18 = vsel %vm336_vm1, %v361_v53, %v370_v9  ;;  %v380_v36 = vsel %vm336_vm1, %v370_v9, %v379_v26  ;;  %v465_v54 = vrot.slane %v463_v43, 3  ;;  %v403_v59 = vshll.u32 %v6912_v51, 16  ;;  %v6936_v42 = vld [vmem:[%s7194_s23 + $0x12c] sm:$0xff]  }
  0x20   : > { %v452_v37 = vsel %vm336_vm1, %v442_v10, %v451_v27  ;;  %v468_v55 = vrot.slane %v466_v46, 4  ;;  %v1095_v9 = vrot.slane %v6921_v6, 3  ;;  %v6919_v10 = vld [vmem:[%s7194_s23 + $0x8] sm:$0xff]   ;;  %v1097_v15 = vrot.slane %v6924_v13, 3  ;;  %v6940_v46 = vld [vmem:[%s7194_s23 + $0x134] sm:$0xff]  }
  0x21   : > { %6026 = vmatpush3.bf16.msra.mxu0 %v6883_v17  ;;  %6864 = vmatpush3.bf16.msra.mxu1 %v6883_v17  ;;  %v6905_v17 = vld [vmem:[%s7194_s23 + $0xe4] sm:$0xff]   ;;  %vm5135_vm5 = vcmask 1040384   ;;  %vm5136_vm6 = vsmask.f32 256 }
  0x22   : > { %6027 = vmatprep.subr.bf16.mxu0 %v7139_v1  ;;  %6857 = vmatprep.subr.bf16.mxu1 %v7139_v1  ;;  %v454_v24 = vshrl.u32 %v6905_v17, 16  ;;  %v457_v25 = vshll.u32 %v6905_v17, 16  ;;  %v6937_v17 = vld [vmem:[%s8713_s1 + $0xe0] sm:$0xff]   ;;  %vm5137_vm7 = vmand %vm5135_vm5, %vm5136_vm6 }
  0x24   : > { %v456_v32 = vrot.slane %v454_v24, 3  ;;  %v459_v38 = vrot.slane %v457_v25, 4  ;;  %v6938_v24 = vld [vmem:[%s8713_s1 + $0x120] sm:$0xff]   ;;  %v6949_v25 = vld [vmem:[%s8713_s1 + $0xd0] sm:$0xff]  }
  0x25   : > { %6028 = vmatpush3.bf16.msra.mxu0 %v6884_v21  ;;  %6865 = vmatpush3.bf16.msra.mxu1 %v6884_v21  ;;  %v6906_v21 = vld [vmem:[%s8713_s1 + $0x98] sm:$0xff]  }
  0x26   : > { %6029 = vmatprep.subr.bf16.mxu0 %v7139_v1  ;;  %6858 = vmatprep.subr.bf16.mxu1 %v7139_v1 }
  0x29   : > { %6030 = vmatpush3.bf16.msra.mxu0 %v6885_v30  ;;  %6866 = vmatpush3.bf16.msra.mxu1 %v6885_v30  ;;  %v387_v30 = vrot.slane %v385_v22, 4  ;;  %v6943_v22 = vld [vmem:[%s8713_s1 + $0xd8] sm:$0xff]  }
  0x2a   : > { %6167 = vmatprep.subr.bf16.mxu0 %v7139_v1  ;;  %6091 = vmatprep.subr.bf16.mxu1 %v7139_v1 }
  0x2c   : > { %6032 = vmatmul.mubr.bf16.vlgmr.msra.gmra.mxu0 %v353_v44  ;;  %6064 = vmatmul.mubr.bf16.vlgmr.msra.gmra.mxu1 %v425_v45  ;;  %v388_v44 = vor.u32 %v387_v30, %v384_v28  ;;  %v460_v45 = vor.u32 %v459_v38, %v456_v32  ;;  %v6930_v28 = vld [vmem:[%s7194_s23 + $0x11c] sm:$0xff]   ;;  %v6955_v30 = vld [vmem:[%s8713_s1 + $0xc8] sm:$0xff]   ;;  %v6950_v32 = vld [vmem:[%s8713_s1 + $0x110] sm:$0xff]  }
  0x2d   : > { %6168 = vmatpush3.bf16.msra.mxu0 %v6890_v40  ;;  %6035 = vmatprep.mubr.msk.bf16.mxu0 %vm7140_vm0, %v7139_v1  ;;  %v6914_v40 = vld [vmem:[%s8713_s1 + $0x88] sm:$0xff]  }
  0x2e   : > { %6067 = vmatprep.mubr.msk.bf16.mxu1 %vm7140_vm0, %v7139_v1  ;;  %6092 = vmatpush3.bf16.msra.mxu1 %v6891_v48  ;;  %v6917_v48 = vld [vmem:[%s8713_s1 + $0x80] sm:$0xff]   ;;  %v389_v52 = vsel %vm336_vm1, %v379_v26, %v388_v44  ;;  %v461_v53 = vsel %vm336_vm1, %v451_v27, %v460_v45  ;;  %v6926_v26 = vld [vmem:[%s7194_s23 + $0x18] sm:$0xff]   ;;  %v6956_v38 = vld [vmem:[%s8713_s1 + $0x108] sm:$0xff]  }
  0x2f   : > { %6169 = vmatprep.subr.bf16.mxu0 %v7139_v1  ;;  %6093 = vmatprep.subr.bf16.mxu1 %v7139_v1 }
  0x31   : > { %6170 = vmatpush3.bf16.msra.mxu0 %v6894_v49  ;;  %v393_v49 = vrot.slane %v391_v41, 3  ;;  %v6933_v41 = vld [vmem:[%s7194_s23 + $0x28] sm:$0xff]  }
  0x32   : > { %6094 = vmatpush3.bf16.msra.mxu1 %v6895_v57  ;;  %6171 = vmatprep.subr.bf16.mxu0 %v7139_v1  ;;  %v469_v57 = vor.u32 %v468_v55, %v465_v54 }
  0x33   : > { %6095 = vmatprep.subr.bf16.mxu1 %v7139_v1  ;;  %v397_v56 = vor.u32 %v396_v50, %v393_v49  ;;  %v6939_v49 = vld [vmem:[%s7194_s23 + $0x38] sm:$0xff]  }
  0x34   : > { %6036 = vmatmul.mubr.bf16.gmra.mxu0 %v362_v62  ;;  %6068 = vmatmul.mubr.bf16.gmra.mxu1 %v434_v63  ;;  %v470_v61 = vsel %vm336_vm1, %v460_v45, %v469_v57  ;;  %v402_v62 = vrot.slane %v400_v58, 3  ;;  %v405_v63 = vrot.slane %v403_v59, 4  ;;  %v6935_v45 = vld [vmem:[%s7194_s23 + $0x30] sm:$0xff]   ;;  %v6942_v50 = vld [vmem:[%s7194_s23 + $0x13c] sm:$0xff]   ;;  %v6945_v57 = vld [vmem:[%s7194_s23 + $0x48] sm:$0xff]  }
  0x35   : > { %6039 = vmatprep.mubr.msk.bf16.mxu0 %vm7140_vm0, %v7139_v1  ;;  %6071 = vmatprep.mubr.msk.bf16.mxu1 %vm7140_vm0, %v7139_v1  ;;  %v398_v60 = vsel %vm336_vm1, %v388_v44, %v397_v56  ;;  %v1105_v44 = vrot.slane %v6936_v42, 3  ;;  %v6948_v58 = vld [vmem:[%s7194_s23 + $0x14c] sm:$0xff]  }
  0x36   : > { %6172 = vmatpush3.bf16.msra.mxu0 %v6898_v3  ;;  %6096 = vmatpush3.bf16.msra.mxu1 %v6899_v4  ;;  %v406_v0 = vor.u32 %v405_v63, %v402_v62  ;;  %v6916_v3 = vld [vmem:[%s7194_s23] sm:$0xff]   ;;  %v6952_v63 = vld [vmem:[%s7194_s23 + $0x154] sm:$0xff]  }
  0x37   : > { %6173 = vmatprep.subr.bf16.mxu0 %v7139_v1  ;;  %6097 = vmatprep.subr.bf16.mxu1 %v7139_v1  ;;  %v6920_v4 = vld [vmem:[%s7194_s23 + $0xfc] sm:$0xf8]  }
  0x38   : > { %v407_v2 = vsel %vm336_vm1, %v397_v56, %v406_v0  ;;  %v416_v5 = vsel %vm336_vm1, %v406_v0, %v7225_v35  ;;  %v6925_v35 = vld [vmem:[%s8713_s1 + $0xf0] sm:$0xff]   ;;  %v1115_v0 = vrot.slane %v6952_v63, 3 }
  0x3a   : > { %6174 = vmatpush3.bf16.msra.mxu0 %v6902_v8  ;;  %6098 = vmatpush3.bf16.msra.mxu1 %v6903_v12  ;;  %v1094_v8 = vrot.slane %v6920_v4, 3  ;;  %v6922_v12 = vld [vmem:[%s8713_s1 + $0x138] sm:$0xff]  }
  0x3b   : > { %6175 = vmatprep.subr.bf16.mxu0 %v7139_v1  ;;  %6099 = vmatprep.subr.bf16.mxu1 %v7139_v1 }
  0x3c   : > { %6040 = vmatmul.mubr.bf16.gmra.mxu0 %v371_v18  ;;  %6072 = vmatmul.mubr.bf16.gmra.mxu1 %v443_v19  ;;  %v1096_v11 = vsel %vm1093_vm2, %v1094_v8, %v1095_v9  ;;  %v6923_v18 = vld [vmem:[%s7194_s23 + $0x10] sm:$0xff]   ;;  %v1098_v19 = vsel %vm1093_vm2, %v1095_v9, %v1097_v15  ;;  %v6953_v8 = vld [vmem:[%s7194_s23 + $0x60] sm:$0xff]  }
  0x3d   : > { %6043 = vmatprep.mubr.msk.bf16.mxu0 %vm7140_vm0, %v7139_v1  ;;  %6075 = vmatprep.mubr.msk.bf16.mxu1 %vm7140_vm0, %v7139_v1 }
  0x3e   : > { %6176 = vmatpush3.bf16.msra.mxu0 %v6906_v21  ;;  %6100 = vmatpush3.bf16.msra.mxu1 %v6907_v23  ;;  %v6932_v21 = vld [vmem:[%s8713_s1 + $0x128] sm:$0xff]   ;;  %v1099_v23 = vrot.slane %v6927_v20, 3 }
  0x3f   : > { %6177 = vmatprep.subr.bf16.mxu0 %v7139_v1  ;;  %6101 = vmatprep.subr.bf16.mxu1 %v7139_v1  ;;  %v6966_v20 = vld [vmem:[%s7194_s23 + $0x18c] sm:$0xff]  }
  0x40   : > { %v1100_v27 = vsel %vm1093_vm2, %v1097_v15, %v1099_v23  ;;  %v6957_v15 = vld [vmem:[%s7194_s23 + $0x68] sm:$0xff]  }
  0x42   : > { %6178 = vmatpush3.bf16.msra.mxu0 %v6910_v29  ;;  %6102 = vmatpush3.bf16.msra.mxu1 %v6911_v31  ;;  %v6944_v29 = vld [vmem:[%s8713_s1 + $0x118] sm:$0xff]   ;;  %v1101_v31 = vrot.slane %v6930_v28, 3  ;;  %v1505_v28 = vshrl.u32 %v6966_v20, 16 }
  0x43   : > { %6103 = vmatprep.subr.bf16.mxu1 %v7139_v1  ;;  %6179 = vmatprep.subr.bf16.mxu0 %v7139_v1 }
  0x44   : > { %6044 = vmatmul.mubr.bf16.gmra.mxu0 %v380_v36  ;;  %6076 = vmatmul.mubr.bf16.gmra.mxu1 %v452_v37  ;;  %v1102_v36 = vsel %vm1093_vm2, %v1099_v23, %v1101_v31  ;;  %v6934_v37 = vld [vmem:[%s7194_s23 + $0x124] sm:$0xff]  }
  0x45   : > { %6047 = vmatprep.mubr.msk.bf16.mxu0 %vm7140_vm0, %v7139_v1  ;;  %6079 = vmatprep.mubr.msk.bf16.mxu1 %vm7140_vm0, %v7139_v1 }
  0x46   : > { %6104 = vmatpush3.bf16.msra.mxu1 %v6913_v39  ;;  %6180 = vmatpush3.bf16.msra.mxu0 %v6914_v40  ;;  %v1103_v39 = vrot.slane %v6934_v37, 3  ;;  %v6962_v40 = vld [vmem:[%s8713_s1 + $0x100] sm:$0xff]   ;;  %v1507_v37 = vrot.slane %v1505_v28, 2 }
  0x47   : > { %6105 = vmatprep.subr.bf16.mxu1 %v7139_v1  ;;  %6181 = vmatprep.subr.bf16.mxu0 %v7139_v1 }
  0x48   : > { %v1104_v43 = vsel %vm1093_vm2, %v1101_v31, %v1103_v39 }
  0x4a   : > { %6106 = vmatpush3.bf16.msra.mxu1 %v6915_v47  ;;  %6182 = vmatpush3.bf16.msra.mxu0 %v6917_v48  ;;  %v1106_v47 = vsel %vm1093_vm2, %v1103_v39, %v1105_v44  ;;  %v1107_v48 = vrot.slane %v6940_v46, 3  ;;  %v6965_v46 = vld [vmem:[%s8713_s1 + $0x178] sm:$0xff]  }
  0x4b   : > { %6243 = vmatprep.subr.bf16.mxu1 %v7139_v1  ;;  %6319 = vmatprep.subr.bf16.mxu0 %v7139_v1 }
  0x4c   : > { %6048 = vmatmul.mubr.bf16.gmra.mxu0 %v389_v52  ;;  %6080 = vmatmul.mubr.bf16.gmra.mxu1 %v461_v53  ;;  %v1108_v51 = vsel %vm1093_vm2, %v1105_v44, %v1107_v48  ;;  %v1109_v52 = vrot.slane %v6942_v50, 3  ;;  %v6941_v53 = vld [vmem:[%s7194_s23 + $0x40] sm:$0xff]  }
  0x4d   : > { %6051 = vmatprep.mubr.msk.bf16.mxu0 %vm7140_vm0, %v7139_v1  ;;  %6083 = vmatprep.mubr.msk.bf16.mxu1 %vm7140_vm0, %v7139_v1 }
  0x4e   : > { %v1110_v55 = vsel %vm1093_vm2, %v1107_v48, %v1109_v52 }
  0x54   : > { %6052 = vmatmul.mubr.bf16.gmra.mxu0 %v398_v60  ;;  %6084 = vmatmul.mubr.bf16.gmra.mxu1 %v470_v61  ;;  %v1113_v60 = vrot.slane %v6948_v58, 3  ;;  %v6947_v61 = vld [vmem:[%s7194_s23 + $0x50] sm:$0xff]  }
  0x55   : > { %6055 = vmatprep.mubr.msk.bf16.mxu0 %vm7140_vm0, %v7139_v1  ;;  %6087 = vmatprep.mubr.msk.bf16.mxu1 %vm7140_vm0, %v7139_v1 }
  0x56   : > { %v1116_v4 = vsel %vm1093_vm2, %v1113_v60, %v1115_v0 }
  0x5c   : > { %6056 = vmatmul.mubr.bf16.gmra.mxu0 %v407_v2  ;;  %6088 = vmatmul.mubr.bf16.gmra.mxu1 %v465_v54  ;;  %v6946_v54 = vld [vmem:[%s7194_s23 + $0x144] sm:$0xff]   ;;  %v6951_v2 = vld [vmem:[%s7194_s23 + $0x58] sm:$0xff]  }
  0x5d   : > { %6059 = vmatprep.mubr.msk.bf16.mxu0 %vm7140_vm0, %v7139_v1  ;;  %6107 = vmatprep.mubr.msk.bf16.mxu1 %vm7140_vm0, %v7139_v1  ;;  %v1111_v56 = vrot.slane %v6946_v54, 3 }
  0x5f   : > { %v1112_v59 = vsel %vm1093_vm2, %v1109_v52, %v1111_v56  ;;  %v1114_v62 = vsel %vm1093_vm2, %v1111_v56, %v1113_v60  ;;  %v6974_v60 = vld [vmem:[%s7194_s23 + $0x1c] sm:$0xff]  }
  0x64   : > { %6060 = vmatmul.mubr.bf16.gmra.mxu0 %v416_v5  ;;  %6108 = vmatmul.mubr.bf16.vlgmr.msra.gmra.mxu1 %v6916_v3  ;;  %v6954_v3 = vld [vmem:[%s7194_s23 + $0x15c] sm:$0xff]   ;;  %v6958_v5 = vld [vmem:[%s7194_s23 + $0x164] sm:$0xff]  }
  0x65   : > { %6111 = vmatprep.mubr.msk.bf16.mxu1 %vm7140_vm0, %v7139_v1  ;;  %6183 = vmatprep.mubr.msk.bf16.mxu0 %vm7140_vm0, %v7139_v1  ;;  %v1117_v6 = vrot.slane %v6954_v3, 3  ;;  %v1119_v9 = vrot.slane %v6958_v5, 3  ;;  %v2011_v5 = vshrl.u32 %v6974_v60, 16 }
  0x66   : > { %6244 = vmatpush3.bf16.msra.mxu1 %v6918_v7  ;;  %v6960_v7 = vld [vmem:[%s7194_s23 + $0x16c] ss:$0 sps:$4 sm:$0xff]  }
  0x67   : > { %6245 = vmatprep.subr.bf16.mxu1 %v7139_v1 }
  0x6a   : > { %6246 = vmatpush3.bf16.msra.mxu1 %v6925_v35  ;;  %v6963_v35 = vld [vmem:[%s7194_s23 + $0x17c] sm:$0xfc]  }
  0x6b   : > { %6247 = vmatprep.subr.bf16.mxu1 %v7139_v1  ;;  %v1488_v13 = vshrl.u32 %v6963_v35, 16 }
  0x6c   : > { %6112 = vmatmul.mubr.bf16.gmra.mxu1 %v6919_v10  ;;  %6184 = vmatmul.mubr.bf16.vlgmr.msra.gmra.mxu0 %v1096_v11  ;;  %v1118_v10 = vsel %vm1093_vm2, %v1115_v0, %v1117_v6  ;;  %v1121_v11 = vrot.slane %v6960_v7, 3  ;;  %v2014_v7 = vshll.u32 %v6974_v60, 16  ;;  %v6983_v60 = vld [vmem:[%s7194_s23 + $0x34] sm:$0xff]  }
  0x6d   : > { %6320 = vmatpush3.bf16.msra.mxu0 %v6922_v12  ;;  %6115 = vmatprep.mubr.msk.bf16.mxu1 %vm7140_vm0, %v7139_v1  ;;  %v6964_v12 = vld [vmem:[%s7194_s23 + $0x184] sm:$0xff]  }
  0x6e   : > { %6187 = vmatprep.mubr.msk.bf16.mxu0 %vm7140_vm0, %v7139_v1  ;;  %6321 = vmatprep.subr.bf16.mxu0 %v7139_v1 }
  0x6f   : > { %6248 = vmatpush3.bf16.msra.mxu1 %v6931_v14  ;;  %v1491_v14 = vshll.u32 %v6963_v35, 16 }
  0x70   : > { %6249 = vmatprep.subr.bf16.mxu1 %v7139_v1 }
  0x71   : > { %6322 = vmatpush3.bf16.msra.mxu0 %v6928_v16  ;;  %v1496_v16 = vshrl.u32 %v6964_v12, 16 }
  0x72   : > { %6323 = vmatprep.subr.bf16.mxu0 %v7139_v1 }
  0x73   : > { %6250 = vmatpush3.bf16.msra.mxu1 %v6937_v17  ;;  %v1499_v17 = vshll.u32 %v6964_v12, 16  ;;  %v1498_v23 = vrot.slane %v1496_v16, 2  ;;  %v6977_v12 = vld [vmem:[%s7194_s23 + $0x24] sm:$0xff]  }
  0x74   : > { %6116 = vmatmul.mubr.bf16.gmra.mxu1 %v6923_v18  ;;  %6188 = vmatmul.mubr.bf16.gmra.mxu0 %v1098_v19  ;;  %v1120_v18 = vsel %vm1093_vm2, %v1117_v6, %v1119_v9  ;;  %v1490_v19 = vrot.slane %v1488_v13, 2  ;;  %v6976_v6 = vld [vmem:[%s7194_s23 + $0x1a4] sm:$0xff]   ;;  %v2013_v13 = vrot.slane %v2011_v5, 3 }
  0x75   : > { %6119 = vmatprep.mubr.msk.bf16.mxu1 %vm7140_vm0, %v7139_v1  ;;  %6191 = vmatprep.mubr.msk.bf16.mxu0 %vm7140_vm0, %v7139_v1  ;;  %v6984_v16 = vld [vmem:[%s8713_s1 + $0x160] sm:$0xff]  }
  0x76   : > { %6324 = vmatpush3.bf16.msra.mxu0 %v6932_v21  ;;  %6251 = vmatprep.subr.bf16.mxu1 %v7139_v1  ;;  %v6959_v21 = vld [vmem:[%s7194_s23 + $0x70] ss:$0 sps:$4 sm:$0x11]  }
  0x77   : > { %6325 = vmatprep.subr.bf16.mxu0 %v7139_v1  ;;  %6252 = vmatpush3.bf16.msra.mxu1 %v6943_v22  ;;  %v1493_v22 = vrot.slane %v1491_v14, 3  ;;  %v2016_v14 = vrot.slane %v2014_v7, 4 }
  0x78   : > { %6253 = vmatprep.subr.bf16.mxu1 %v7139_v1 }
  0x7a   : > { %6326 = vmatpush3.bf16.msra.mxu0 %v6938_v24  ;;  %v1501_v24 = vrot.slane %v1499_v17, 3 }
  0x7b   : > { %6327 = vmatprep.subr.bf16.mxu0 %v7139_v1  ;;  %6254 = vmatpush3.bf16.msra.mxu1 %v6949_v25  ;;  %v6967_v25 = vld [vmem:[%s7194_s23 + $0x4] sm:$0xf8]  }
  0x7c   : > { %6120 = vmatmul.mubr.bf16.gmra.mxu1 %v6926_v26  ;;  %6192 = vmatmul.mubr.bf16.gmra.mxu0 %v1100_v27  ;;  %v6968_v26 = vld [vmem:[%s7194_s23 + $0xc] sm:$0xff]   ;;  %v1122_v27 = vsel %vm1093_vm2, %v1119_v9, %v1121_v11  ;;  %v1988_v31 = vshll.u32 %v6967_v25, 16 }
  0x7d   : > { %6123 = vmatprep.mubr.msk.bf16.mxu1 %vm7140_vm0, %v7139_v1  ;;  %6195 = vmatprep.mubr.msk.bf16.mxu0 %vm7140_vm0, %v7139_v1  ;;  %v1996_v39 = vshll.u32 %v6968_v26, 16  ;;  %v6978_v9 = vld [vmem:[%s8713_s1 + $0x168] sm:$0xff]  }
  0x7e   : > { %6328 = vmatpush3.bf16.msra.mxu0 %v6944_v29  ;;  %6255 = vmatprep.subr.bf16.mxu1 %v7139_v1  ;;  %v1508_v29 = vshll.u32 %v6966_v20, 16  ;;  %v1990_v42 = vrot.slane %v1988_v31, 4  ;;  %v6980_v20 = vld [vmem:[%s7194_s23 + $0x1ac] sm:$0xff]   ;;  %v6985_v31 = vld [vmem:[%s8713_s1 + $0x1a0] sm:$0xff]  }
  0x7f   : > { %6329 = vmatprep.subr.bf16.mxu0 %v7139_v1  ;;  %6256 = vmatpush3.bf16.msra.mxu1 %v6955_v30  ;;  %v1985_v30 = vshrl.u32 %v6967_v25, 16  ;;  %v1998_v48 = vrot.slane %v1996_v39, 4 }
  0x80   : > { %6257 = vmatprep.subr.bf16.mxu1 %v7139_v1 }
  0x82   : > { %6330 = vmatpush3.bf16.msra.mxu0 %v6950_v32  ;;  %v1993_v32 = vshrl.u32 %v6968_v26, 16 }
  0x83   : > { %6331 = vmatprep.subr.bf16.mxu0 %v7139_v1  ;;  %6258 = vmatpush3.bf16.msra.mxu1 %v6961_v33  ;;  %v6970_v33 = vld [vmem:[%s7194_s23 + $0x194] sm:$0xff]  }
  0x84   : > { %6124 = vmatmul.mubr.bf16.gmra.mxu1 %v6929_v34  ;;  %6196 = vmatmul.mubr.bf16.gmra.mxu0 %v1102_v36  ;;  %v1494_v34 = vor.u32 %v1493_v22, %v1490_v19  ;;  %v1502_v36 = vor.u32 %v1501_v24, %v1498_v23  ;;  %v1514_v44 = vshrl.u32 %v6970_v33, 16  ;;  %v2020_v19 = vshrl.u32 %v6977_v12, 16  ;;  %v6990_v23 = vld [vmem:[%s8713_s1 + $0x158] sm:$0xff]  }
  0x85   : > { %6127 = vmatprep.mubr.msk.bf16.mxu1 %vm7140_vm0, %v7139_v1  ;;  %6199 = vmatprep.mubr.msk.bf16.mxu0 %vm7140_vm0, %v7139_v1  ;;  %v2023_v22 = vshll.u32 %v6977_v12, 16 }
  0x86   : > { %6332 = vmatpush3.bf16.msra.mxu0 %v6956_v38  ;;  %6395 = vmatprep.subr.bf16.mxu1 %v7139_v1  ;;  %v1510_v38 = vrot.slane %v1508_v29, 3 }
  0x87   : > { %6333 = vmatprep.subr.bf16.mxu0 %v7139_v1 }
  0x88   : > { %v1511_v54 = vor.u32 %v1510_v38, %v1507_v37  ;;  %v6981_v37 = vld [vmem:[%s7194_s23 + $0x2c] sm:$0xff]  }
  0x89   : > { %v6996_v38 = vld [vmem:[%s8713_s1 + $0x150] sm:$0xff]  }
  0x8a   : > { %6334 = vmatpush3.bf16.msra.mxu0 %v6962_v40  ;;  %v6971_v40 = vld [vmem:[%s7194_s23 + $0x14] sm:$0xff]   ;;  %v1512_v3 = vsel %vm1486_vm3, %v1502_v36, %v1511_v54 }
  0x8b   : > { %6471 = vmatprep.subr.bf16.mxu0 %v7139_v1  ;;  %v2002_v50 = vshrl.u32 %v6971_v40, 16 }
  0x8c   : > { %6128 = vmatmul.mubr.bf16.gmra.mxu1 %v6933_v41  ;;  %6200 = vmatmul.mubr.bf16.gmra.mxu0 %v1104_v43  ;;  %v1987_v41 = vrot.slane %v1985_v30, 3  ;;  %v1995_v43 = vrot.slane %v1993_v32, 3  ;;  %v2022_v30 = vrot.slane %v2020_v19, 3 }
  0x8d   : > { %6131 = vmatprep.mubr.msk.bf16.mxu1 %vm7140_vm0, %v7139_v1  ;;  %6203 = vmatprep.mubr.msk.bf16.mxu0 %vm7140_vm0, %v7139_v1 }
  0x8e   : > { %v1999_v56 = vor.u32 %v1998_v48, %v1995_v43  ;;  %v1544_v43 = vshll.u32 %v6980_v20, 16  ;;  %v7002_v48 = vld [vmem:[%s8713_s1 + $0x148] sm:$0xff]  }
  0x94   : > { %6132 = vmatmul.mubr.bf16.gmra.mxu1 %v6935_v45  ;;  %6204 = vmatmul.mubr.bf16.gmra.mxu0 %v1106_v47  ;;  %v6973_v45 = vld [vmem:[%s7194_s23 + $0x19c] sm:$0xff]   ;;  %v1503_v47 = vsel %vm1486_vm3, %v1494_v34, %v1502_v36  ;;  %v2025_v34 = vrot.slane %v2023_v22, 4  ;;  %v1541_v36 = vshrl.u32 %v6980_v20, 16 }
  0x95   : > { %6135 = vmatprep.mubr.msk.bf16.mxu1 %vm7140_vm0, %v7139_v1  ;;  %6207 = vmatprep.mubr.msk.bf16.mxu0 %vm7140_vm0, %v7139_v1  ;;  %v1523_v52 = vshrl.u32 %v6973_v45, 16  ;;  %v6986_v20 = vld [vmem:[%s7194_s23 + $0x1bc] sm:$0xff]  }
  0x97   : > { %v1525_v0 = vrot.slane %v1523_v52, 2 }
  0x9c   : > { %6136 = vmatmul.mubr.bf16.gmra.mxu1 %v6939_v49  ;;  %6208 = vmatmul.mubr.bf16.gmra.mxu0 %v1108_v51  ;;  %v1517_v49 = vshll.u32 %v6970_v33, 16  ;;  %v2005_v51 = vshll.u32 %v6971_v40, 16 }
  0x9d   : > { %6139 = vmatprep.mubr.msk.bf16.mxu1 %vm7140_vm0, %v7139_v1  ;;  %6211 = vmatprep.mubr.msk.bf16.mxu0 %vm7140_vm0, %v7139_v1 }
  0x9e   : > { %v1519_v58 = vrot.slane %v1517_v49, 3  ;;  %v2007_v63 = vrot.slane %v2005_v51, 4  ;;  %v6982_v51 = vld [vmem:[%s7194_s23 + $0x1b4] sm:$0xff]  }
  0x9f   : > { %v1550_v7 = vshrl.u32 %v6982_v51, 16 }
  0xa4   : > { %6140 = vmatmul.mubr.bf16.gmra.mxu1 %v6941_v53  ;;  %6212 = vmatmul.mubr.bf16.gmra.mxu0 %v1110_v55  ;;  %v1526_v53 = vshll.u32 %v6973_v45, 16  ;;  %v1991_v55 = vor.u32 %v1990_v42, %v1987_v41 }
  0xa5   : > { %6143 = vmatprep.mubr.msk.bf16.mxu1 %vm7140_vm0, %v7139_v1  ;;  %6215 = vmatprep.mubr.msk.bf16.mxu0 %vm7140_vm0, %v7139_v1 }
  0xac   : > { %6144 = vmatmul.mubr.bf16.gmra.mxu1 %v6945_v57  ;;  %6216 = vmatmul.mubr.bf16.gmra.mxu0 %v1112_v59  ;;  %v1516_v57 = vrot.slane %v1514_v44, 2  ;;  %v6972_v59 = vld [vmem:[%s8713_s1 + $0x170] sm:$0xff]   ;;  %v6991_v44 = vld [vmem:[%s8713_s1 + $0x198] sm:$0xff]  }
  0xad   : > { %6147 = vmatprep.mubr.msk.bf16.mxu1 %vm7140_vm0, %v7139_v1  ;;  %6219 = vmatprep.mubr.msk.bf16.mxu0 %vm7140_vm0, %v7139_v1 }
  0xae   : > { %v1520_v35 = vor.u32 %v1519_v58, %v1516_v57  ;;  %v1543_v58 = vrot.slane %v1541_v36, 2  ;;  %v1562_v36 = vshll.u32 %v6986_v20, 16 }
  0xb0   : > { %v1521_v17 = vsel %vm1486_vm3, %v1511_v54, %v1520_v35  ;;  %v2032_v54 = vshll.u32 %v6981_v37, 16 }
  0xb4   : > { %6148 = vmatmul.mubr.bf16.gmra.mxu1 %v6947_v61  ;;  %6220 = vmatmul.mubr.bf16.gmra.mxu0 %v1114_v62  ;;  %v6969_v61 = vld [vmem:[%s8713_s1 + $0x1b8] sm:$0xff]   ;;  %v2004_v62 = vrot.slane %v2002_v50, 3 }
  0xb5   : > { %6151 = vmatprep.mubr.msk.bf16.mxu1 %vm7140_vm0, %v7139_v1  ;;  %6223 = vmatprep.mubr.msk.bf16.mxu0 %vm7140_vm0, %v7139_v1 }
  0xbc   : > { %6152 = vmatmul.mubr.bf16.gmra.mxu1 %v6951_v2  ;;  %6224 = vmatmul.mubr.bf16.gmra.mxu0 %v1116_v4  ;;  %v1528_v2 = vrot.slane %v1526_v53, 3  ;;  %v2000_v4 = vsel %vm336_vm1, %v1991_v55, %v1999_v56  ;;  %v2026_v53 = vor.u32 %v2025_v34, %v2022_v30  ;;  %v6997_v55 = vld [vmem:[%s8713_s1 + $0x190] sm:$0xff]   ;;  %v1559_v34 = vshrl.u32 %v6986_v20, 16 }
  0xbd   : > { %6155 = vmatprep.mubr.msk.bf16.mxu1 %vm7140_vm0, %v7139_v1  ;;  %6227 = vmatprep.mubr.msk.bf16.mxu0 %vm7140_vm0, %v7139_v1 }
  0xbe   : > { %v1529_v26 = vor.u32 %v1528_v2, %v1525_v0 }
  0xc0   : > { %v1530_v41 = vsel %vm1486_vm3, %v1520_v35, %v1529_v26  ;;  %v2038_v35 = vshrl.u32 %v6983_v60, 16 }
  0xc4   : > { %6156 = vmatmul.mubr.bf16.gmra.mxu1 %v6953_v8  ;;  %6228 = vmatmul.mubr.bf16.gmra.mxu0 %v1118_v10  ;;  %v6975_v8 = vld [vmem:[%s8713_s1 + $0x1b0] sm:$0xff]   ;;  %v2008_v10 = vor.u32 %v2007_v63, %v2004_v62 }
  0xc5   : > { %6159 = vmatprep.mubr.msk.bf16.mxu1 %vm7140_vm0, %v7139_v1  ;;  %6231 = vmatprep.mubr.msk.bf16.mxu0 %vm7140_vm0, %v7139_v1 }
  0xcc   : > { %6160 = vmatmul.mubr.bf16.gmra.mxu1 %v6957_v15  ;;  %6232 = vmatmul.mubr.bf16.gmra.mxu0 %v1120_v18  ;;  %v1535_v15 = vshll.u32 %v6976_v6, 16  ;;  %v2009_v18 = vsel %vm336_vm1, %v1999_v56, %v2008_v10 }
  0xcd   : > { %6163 = vmatprep.mubr.msk.bf16.mxu1 %vm7140_vm0, %v7139_v1  ;;  %6235 = vmatprep.mubr.msk.bf16.mxu0 %vm7140_vm0, %v7139_v1 }
  0xce   : > { %v1537_v29 = vrot.slane %v1535_v15, 3  ;;  %v7008_v15 = vld [vmem:[%s8713_s1 + $0x180] sm:$0xff]  }
  0xd4   : > { %6164 = vmatmul.mubr.bf16.gmra.mxu1 %v6959_v21  ;;  %6236 = vmatmul.mubr.bf16.gmra.mxu0 %v1122_v27  ;;  %v6979_v21 = vld [vmem:[%s8713_s1 + $0x1a8] sm:$0xff]   ;;  %v2017_v27 = vor.u32 %v2016_v14, %v2013_v13  ;;  %v2041_v14 = vshll.u32 %v6983_v60, 16 }
  0xd5   : > { %6239 = vmatprep.mubr.msk.bf16.mxu0 %vm7140_vm0, %v7139_v1  ;;  %6259 = vmatprep.mubr.msk.bf16.mxu1 %vm7140_vm0, %v7139_v1 }
  0xd6   : > { %v2018_v42 = vsel %vm336_vm1, %v2008_v10, %v2017_v27  ;;  %v2027_v2 = vsel %vm336_vm1, %v2017_v27, %v2026_v53 }
  0xdc   : > { %6240 = vmatmul.mubr.bf16.gmra.mxu0 %v1121_v11  ;;  %6260 = vmatmul.mubr.bf16.vlgmr.msra.gmra.mxu1 %v1503_v47  ;;  %v1532_v11 = vshrl.u32 %v6976_v6, 16  ;;  %v2029_v47 = vshrl.u32 %v6981_v37, 16 }
  0xdd   : > { %6263 = vmatprep.mubr.msk.bf16.mxu1 %vm7140_vm0, %v7139_v1  ;;  %6335 = vmatprep.mubr.msk.bf16.mxu0 %vm7140_vm0, %v7139_v1 }
  0xde   : > { %6396 = vmatpush3.bf16.msra.mxu1 %v6965_v46  ;;  %v1534_v28 = vrot.slane %v1532_v11, 2 }
  0xdf   : > { %6397 = vmatprep.subr.bf16.mxu1 %v7139_v1 }
  0xe0   : > { %v1538_v52 = vor.u32 %v1537_v29, %v1534_v28  ;;  %v2040_v28 = vrot.slane %v2038_v35, 3  ;;  %v2043_v29 = vrot.slane %v2041_v14, 4  ;;  %v6993_v14 = vld [vmem:[%s7194_s23 + $0x4c] sm:$0xff]  }
  0xe2   : > { %6398 = vmatpush3.bf16.msra.mxu1 %v6972_v59  ;;  %v1546_v59 = vrot.slane %v1544_v43, 3  ;;  %v1539_v0 = vsel %vm1486_vm3, %v1529_v26, %v1538_v52 }
  0xe3   : > { %6399 = vmatprep.subr.bf16.mxu1 %v7139_v1 }
  0xe4   : > { %6264 = vmatmul.mubr.bf16.gmra.mxu1 %v1512_v3  ;;  %6336 = vmatmul.mubr.bf16.vlgmr.msra.gmra.mxu0 %v2000_v4  ;;  %v2031_v3 = vrot.slane %v2029_v47, 3  ;;  %v2034_v4 = vrot.slane %v2032_v54, 4  ;;  %v1547_v12 = vor.u32 %v1546_v59, %v1543_v58  ;;  %v1561_v47 = vrot.slane %v1559_v34, 2 }
  0xe5   : > { %6472 = vmatpush3.bf16.msra.mxu0 %v6969_v61  ;;  %6267 = vmatprep.mubr.msk.bf16.mxu1 %vm7140_vm0, %v7139_v1  ;;  %v7007_v61 = vld [vmem:[%s8713_s1 + $0x140] sm:$0xff]  }
  0xe6   : > { %6339 = vmatprep.mubr.msk.bf16.mxu0 %vm7140_vm0, %v7139_v1  ;;  %6473 = vmatprep.subr.bf16.mxu0 %v7139_v1  ;;  %v2035_v13 = vor.u32 %v2034_v4, %v2031_v3  ;;  %v1548_v26 = vsel %vm1486_vm3, %v1538_v52, %v1547_v12 }
  0xe7   : > { %6400 = vmatpush3.bf16.msra.mxu1 %v6978_v9  ;;  %v1553_v9 = vshll.u32 %v6982_v51, 16 }
  0xe8   : > { %6401 = vmatprep.subr.bf16.mxu1 %v7139_v1  ;;  %v2036_v27 = vsel %vm336_vm1, %v2026_v53, %v2035_v13 }
  0xe9   : > { %6474 = vmatpush3.bf16.msra.mxu0 %v6975_v8  ;;  %v7003_v8 = vld [vmem:[%s8713_s1 + $0x188] sm:$0xff]   ;;  %v1555_v19 = vrot.slane %v1553_v9, 3 }
  0xea   : > { %6475 = vmatprep.subr.bf16.mxu0 %v7139_v1 }
  0xeb   : > { %6402 = vmatpush3.bf16.msra.mxu1 %v6984_v16 }
  0xec   : > { %v7570_v24 = vpop.f32.mrf.mxu0  ;;  %v7572_v25 = vpop.f32.mrf.mxu1  ;;  %6268 = vmatmul.mubr.bf16.gmra.mxu1 %v1521_v17  ;;  %6340 = vmatmul.mubr.bf16.gmra.mxu0 %v2009_v18  ;;  %v1552_v18 = vrot.slane %v1550_v7, 2 }
  0xed   : > { %6271 = vmatprep.mubr.msk.bf16.mxu1 %vm7140_vm0, %v7139_v1  ;;  %6343 = vmatprep.mubr.msk.bf16.mxu0 %vm7140_vm0, %v7139_v1 }
  0xee   : > { %v6033_v32 = vpop.f32.mrf.mxu0  ;;  %v6065_v33 = vpop.f32.mrf.mxu1  ;;  %6476 = vmatpush3.bf16.msra.mxu0 %v6979_v21  ;;  %6403 = vmatprep.subr.bf16.mxu1 %v7139_v1  ;;  %v6987_v21 = vld [vmem:[%s7194_s23 + $0x3c] sm:$0xff]  }
  0xef   : > { %6477 = vmatprep.subr.bf16.mxu0 %v7139_v1  ;;  %6404 = vmatpush3.bf16.msra.mxu1 %v6990_v23  ;;  %v2047_v37 = vshrl.u32 %v6987_v21, 16 }
  0xf0   : > { %v7587_v39 = vpop.f32.mrf.mxu0  ;;  %v7589_v40 = vpop.f32.mrf.mxu1  ;;  %6405 = vmatprep.subr.bf16.mxu1 %v7139_v1 }
  0xf1   : > { %v2049_v51 = vrot.slane %v2047_v37, 3 }
  0xf2   : > { %v6034_v45 = vpop.f32.mrf.mxu0  ;;  %v6066_v46 = vpop.f32.mrf.mxu1  ;;  %6478 = vmatpush3.bf16.msra.mxu0 %v6985_v31 }
  0xf3   : > { %6479 = vmatprep.subr.bf16.mxu0 %v7139_v1  ;;  %6406 = vmatpush3.bf16.msra.mxu1 %v6996_v38  ;;  %v2050_v38 = vshll.u32 %v6987_v21, 16 }
  0xf4   : > { %v7601_v49 = vpop.f32.mrf.mxu0  ;;  %v7603_v50 = vpop.f32.mrf.mxu1  ;;  %6272 = vmatmul.mubr.bf16.gmra.mxu1 %v1530_v41  ;;  %6344 = vmatmul.mubr.bf16.gmra.mxu0 %v2018_v42  ;;  %v1556_v41 = vor.u32 %v1555_v19, %v1552_v18  ;;  %v2044_v42 = vor.u32 %v2043_v29, %v2040_v28  ;;  %v2065_v29 = vshrl.u32 %v6993_v14, 16 }
  0xf5   : > { %6275 = vmatprep.mubr.msk.bf16.mxu1 %vm7140_vm0, %v7139_v1  ;;  %6347 = vmatprep.mubr.msk.bf16.mxu0 %vm7140_vm0, %v7139_v1  ;;  %v2052_v52 = vrot.slane %v2050_v38, 4 }
  0xf6   : > { %v6037_v56 = vpop.f32.mrf.mxu0  ;;  %v6069_v57 = vpop.f32.mrf.mxu1  ;;  %6480 = vmatpush3.bf16.msra.mxu0 %v6991_v44  ;;  %6407 = vmatprep.subr.bf16.mxu1 %v7139_v1  ;;  %v1557_v53 = vsel %vm1486_vm3, %v1547_v12, %v1556_v41  ;;  %v2045_v54 = vsel %vm336_vm1, %v2035_v13, %v2044_v42  ;;  %v6992_v13 = vld [vmem:[%s7194_s23 + $0x1cc] sm:$0xff]  }
  0xf7   : > { %6481 = vmatprep.subr.bf16.mxu0 %v7139_v1  ;;  %6408 = vmatpush3.bf16.msra.mxu1 %v7002_v48  ;;  %v1564_v48 = vrot.slane %v1562_v36, 3  ;;  %v6989_v56 = vld [vmem:[%s7194_s23 + $0x44] sm:$0xff]   ;;  %v1580_v28 = vshll.u32 %v6992_v13, 16 }
  0xf8   : > { %v7619_v62 = vpop.f32.mrf.mxu0  ;;  %v7621_v63 = vpop.f32.mrf.mxu1  ;;  %6409 = vmatprep.subr.bf16.mxu1 %v7139_v1  ;;  %v2056_v4 = vshrl.u32 %v6989_v56, 16 }
  0xfa   : > { %v6038_v5 = vpop.f32.mrf.mxu0  ;;  %v6070_v6 = vpop.f32.mrf.mxu1  ;;  %6482 = vmatpush3.bf16.msra.mxu0 %v6997_v55  ;;  %v6988_v55 = vld [vmem:[%s7194_s23 + $0x1c4] sm:$0xff]  }
  0xfb   : > { %6483 = vmatprep.subr.bf16.mxu0 %v7139_v1  ;;  %6410 = vmatpush3.bf16.msra.mxu1 %v7007_v61  ;;  %v1565_v61 = vor.u32 %v1564_v48, %v1561_v47  ;;  %v1571_v3 = vshll.u32 %v6988_v55, 16  ;;  %v2059_v5 = vshll.u32 %v6989_v56, 16 }
  0xfc   : > { %v7630_v10 = vpop.f32.mrf.mxu0  ;;  %v7632_v11 = vpop.f32.mrf.mxu1  ;;  %6276 = vmatmul.mubr.bf16.gmra.mxu1 %v1539_v0  ;;  %6348 = vmatmul.mubr.bf16.gmra.mxu0 %v2027_v2  ;;  %v2053_v0 = vor.u32 %v2052_v52, %v2049_v51  ;;  %v1568_v2 = vshrl.u32 %v6988_v55, 16  ;;  %v6994_v52 = vld [vmem:[%s7194_s23 + $0x1d4] sm:$0xff]  }
  0xfd   : > { %6279 = vmatprep.mubr.msk.bf16.mxu1 %vm7140_vm0, %v7139_v1  ;;  %6351 = vmatprep.mubr.msk.bf16.mxu0 %vm7140_vm0, %v7139_v1  ;;  %v1566_v35 = vsel %vm1486_vm3, %v1556_v41, %v1565_v61  ;;  %v2061_v18 = vrot.slane %v2059_v5, 4 }
  0xfe   : > { %v6041_v16 = vpop.f32.mrf.mxu0  ;;  %v6073_v17 = vpop.f32.mrf.mxu1  ;;  %6484 = vmatpush3.bf16.msra.mxu0 %v7003_v8  ;;  %6547 = vmatprep.subr.bf16.mxu1 %v7139_v1  ;;  %v2054_v12 = vsel %vm336_vm1, %v2044_v42, %v2053_v0 }
  0xff   : > { %6485 = vmatprep.subr.bf16.mxu0 %v7139_v1  ;;  %v1573_v16 = vrot.slane %v1571_v3, 3  ;;  %v2058_v17 = vrot.slane %v2056_v4, 3 }
 0x100   : > { %v7645_v22 = vpop.f32.mrf.mxu0  ;;  %v7647_v23 = vpop.f32.mrf.mxu1 }
 0x101   : > { %v2062_v34 = vor.u32 %v2061_v18, %v2058_v17 }
 0x102   : > { %v6042_v30 = vpop.f32.mrf.mxu0  ;;  %v6074_v31 = vpop.f32.mrf.mxu1  ;;  %6486 = vmatpush3.bf16.msra.mxu0 %v7008_v15  ;;  %v1570_v15 = vrot.slane %v1568_v2, 2 }
 0x103   : > { %6623 = vmatprep.subr.bf16.mxu0 %v7139_v1  ;;  %v2068_v30 = vshll.u32 %v6993_v14, 16  ;;  %v2063_v51 = vsel %vm336_vm1, %v2053_v0, %v2062_v34  ;;  %v1589_v0 = vshll.u32 %v6994_v52, 16  ;;  %v6998_v14 = vld [vmem:[%s7194_s23 + $0x1dc] sm:$0xff]  }
 0x104   : > { %v7652_v32 = vpop.f32.mrf.mxu0  ;;  %v7654_v33 = vpop.f32.mrf.mxu1  ;;  %6280 = vmatmul.mubr.bf16.gmra.mxu1 %v1548_v26  ;;  %6352 = vmatmul.mubr.bf16.gmra.mxu0 %v2036_v27  ;;  %v1577_v27 = vshrl.u32 %v6992_v13, 16  ;;  %v1574_v31 = vor.u32 %v1573_v16, %v1570_v15  ;;  %v6999_v15 = vld [vmem:[%s7194_s23 + $0x5c] sm:$0xff]  }
 0x105   : > { %6283 = vmatprep.mubr.msk.bf16.mxu1 %vm7140_vm0, %v7139_v1  ;;  %6355 = vmatprep.mubr.msk.bf16.mxu0 %vm7140_vm0, %v7139_v1  ;;  %v2070_v47 = vrot.slane %v2068_v30, 4  ;;  %v1591_v17 = vrot.slane %v1589_v0, 3  ;;  %v1595_v30 = vshrl.u32 %v6998_v14, 16 }
 0x106   : > { %v6045_v43 = vpop.f32.mrf.mxu0  ;;  %v6077_v44 = vpop.f32.mrf.mxu1  ;;  %v1579_v42 = vrot.slane %v1577_v27, 2  ;;  %v1575_v48 = vsel %vm1486_vm3, %v1565_v61, %v1574_v31  ;;  %v1586_v61 = vshrl.u32 %v6994_v52, 16 }
 0x107   : > { %v1582_v43 = vrot.slane %v1580_v28, 3  ;;  %v2067_v44 = vrot.slane %v2065_v29, 3 }
 0x108   : > { %v7660_v45 = vpop.f32.mrf.mxu0  ;;  %v7662_v46 = vpop.f32.mrf.mxu1  ;;  %v1588_v16 = vrot.slane %v1586_v61, 2 }
 0x109   : > { %v2071_v2 = vor.u32 %v2070_v47, %v2067_v44 }
 0x10a   : > { %v6046_v57 = vpop.f32.mrf.mxu0  ;;  %v6078_v58 = vpop.f32.mrf.mxu1 }
 0x10b   : > { %v1583_v58 = vor.u32 %v1582_v43, %v1579_v42  ;;  %v2072_v13 = vsel %vm336_vm1, %v2062_v34, %v2071_v2  ;;  %v1592_v42 = vor.u32 %v1591_v17, %v1588_v16 }
 0x10c   : > { %v7668_v59 = vpop.f32.mrf.mxu0  ;;  %v7670_v60 = vpop.f32.mrf.mxu1  ;;  %6284 = vmatmul.mubr.bf16.gmra.mxu1 %v1557_v53  ;;  %6356 = vmatmul.mubr.bf16.gmra.mxu0 %v2045_v54  ;;  %v6995_v53 = vld [vmem:[%s7194_s23 + $0x54] sm:$0xff]  }
 0x10d   : > { %6287 = vmatprep.mubr.msk.bf16.mxu1 %vm7140_vm0, %v7139_v1  ;;  %6359 = vmatprep.mubr.msk.bf16.mxu0 %vm7140_vm0, %v7139_v1  ;;  %v2074_v3 = vshrl.u32 %v6995_v53, 16  ;;  %v2077_v4 = vshll.u32 %v6995_v53, 16  ;;  %v1597_v53 = vrot.slane %v1595_v30, 2  ;;  %v1593_v0 = vsel %vm1486_vm3, %v1583_v58, %v1592_v42 }
 0x10e   : > { %v6049_v6 = vpop.f32.mrf.mxu0  ;;  %v6081_v7 = vpop.f32.mrf.mxu1 }
 0x10f   : > { %v2076_v18 = vrot.slane %v2074_v3, 3 }
 0x110   : > { %v7676_v8 = vpop.f32.mrf.mxu0  ;;  %v7678_v9 = vpop.f32.mrf.mxu1 }
 0x112   : > { %v6050_v19 = vpop.f32.mrf.mxu0  ;;  %v6082_v20 = vpop.f32.mrf.mxu1 }
 0x113   : > { %v2079_v19 = vrot.slane %v2077_v4, 4  ;;  %v7001_v4 = vld [vmem:[%s7194_s23 + $0x64] sm:$0xff]  }
 0x114   : > { %v7684_v21 = vpop.f32.mrf.mxu0  ;;  %v7686_v26 = vpop.f32.mrf.mxu1  ;;  %6288 = vmatmul.mubr.bf16.gmra.mxu1 %v1566_v35  ;;  %6360 = vmatmul.mubr.bf16.gmra.mxu0 %v2054_v12  ;;  %v1584_v12 = vsel %vm1486_vm3, %v1574_v31, %v1583_v58  ;;  %v2086_v31 = vshll.u32 %v6999_v15, 16  ;;  %v2092_v58 = vshrl.u32 %v7001_v4, 16 }
 0x115   : > { %6291 = vmatprep.mubr.msk.bf16.mxu1 %vm7140_vm0, %v7139_v1  ;;  %6363 = vmatprep.mubr.msk.bf16.mxu0 %vm7140_vm0, %v7139_v1  ;;  %v2080_v43 = vor.u32 %v2079_v19, %v2076_v18 }
 0x116   : > { %v6053_v36 = vpop.f32.mrf.mxu0  ;;  %v6085_v37 = vpop.f32.mrf.mxu1  ;;  %v2088_v61 = vrot.slane %v2086_v31, 4  ;;  %v7005_v31 = vld [vmem:[%s7194_s23 + $0x6c] sm:$0xff]  }
 0x117   : > { %v1598_v36 = vshll.u32 %v6998_v14, 16  ;;  %v2083_v37 = vshrl.u32 %v6999_v15, 16  ;;  %v2081_v3 = vsel %vm336_vm1, %v2071_v2, %v2080_v43  ;;  %v2095_v2 = vshll.u32 %v7001_v4, 16 }
 0x118   : > { %v7692_v38 = vpop.f32.mrf.mxu0  ;;  %v7694_v41 = vpop.f32.mrf.mxu1  ;;  %v2104_v4 = vshll.u32 %v7005_v31, 16 }
 0x11a   : > { %v6054_v54 = vpop.f32.mrf.mxu0  ;;  %v6086_v55 = vpop.f32.mrf.mxu1 }
 0x11b   : > { %v1600_v54 = vrot.slane %v1598_v36, 3  ;;  %v2085_v55 = vrot.slane %v2083_v37, 3  ;;  %v7004_v37 = vld [vmem:[%s7194_s23 + $0x1ec] ss:$0 sps:$4 sm:$0x77]  }
 0x11c   : > { %v7700_v56 = vpop.f32.mrf.mxu0  ;;  %v7702_v57 = vpop.f32.mrf.mxu1  ;;  %6292 = vmatmul.mubr.bf16.gmra.mxu1 %v1575_v48  ;;  %6364 = vmatmul.mubr.bf16.gmra.mxu0 %v2063_v51  ;;  %v7000_v48 = vld [vmem:[%s7194_s23 + $0x1e4] sm:$0xff]  }
 0x11d   : > { %6295 = vmatprep.mubr.msk.bf16.mxu1 %vm7140_vm0, %v7139_v1  ;;  %6367 = vmatprep.mubr.msk.bf16.mxu0 %vm7140_vm0, %v7139_v1  ;;  %v1601_v15 = vor.u32 %v1600_v54, %v1597_v53  ;;  %v2089_v16 = vor.u32 %v2088_v61, %v2085_v55 }
 0x11e   : > { %v6057_v5 = vpop.f32.mrf.mxu0  ;;  %v6089_v6 = vpop.f32.mrf.mxu1 }
 0x11f   : > { %v1602_v36 = vsel %vm1486_vm3, %v1592_v42, %v1601_v15  ;;  %v2101_v42 = vshrl.u32 %v7005_v31, 16 }
 0x120   : > { %v7708_v7 = vpop.f32.mrf.mxu0  ;;  %v683_v35 = vpop.f32.mrf.mxu1 }
 0x121   : > { %v1604_v35 = vshrl.u32 %v7000_v48, 16 }
 0x122   : > { %v6058_v20 = vpop.f32.mrf.mxu0  ;;  %v6090_v27 = vpop.f32.mrf.mxu1 }
 0x123   : > { %v1606_v20 = vrot.slane %v1604_v35, 2 }
 0x124   : > { %v7714_v28 = vpop.f32.mrf.mxu0  ;;  %v856_v29 = vpop.f32.mrf.mxu1  ;;  %6296 = vmatmul.mubr.bf16.gmra.mxu1 %v1584_v12  ;;  %6368 = vmatmul.mubr.bf16.gmra.mxu0 %v2072_v13  ;;  %v1607_v12 = vshll.u32 %v7000_v48, 16  ;;  %v2097_v48 = vrot.slane %v2095_v2, 4  ;;  %v2106_v2 = vrot.slane %v2104_v4, 4 }
 0x125   : > { %v857_v34 = vadd.f32 %v856_v29, %v7570_v24  ;;  %6299 = vmatprep.mubr.msk.bf16.mxu1 %vm7140_vm0, %v7139_v1  ;;  %6371 = vmatprep.mubr.msk.bf16.mxu0 %vm7140_vm0, %v7139_v1 }
 0x126   : > { %v6061_v44 = vpop.f32.mrf.mxu0  ;;  %v6109_v47 = vpop.f32.mrf.mxu1  ;;  %v1609_v27 = vrot.slane %v1607_v12, 3 }
 0x127   : > { %v2094_v47 = vrot.slane %v2092_v58, 3  ;;  %v2103_v58 = vrot.slane %v2101_v42, 3 }
 0x128   : > { %v7722_v51 = vpop.f32.mrf.mxu0  ;;  %v859_v52 = vpop.f32.mrf.mxu1  ;;  %v1610_v54 = vor.u32 %v1609_v27, %v1606_v20  ;;  %v7006_v20 = vld [vmem:[%s7194_s23 + $0x74] ss:$0 sps:$4 sm:$0xff]  }
 0x129   : > { %v860_v24 = vadd.f32 %v859_v52, %v7587_v39 }
 0x12a   : > { %v6062_v5 = vpop.f32.mrf.mxu0  ;;  %v6110_v6 = vpop.f32.mrf.mxu1 }
 0x12c   : > { %v864_v13 = vpop.f32.mrf.mxu1  ;;  %v1220_v14 = vpop.f32.mrf.mxu0  ;;  %6300 = vmatmul.mubr.bf16.gmra.mxu1 %v1593_v0  ;;  %6372 = vmatmul.mubr.bf16.gmra.mxu0 %v2081_v3  ;;  %v1613_v0 = vshrl.u32 %v7004_v37, 16  ;;  %v1616_v3 = vshll.u32 %v7004_v37, 16  ;;  %v2107_v37 = vor.u32 %v2106_v2, %v2103_v58  ;;  %v7009_v58 = vld [vmem:[%s7194_s23 + $0x84] sm:$0xf8]   ;;  %v7776_v2 = vld [vmem:[%s7194_s23 + $0x8c] sm:$0xff]  }
 0x12d   : > { %v865_v17 = vadd.f32 %v864_v13, %v7601_v49  ;;  %v7729_v39 = vadd.f32 %v1220_v14, %v857_v34  ;;  %6303 = vmatprep.mubr.msk.bf16.mxu1 %vm7140_vm0, %v7139_v1  ;;  %6375 = vmatprep.mubr.msk.bf16.mxu0 %vm7140_vm0, %v7139_v1  ;;  %v2090_v49 = vsel %vm336_vm1, %v2080_v43, %v2089_v16 }
 0x12e   : > { %v6113_v18 = vpop.f32.mrf.mxu1  ;;  %v6185_v19 = vpop.f32.mrf.mxu0  ;;  %v1615_v13 = vrot.slane %v1613_v0, 2  ;;  %v1618_v14 = vrot.slane %v1616_v3, 3 }
 0x12f   : > { %v1611_v18 = vsel %vm1486_vm3, %v1601_v15, %v1610_v54  ;;  %v2113_v15 = vshll.u32 %v7006_v20, 16 }
 0x130   : > { %v867_v29 = vpop.f32.mrf.mxu1  ;;  %v1223_v30 = vpop.f32.mrf.mxu0 }
 0x131   : > { %v868_v34 = vadd.f32 %v867_v29, %v7619_v62  ;;  %v7740_v44 = vadd.f32 %v1223_v30, %v860_v24  ;;  %v2098_v62 = vor.u32 %v2097_v48, %v2094_v47  ;;  %v2115_v3 = vrot.slane %v2113_v15, 4 }
 0x132   : > { %v6114_v52 = vpop.f32.mrf.mxu1  ;;  %v6186_v53 = vpop.f32.mrf.mxu0 }
 0x133   : > { %v2099_v19 = vsel %vm336_vm1, %v2089_v16, %v2098_v62 }
 0x134   : > { %v872_v55 = vpop.f32.mrf.mxu1  ;;  %v1228_v61 = vpop.f32.mrf.mxu0  ;;  %6304 = vmatmul.mubr.bf16.gmra.mxu1 %v1602_v36  ;;  %6376 = vmatmul.mubr.bf16.gmra.mxu0 %v2090_v49  ;;  %v1619_v49 = vor.u32 %v1618_v14, %v1615_v13 }
 0x135   : > { %v873_v43 = vadd.f32 %v872_v55, %v7630_v10  ;;  %v7743_v5 = vadd.f32 %v1228_v61, %v865_v17  ;;  %6307 = vmatprep.mubr.msk.bf16.mxu1 %vm7140_vm0, %v7139_v1  ;;  %6379 = vmatprep.mubr.msk.bf16.mxu0 %vm7140_vm0, %v7139_v1  ;;  %v2108_v55 = vsel %vm336_vm1, %v2098_v62, %v2107_v37 }
 0x136   : > { %v6117_v24 = vpop.f32.mrf.mxu1  ;;  %v6189_v6 = vpop.f32.mrf.mxu0  ;;  %v1620_v53 = vsel %vm1486_vm3, %v1610_v54, %v1619_v49  ;;  %v2481_v49 = vrot.slane %v7009_v58, 3 }
 0x138   : > { %v875_v35 = vpop.f32.mrf.mxu1  ;;  %v1231_v12 = vpop.f32.mrf.mxu0 }
 0x139   : > { %v876_v10 = vadd.f32 %v875_v35, %v7645_v22  ;;  %v7750_v17 = vadd.f32 %v1231_v12, %v868_v34  ;;  %v2110_v22 = vshrl.u32 %v7006_v20, 16  ;;  %v7014_v20 = vld [vmem:[%s7194_s23 + $0x10c] sm:$0xff]  }
 0x13a   : > { %v6118_v27 = vpop.f32.mrf.mxu1  ;;  %v6190_v29 = vpop.f32.mrf.mxu0 }
 0x13b   : > { %v2112_v0 = vrot.slane %v2110_v22, 3 }
 0x13c   : > { %v880_v30 = vpop.f32.mrf.mxu1  ;;  %v1236_v36 = vpop.f32.mrf.mxu0  ;;  %6308 = vmatmul.mubr.bf16.gmra.mxu1 %v1611_v18  ;;  %6380 = vmatmul.mubr.bf16.gmra.mxu0 %v2099_v19 }
 0x13d   : > { %v881_v31 = vadd.f32 %v880_v30, %v7652_v32  ;;  %v7756_v47 = vadd.f32 %v1236_v36, %v873_v43  ;;  %6311 = vmatprep.mubr.msk.bf16.mxu1 %vm7140_vm0, %v7139_v1  ;;  %6383 = vmatprep.mubr.msk.bf16.mxu0 %vm7140_vm0, %v7139_v1 }
 0x13e   : > { %v6121_v16 = vpop.f32.mrf.mxu1  ;;  %v6193_v34 = vpop.f32.mrf.mxu0 }
 0x140   : > { %v883_v48 = vpop.f32.mrf.mxu1  ;;  %v1239_v52 = vpop.f32.mrf.mxu0 }
 0x141   : > { %v884_v32 = vadd.f32 %v883_v48, %v7660_v45  ;;  %v7765_v61 = vadd.f32 %v1239_v52, %v876_v10  ;;  %v2116_v45 = vor.u32 %v2115_v3, %v2112_v0  ;;  %v7013_v10 = vld [vmem:[%s7194_s23 + $0x104] sm:$0xfc]  }
 0x142   : > { %v6122_v42 = vpop.f32.mrf.mxu1  ;;  %v6194_v4 = vpop.f32.mrf.mxu0  ;;  %v2874_v22 = vshrl.u32 %v7013_v10, 16  ;;  %v2877_v15 = vshll.u32 %v7013_v10, 16 }
 0x143   : > { %v2117_v19 = vsel %vm336_vm1, %v2107_v37, %v2116_v45  ;;  %v2882_v37 = vshrl.u32 %v7014_v20, 16 }
 0x144   : > { %v888_v43 = vpop.f32.mrf.mxu1  ;;  %v1244_v24 = vpop.f32.mrf.mxu0  ;;  %6312 = vmatmul.mubr.bf16.gmra.mxu1 %v1620_v53  ;;  %6384 = vmatmul.mubr.bf16.gmra.mxu0 %v2108_v55  ;;  %v2879_v3 = vrot.slane %v2877_v15, 3 }
 0x145   : > { %v889_v54 = vadd.f32 %v888_v43, %v7668_v59  ;;  %v7768_v6 = vadd.f32 %v1244_v24, %v881_v31  ;;  %6315 = vmatprep.mubr.msk.bf16.mxu1 %vm7140_vm0, %v7139_v1  ;;  %6387 = vmatprep.mubr.msk.bf16.mxu0 %vm7140_vm0, %v7139_v1  ;;  %v2482_v31 = vrot.slane %v7776_v2, 3  ;;  %v7798_v43 = vld [vmem:[%s7194_s23 + $0x94] sm:$0xff]   ;;  %v2884_v24 = vrot.slane %v2882_v37, 2 }
 0x146   : > { %v6125_v62 = vpop.f32.mrf.mxu1  ;;  %v6197_v35 = vpop.f32.mrf.mxu0 }
 0x147   : > { %v2483_v55 = vsel %vm1093_vm2, %v2481_v49, %v2482_v31  ;;  %v7011_v35 = vld [vmem:[%s8713_s1 + $0x1f8] sm:$0xff]  }
 0x148   : > { %v891_v12 = vpop.f32.mrf.mxu1  ;;  %v1247_v14 = vpop.f32.mrf.mxu0 }
 0x149   : > { %v892_v18 = vadd.f32 %v891_v12, %v7676_v8  ;;  %v7780_v59 = vadd.f32 %v1247_v14, %v884_v32  ;;  %v2876_v32 = vrot.slane %v2874_v22, 2 }
 0x14a   : > { %v6126_v27 = vpop.f32.mrf.mxu1  ;;  %v6198_v29 = vpop.f32.mrf.mxu0 }
 0x14b   : > { %v2880_v58 = vor.u32 %v2879_v3, %v2876_v32  ;;  %v7018_v29 = vld [vmem:[%s8713_s1 + $0x1f0] sm:$0xff]  }
 0x14c   : > { %v896_v30 = vpop.f32.mrf.mxu1  ;;  %v1252_v36 = vpop.f32.mrf.mxu0  ;;  %6316 = vmatmul.mubr.bf16.gmra.mxu1 %v1615_v13  ;;  %6388 = vmatmul.mubr.bf16.gmra.mxu0 %v2117_v19  ;;  %v2885_v13 = vshll.u32 %v7014_v20, 16  ;;  %v2484_v19 = vrot.slane %v7798_v43, 3 }
 0x14d   : > { %v897_v16 = vadd.f32 %v896_v30, %v7684_v21  ;;  %v7786_v8 = vadd.f32 %v1252_v36, %v889_v54  ;;  %6391 = vmatprep.mubr.msk.bf16.mxu0 %vm7140_vm0, %v7139_v1  ;;  %6411 = vmatprep.mubr.msk.bf16.mxu1 %vm7140_vm0, %v7139_v1  ;;  %v7017_v21 = vld [vmem:[%s7194_s23 + $0x114] sm:$0xff]   ;;  %v7816_v36 = vld [vmem:[%s7194_s23 + $0x9c] sm:$0xff]  }
 0x14e   : > { %v6129_v34 = vpop.f32.mrf.mxu1  ;;  %v6201_v48 = vpop.f32.mrf.mxu0  ;;  %v2887_v54 = vrot.slane %v2885_v13, 3  ;;  %v2891_v2 = vshrl.u32 %v7017_v21, 16  ;;  %v2485_v37 = vsel %vm1093_vm2, %v2482_v31, %v2484_v19  ;;  %v2486_v31 = vrot.slane %v7816_v36, 3 }
 0x14f   : > { %v7015_v34 = vld [vmem:[%s8713_s1 + $0x238] sm:$0xff]  }
 0x150   : > { %v899_v52 = vpop.f32.mrf.mxu1  ;;  %v1255_v53 = vpop.f32.mrf.mxu0  ;;  %v2888_v20 = vor.u32 %v2887_v54, %v2884_v24  ;;  %v2893_v49 = vrot.slane %v2891_v2, 2  ;;  %v7020_v48 = vld [vmem:[%s7194_s23 + $0x11c] sm:$0xff]   ;;  %v7021_v54 = vld [vmem:[%s8713_s1 + $0x230] sm:$0xff]   ;;  %v7849_v2 = vld [vmem:[%s7194_s23 + $0xa4] sm:$0xff]  }
 0x151   : > { %v900_v42 = vadd.f32 %v899_v52, %v7692_v38  ;;  %v7795_v4 = vadd.f32 %v1255_v53, %v892_v18  ;;  %v2894_v38 = vshll.u32 %v7017_v21, 16  ;;  %v2900_v43 = vshrl.u32 %v7020_v48, 16 }
 0x152   : > { %v6130_v45 = vpop.f32.mrf.mxu1  ;;  %v6202_v62 = vpop.f32.mrf.mxu0  ;;  %v2889_v13 = vsel %vm1486_vm3, %v2880_v58, %v2888_v20  ;;  %v2903_v24 = vshll.u32 %v7020_v48, 16 }
 0x153   : > { %v2896_v22 = vrot.slane %v2894_v38, 3 }
 0x154   : > { %v904_v12 = vpop.f32.mrf.mxu1  ;;  %v1260_v14 = vpop.f32.mrf.mxu0  ;;  %6392 = vmatmul.mubr.bf16.gmra.mxu0 %v2112_v0  ;;  %6412 = vmatmul.mubr.bf16.vlgmr.msra.gmra.mxu1 %v2483_v55 }
 0x155   : > { %v905_v10 = vadd.f32 %v904_v12, %v7700_v56  ;;  %v7804_v18 = vadd.f32 %v1260_v14, %v897_v16  ;;  %6415 = vmatprep.mubr.msk.bf16.mxu1 %vm7140_vm0, %v7139_v1  ;;  %6487 = vmatprep.mubr.msk.bf16.mxu0 %vm7140_vm0, %v7139_v1  ;;  %v2897_v3 = vor.u32 %v2896_v22, %v2893_v49  ;;  %v2488_v49 = vrot.slane %v7849_v2, 3 }
 0x156   : > { %v6133_v0 = vpop.f32.mrf.mxu1  ;;  %v6205_v27 = vpop.f32.mrf.mxu0  ;;  %6548 = vmatpush3.bf16.msra.mxu1 %v7011_v35  ;;  %v2487_v14 = vsel %vm1093_vm2, %v2484_v19, %v2486_v31  ;;  %v7025_v19 = vld [vmem:[%s8713_s1 + $0x228] sm:$0xff]  }
 0x157   : > { %6549 = vmatprep.subr.bf16.mxu1 %v7139_v1  ;;  %v2898_v58 = vsel %vm1486_vm3, %v2888_v20, %v2897_v3  ;;  %v2902_v0 = vrot.slane %v2900_v43, 2  ;;  %v2905_v27 = vrot.slane %v2903_v24, 3  ;;  %v7036_v20 = vld [vmem:[%s8713_s1 + $0x1d8] sm:$0xff]  }
 0x158   : > { %v907_v56 = vpop.f32.mrf.mxu1  ;;  %v1263_v30 = vpop.f32.mrf.mxu0 }
 0x159   : > { %v908_v15 = vadd.f32 %v907_v56, %v7708_v7  ;;  %v7819_v16 = vadd.f32 %v1263_v30, %v900_v42  ;;  %v7024_v7 = vld [vmem:[%s8713_s1 + $0x1e8] sm:$0xff]  }
 0x15a   : > { %v6134_v52 = vpop.f32.mrf.mxu1  ;;  %v6206_v53 = vpop.f32.mrf.mxu0  ;;  %6550 = vmatpush3.bf16.msra.mxu1 %v7018_v29  ;;  %v7023_v29 = vld [vmem:[%s7194_s23 + $0x124] sm:$0xff]  }
 0x15b   : > { %6551 = vmatprep.subr.bf16.mxu1 %v7139_v1  ;;  %v7031_v52 = vld [vmem:[%s8713_s1 + $0x220] sm:$0xff]   ;;  %v7042_v53 = vld [vmem:[%s8713_s1 + $0x1d0] sm:$0xff]  }
 0x15c   : > { %v912_v55 = vpop.f32.mrf.mxu1  ;;  %v1268_v32 = vpop.f32.mrf.mxu0  ;;  %6416 = vmatmul.mubr.bf16.gmra.mxu1 %v2485_v37  ;;  %6488 = vmatmul.mubr.bf16.vlgmr.msra.gmra.mxu0 %v2889_v13  ;;  %v2909_v37 = vshrl.u32 %v7023_v29, 16  ;;  %v2912_v13 = vshll.u32 %v7023_v29, 16 }
 0x15d   : > { %v913_v21 = vadd.f32 %v912_v55, %v7714_v28  ;;  %v7833_v42 = vadd.f32 %v1268_v32, %v905_v10  ;;  %6624 = vmatpush3.bf16.msra.mxu0 %v7015_v34  ;;  %6419 = vmatprep.mubr.msk.bf16.mxu1 %vm7140_vm0, %v7139_v1  ;;  %v7030_v28 = vld [vmem:[%s8713_s1 + $0x1e0] sm:$0xff]   ;;  %v2489_v32 = vsel %vm1093_vm2, %v2486_v31, %v2488_v49 }
 0x15e   : > { %v6137_v45 = vpop.f32.mrf.mxu1  ;;  %v6209_v62 = vpop.f32.mrf.mxu0  ;;  %6491 = vmatprep.mubr.msk.bf16.mxu0 %vm7140_vm0, %v7139_v1  ;;  %6625 = vmatprep.subr.bf16.mxu0 %v7139_v1 }
 0x15f   : > { %6552 = vmatpush3.bf16.msra.mxu1 %v7024_v7  ;;  %v2914_v45 = vrot.slane %v2912_v13, 3  ;;  %v7027_v62 = vld [vmem:[%s7194_s23 + $0x12c] sm:$0xff]   ;;  %v7913_v13 = vld [vmem:[%s7194_s23 + $0xb4] sm:$0xff]  }
 0x160   : > { %v915_v35 = vpop.f32.mrf.mxu1  ;;  %v1271_v12 = vpop.f32.mrf.mxu0  ;;  %6553 = vmatprep.subr.bf16.mxu1 %v7139_v1 }
 0x161   : > { %v916_v38 = vadd.f32 %v915_v35, %v7722_v51  ;;  %v7853_v10 = vadd.f32 %v1271_v12, %v908_v15  ;;  %6626 = vmatpush3.bf16.msra.mxu0 %v7021_v54  ;;  %v2906_v15 = vor.u32 %v2905_v27, %v2902_v0  ;;  %v2911_v54 = vrot.slane %v2909_v37, 2  ;;  %v7037_v12 = vld [vmem:[%s8713_s1 + $0x218] sm:$0xff]  }
 0x162   : > { %v6138_v56 = vpop.f32.mrf.mxu1  ;;  %v6210_v30 = vpop.f32.mrf.mxu0  ;;  %6627 = vmatprep.subr.bf16.mxu0 %v7139_v1  ;;  %v2918_v0 = vshrl.u32 %v7027_v62, 16  ;;  %v2921_v27 = vshll.u32 %v7027_v62, 16 }
 0x163   : > { %6554 = vmatpush3.bf16.msra.mxu1 %v7030_v28  ;;  %v2907_v24 = vsel %vm1486_vm3, %v2897_v3, %v2906_v15  ;;  %v7043_v30 = vld [vmem:[%s8713_s1 + $0x210] sm:$0xff]  }
 0x164   : > { %v920_v51 = vpop.f32.mrf.mxu1  ;;  %v1276_v36 = vpop.f32.mrf.mxu0  ;;  %6420 = vmatmul.mubr.bf16.gmra.mxu1 %v2487_v14  ;;  %6492 = vmatmul.mubr.bf16.gmra.mxu0 %v2898_v58  ;;  %v7048_v14 = vld [vmem:[%s8713_s1 + $0x1c8] sm:$0xff]  }
 0x165   : > { %v7864_v22 = vadd.f32 %v1276_v36, %v913_v21  ;;  %6423 = vmatprep.mubr.msk.bf16.mxu1 %vm7140_vm0, %v7139_v1  ;;  %6495 = vmatprep.mubr.msk.bf16.mxu0 %vm7140_vm0, %v7139_v1  ;;  %v7880_v21 = vld [vmem:[%s7194_s23 + $0xac] sm:$0xff]   ;;  %v921_v31 = vadd.f32 %v920_v51, %v7572_v25  ;;  %v2915_v25 = vor.u32 %v2914_v45, %v2911_v54 }
 0x166   : > { %v6141_v34 = vpop.f32.mrf.mxu1  ;;  %v6213_v48 = vpop.f32.mrf.mxu0  ;;  %6628 = vmatpush3.bf16.msra.mxu0 %v7025_v19  ;;  %6555 = vmatprep.subr.bf16.mxu1 %v7139_v1  ;;  %v2490_v2 = vrot.slane %v7880_v21, 3 }
 0x167   : > { %6629 = vmatprep.subr.bf16.mxu0 %v7139_v1  ;;  %6556 = vmatpush3.bf16.msra.mxu1 %v7036_v20  ;;  %v7053_v20 = vld [vmem:[%s8713_s1 + $0x1c0] sm:$0xff]   ;;  %v2916_v48 = vsel %vm1486_vm3, %v2906_v15, %v2915_v25  ;;  %v2492_v15 = vrot.slane %v7913_v13, 3 }
 0x168   : > { %v923_v7 = vpop.f32.mrf.mxu1  ;;  %v1279_v55 = vpop.f32.mrf.mxu0  ;;  %6557 = vmatprep.subr.bf16.mxu1 %v7139_v1  ;;  %v2491_v37 = vsel %vm1093_vm2, %v2488_v49, %v2490_v2 }
 0x169   : > { %v7883_v43 = vadd.f32 %v1279_v55, %v916_v38  ;;  %v924_v19 = vadd.f32 %v923_v7, %v7589_v40  ;;  %v2920_v40 = vrot.slane %v2918_v0, 2  ;;  %v7028_v0 = vld [vmem:[%s7194_s23 + $0xbc] sm:$0xff]  }
 0x16a   : > { %v6142_v28 = vpop.f32.mrf.mxu1  ;;  %v6214_v35 = vpop.f32.mrf.mxu0  ;;  %6630 = vmatpush3.bf16.msra.mxu0 %v7031_v52  ;;  %v2923_v52 = vrot.slane %v2921_v27, 3 }
 0x16b   : > { %6631 = vmatprep.subr.bf16.mxu0 %v7139_v1  ;;  %6558 = vmatpush3.bf16.msra.mxu1 %v7042_v53  ;;  %v7029_v53 = vld [vmem:[%s7194_s23 + $0x134] sm:$0xff]  }
 0x16c   : > { %v928_v3 = vpop.f32.mrf.mxu1  ;;  %v1284_v58 = vpop.f32.mrf.mxu0  ;;  %6424 = vmatmul.mubr.bf16.gmra.mxu1 %v2489_v32  ;;  %6496 = vmatmul.mubr.bf16.gmra.mxu0 %v2907_v24  ;;  %v7049_v32 = vld [vmem:[%s8713_s1 + $0x208] sm:$0xff]   ;;  %v2924_v45 = vor.u32 %v2923_v52, %v2920_v40  ;;  %v2930_v62 = vshll.u32 %v7029_v53, 16 }
 0x16d   : > { %v7896_v38 = vadd.f32 %v1284_v58, %v921_v31  ;;  %6427 = vmatprep.mubr.msk.bf16.mxu1 %vm7140_vm0, %v7139_v1  ;;  %6499 = vmatprep.mubr.msk.bf16.mxu0 %vm7140_vm0, %v7139_v1  ;;  %v929_v49 = vadd.f32 %v928_v3, %v7603_v50  ;;  %v2927_v50 = vshrl.u32 %v7029_v53, 16  ;;  %v2493_v58 = vsel %vm1093_vm2, %v2490_v2, %v2492_v15 }
 0x16e   : > { %v6145_v29 = vpop.f32.mrf.mxu1  ;;  %v6217_v56 = vpop.f32.mrf.mxu0  ;;  %6632 = vmatpush3.bf16.msra.mxu0 %v7037_v12  ;;  %6559 = vmatprep.subr.bf16.mxu1 %v7139_v1  ;;  %v7054_v12 = vld [vmem:[%s8713_s1 + $0x200] sm:$0xff]   ;;  %v2494_v2 = vrot.slane %v7028_v0, 3 }
 0x16f   : > { %6633 = vmatprep.subr.bf16.mxu0 %v7139_v1  ;;  %6560 = vmatpush3.bf16.msra.mxu1 %v7048_v14  ;;  %v2925_v29 = vsel %vm1486_vm3, %v2915_v25, %v2924_v45  ;;  %v2929_v56 = vrot.slane %v2927_v50, 2 }
 0x170   : > { %v931_v51 = vpop.f32.mrf.mxu1  ;;  %v1287_v36 = vpop.f32.mrf.mxu0  ;;  %6561 = vmatprep.subr.bf16.mxu1 %v7139_v1 }
 0x171   : > { %v7916_v34 = vadd.f32 %v1287_v36, %v924_v19  ;;  %v932_v31 = vadd.f32 %v931_v51, %v7621_v63  ;;  %v7033_v19 = vld [vmem:[%s7194_s23 + $0x13c] sm:$0xff]  }
 0x172   : > { %v6146_v7 = vpop.f32.mrf.mxu1  ;;  %v6218_v55 = vpop.f32.mrf.mxu0  ;;  %6634 = vmatpush3.bf16.msra.mxu0 %v7043_v30  ;;  %v2932_v30 = vrot.slane %v2930_v62, 3 }
 0x173   : > { %6635 = vmatprep.subr.bf16.mxu0 %v7139_v1  ;;  %6562 = vmatpush3.bf16.msra.mxu1 %v7053_v20 }
 0x174   : > { %v936_v21 = vpop.f32.mrf.mxu1  ;;  %v1292_v24 = vpop.f32.mrf.mxu0  ;;  %6428 = vmatmul.mubr.bf16.gmra.mxu1 %v2491_v37  ;;  %6500 = vmatmul.mubr.bf16.gmra.mxu0 %v2916_v48  ;;  %v2933_v25 = vor.u32 %v2932_v30, %v2929_v56  ;;  %v2936_v48 = vshrl.u32 %v7033_v19, 16 }
 0x175   : > { %v7926_v54 = vadd.f32 %v1292_v24, %v929_v49  ;;  %6431 = vmatprep.mubr.msk.bf16.mxu1 %vm7140_vm0, %v7139_v1  ;;  %6503 = vmatprep.mubr.msk.bf16.mxu0 %vm7140_vm0, %v7139_v1  ;;  %v937_v37 = vadd.f32 %v936_v21, %v7632_v11  ;;  %v2939_v11 = vshll.u32 %v7033_v19, 16  ;;  %v7032_v49 = vld [vmem:[%s7194_s23 + $0xc4] sm:$0xff]  }
 0x176   : > { %v6149_v28 = vpop.f32.mrf.mxu1  ;;  %v6221_v35 = vpop.f32.mrf.mxu0  ;;  %6636 = vmatpush3.bf16.msra.mxu0 %v7049_v32  ;;  %6699 = vmatprep.subr.bf16.mxu1 %v7139_v1  ;;  %v2495_v32 = vsel %vm1093_vm2, %v2492_v15, %v2494_v2  ;;  %v2934_v24 = vsel %vm1486_vm3, %v2924_v45, %v2933_v25  ;;  %v2938_v50 = vrot.slane %v2936_v48, 2 }
 0x177   : > { %6637 = vmatprep.subr.bf16.mxu0 %v7139_v1  ;;  %v2941_v62 = vrot.slane %v2939_v11, 3  ;;  %v7035_v28 = vld [vmem:[%s7194_s23 + $0x144] sm:$0xff]   ;;  %v7039_v11 = vld [vmem:[%s7194_s23 + $0x14c] sm:$0xff]  }
 0x178   : > { %v939_v14 = vpop.f32.mrf.mxu1  ;;  %v1295_v3 = vpop.f32.mrf.mxu0  ;;  %v2945_v45 = vshrl.u32 %v7035_v28, 16  ;;  %v2948_v0 = vshll.u32 %v7035_v28, 16 }
 0x179   : > { %v7940_v27 = vadd.f32 %v1295_v3, %v932_v31  ;;  %v940_v53 = vadd.f32 %v939_v14, %v7647_v23  ;;  %v2496_v23 = vrot.slane %v7032_v49, 3  ;;  %v2942_v15 = vor.u32 %v2941_v62, %v2938_v50 }
 0x17a   : > { %v6150_v20 = vpop.f32.mrf.mxu1  ;;  %v6222_v36 = vpop.f32.mrf.mxu0  ;;  %6638 = vmatpush3.bf16.msra.mxu0 %v7054_v12  ;;  %v2950_v48 = vrot.slane %v2948_v0, 3  ;;  %v2957_v49 = vshll.u32 %v7039_v11, 16  ;;  %v7041_v0 = vld [vmem:[%s7194_s23 + $0x154] sm:$0xff]  }
 0x17b   : > { %6775 = vmatprep.subr.bf16.mxu0 %v7139_v1  ;;  %v2497_v20 = vsel %vm1093_vm2, %v2494_v2, %v2496_v23  ;;  %v7034_v36 = vld [vmem:[%s7194_s23 + $0xcc] sm:$0xff]  }
 0x17c   : > { %v944_v63 = vpop.f32.mrf.mxu1  ;;  %v1300_v51 = vpop.f32.mrf.mxu0  ;;  %6432 = vmatmul.mubr.bf16.gmra.mxu1 %v2493_v58  ;;  %6504 = vmatmul.mubr.bf16.gmra.mxu0 %v2925_v29 }
 0x17d   : > { %v7946_v13 = vadd.f32 %v1300_v51, %v937_v37  ;;  %6435 = vmatprep.mubr.msk.bf16.mxu1 %vm7140_vm0, %v7139_v1  ;;  %6507 = vmatprep.mubr.msk.bf16.mxu0 %vm7140_vm0, %v7139_v1  ;;  %v945_v31 = vadd.f32 %v944_v63, %v7654_v33  ;;  %v2943_v63 = vsel %vm1486_vm3, %v2933_v25, %v2942_v15  ;;  %v2947_v51 = vrot.slane %v2945_v45, 2 }
 0x17e   : > { %v6153_v40 = vpop.f32.mrf.mxu1  ;;  %v6225_v52 = vpop.f32.mrf.mxu0  ;;  %v2954_v25 = vshrl.u32 %v7039_v11, 16  ;;  %v2959_v45 = vrot.slane %v2957_v49, 3 }
 0x17f   : > { %v2951_v2 = vor.u32 %v2950_v48, %v2947_v51 }
 0x180   : > { %v947_v7 = vpop.f32.mrf.mxu1  ;;  %v1303_v55 = vpop.f32.mrf.mxu0 }
 0x181   : > { %v7955_v21 = vadd.f32 %v1303_v55, %v940_v53  ;;  %v948_v56 = vadd.f32 %v947_v7, %v7662_v46  ;;  %v2498_v46 = vrot.slane %v7034_v36, 3  ;;  %v2966_v36 = vshll.u32 %v7041_v0, 16 }
 0x182   : > { %v6154_v35 = vpop.f32.mrf.mxu1  ;;  %v6226_v12 = vpop.f32.mrf.mxu0 }
 0x183   : > { %v2499_v35 = vsel %vm1093_vm2, %v2496_v23, %v2498_v46  ;;  %v7038_v12 = vld [vmem:[%s7194_s23 + $0xd4] sm:$0xff]   ;;  %v2968_v49 = vrot.slane %v2966_v36, 3 }
 0x184   : > { %v952_v3 = vpop.f32.mrf.mxu1  ;;  %v1308_v58 = vpop.f32.mrf.mxu0  ;;  %6436 = vmatmul.mubr.bf16.gmra.mxu1 %v2495_v32  ;;  %6508 = vmatmul.mubr.bf16.gmra.mxu0 %v2934_v24 }
 0x185   : > { %v7960_v14 = vadd.f32 %v1308_v58, %v945_v31  ;;  %6439 = vmatprep.mubr.msk.bf16.mxu1 %vm7140_vm0, %v7139_v1  ;;  %6511 = vmatprep.mubr.msk.bf16.mxu0 %vm7140_vm0, %v7139_v1  ;;  %v953_v53 = vadd.f32 %v952_v3, %v7670_v60  ;;  %v2952_v3 = vsel %vm1486_vm3, %v2942_v15, %v2951_v2  ;;  %v2956_v58 = vrot.slane %v2954_v25, 2 }
 0x186   : > { %v6157_v29 = vpop.f32.mrf.mxu1  ;;  %v6229_v33 = vpop.f32.mrf.mxu0 }
 0x187   : > { %v2960_v15 = vor.u32 %v2959_v45, %v2956_v58 }
 0x188   : > { %v955_v30 = vpop.f32.mrf.mxu1  ;;  %v1311_v19 = vpop.f32.mrf.mxu0 }
 0x189   : > { %v7969_v37 = vadd.f32 %v1311_v19, %v948_v56  ;;  %v956_v50 = vadd.f32 %v955_v30, %v7678_v9  ;;  %v2500_v9 = vrot.slane %v7038_v12, 3  ;;  %v2963_v30 = vshrl.u32 %v7041_v0, 16 }
 0x18a   : > { %v6158_v40 = vpop.f32.mrf.mxu1  ;;  %v6230_v52 = vpop.f32.mrf.mxu0 }
 0x18b   : > { %v2501_v40 = vsel %vm1093_vm2, %v2498_v46, %v2500_v9  ;;  %v7045_v52 = vld [vmem:[%s7194_s23 + $0x15c] sm:$0xff]   ;;  %v2965_v25 = vrot.slane %v2963_v30, 2  ;;  %v7047_v30 = vld [vmem:[%s7194_s23 + $0x164] sm:$0xff]  }
 0x18c   : > { %v960_v55 = vpop.f32.mrf.mxu1  ;;  %v1316_v32 = vpop.f32.mrf.mxu0  ;;  %6440 = vmatmul.mubr.bf16.gmra.mxu1 %v2497_v20  ;;  %6512 = vmatmul.mubr.bf16.gmra.mxu0 %v2943_v63 }
 0x18d   : > { %v7974_v7 = vadd.f32 %v1316_v32, %v953_v53  ;;  %6443 = vmatprep.mubr.msk.bf16.mxu1 %vm7140_vm0, %v7139_v1  ;;  %6515 = vmatprep.mubr.msk.bf16.mxu0 %vm7140_vm0, %v7139_v1  ;;  %v961_v56 = vadd.f32 %v960_v55, %v7686_v26  ;;  %v2961_v55 = vsel %vm1486_vm3, %v2951_v2, %v2960_v15  ;;  %v7040_v32 = vld [vmem:[%s7194_s23 + $0xdc] sm:$0xff]  }
 0x18e   : > { %v6161_v24 = vpop.f32.mrf.mxu1  ;;  %v6233_v60 = vpop.f32.mrf.mxu0  ;;  %v2502_v2 = vrot.slane %v7040_v32, 3 }
 0x190   : > { %v963_v62 = vpop.f32.mrf.mxu1  ;;  %v1319_v28 = vpop.f32.mrf.mxu0 }
 0x191   : > { %v7983_v31 = vadd.f32 %v1319_v28, %v956_v50  ;;  %v964_v51 = vadd.f32 %v963_v62, %v7694_v41  ;;  %v2972_v41 = vshrl.u32 %v7045_v52, 16  ;;  %v2975_v62 = vshll.u32 %v7045_v52, 16 }
 0x192   : > { %v6162_v29 = vpop.f32.mrf.mxu1  ;;  %v6234_v33 = vpop.f32.mrf.mxu0 }
 0x193   : > { %v7044_v29 = vld [vmem:[%s7194_s23 + $0xe4] sm:$0xff]   ;;  %v2974_v33 = vrot.slane %v2972_v41, 2 }
 0x194   : > { %v968_v19 = vpop.f32.mrf.mxu1  ;;  %v1324_v20 = vpop.f32.mrf.mxu0  ;;  %6444 = vmatmul.mubr.bf16.gmra.mxu1 %v2499_v35  ;;  %6516 = vmatmul.mubr.bf16.gmra.mxu0 %v2952_v3 }
 0x195   : > { %v7988_v23 = vadd.f32 %v1324_v20, %v961_v56  ;;  %6447 = vmatprep.mubr.msk.bf16.mxu1 %vm7140_vm0, %v7139_v1  ;;  %6519 = vmatprep.mubr.msk.bf16.mxu0 %vm7140_vm0, %v7139_v1  ;;  %v969_v50 = vadd.f32 %v968_v19, %v7702_v57  ;;  %v2969_v57 = vor.u32 %v2968_v49, %v2965_v25  ;;  %v2977_v56 = vrot.slane %v2975_v62, 3 }
 0x196   : > { %v6165_v63 = vpop.f32.mrf.mxu1  ;;  %v6237_v26 = vpop.f32.mrf.mxu0  ;;  %v2503_v20 = vsel %vm1093_vm2, %v2500_v9, %v2502_v2  ;;  %v2984_v9 = vshll.u32 %v7047_v30, 16 }
 0x198   : > { %v971_v48 = vpop.f32.mrf.mxu1  ;;  %v1327_v11 = vpop.f32.mrf.mxu0  ;;  %v2986_v41 = vrot.slane %v2984_v9, 3 }
 0x199   : > { %v7997_v53 = vadd.f32 %v1327_v11, %v964_v51  ;;  %v2504_v48 = vrot.slane %v7044_v29, 3  ;;  %v2978_v11 = vor.u32 %v2977_v56, %v2974_v33 }
 0x19a   : > { %v6166_v24 = vpop.f32.mrf.mxu1  ;;  %v6238_v60 = vpop.f32.mrf.mxu0 }
 0x19b   : > { %v2505_v49 = vsel %vm1093_vm2, %v2502_v2, %v2504_v48  ;;  %v2979_v24 = vsel %vm1486_vm3, %v2969_v57, %v2978_v11  ;;  %v7051_v60 = vld [vmem:[%s7194_s23 + $0x16c] sm:$0xff]  }
 0x19c   : > { %v1332_v28 = vpop.f32.mrf.mxu0  ;;  %v1718_v35 = vpop.f32.mrf.mxu1  ;;  %6448 = vmatmul.mubr.bf16.gmra.mxu1 %v2501_v40  ;;  %6520 = vmatmul.mubr.bf16.gmra.mxu0 %v2961_v55 }
 0x19d   : > { %v8002_v46 = vadd.f32 %v1332_v28, %v969_v50  ;;  %v1836_v12 = vadd.f32 %v1718_v35, %v7729_v39  ;;  %6451 = vmatprep.mubr.msk.bf16.mxu1 %vm7140_vm0, %v7139_v1  ;;  %6523 = vmatprep.mubr.msk.bf16.mxu0 %vm7140_vm0, %v7139_v1  ;;  %v2970_v39 = vsel %vm1486_vm3, %v2960_v15, %v2969_v57  ;;  %v7046_v28 = vld [vmem:[%s7194_s23 + $0xec] sm:$0xff]  }
 0x19e   : > { %v6241_v3 = vpop.f32.mrf.mxu0  ;;  %v6261_v58 = vpop.f32.mrf.mxu1 }
 0x1a0   : > { %v1335_v45 = vpop.f32.mrf.mxu0  ;;  %v1721_v0 = vpop.f32.mrf.mxu1 }
 0x1a1   : > { %v1837_v19 = vadd.f32 %v1721_v0, %v7740_v44  ;;  %v2981_v44 = vshrl.u32 %v7047_v30, 16  ;;  %v2990_v45 = vshrl.u32 %v7051_v60, 16  ;;  %v2993_v0 = vshll.u32 %v7051_v60, 16 }
 0x1a2   : > { %v6242_v36 = vpop.f32.mrf.mxu0  ;;  %v6262_v63 = vpop.f32.mrf.mxu1 }
 0x1a3   : > { %v2983_v35 = vrot.slane %v2981_v44, 2  ;;  %v2992_v30 = vrot.slane %v2990_v45, 2  ;;  %v2995_v36 = vrot.slane %v2993_v0, 3 }
 0x1a4   : > { %v1726_v26 = vpop.f32.mrf.mxu1  ;;  %v2215_v51 = vpop.f32.mrf.mxu0  ;;  %6452 = vmatmul.mubr.bf16.gmra.mxu1 %v2503_v20  ;;  %6524 = vmatmul.mubr.bf16.gmra.mxu0 %v2970_v39  ;;  %v7050_v39 = vld [vmem:[%s7194_s23 + $0xf4] ss:$0 sps:$4 sm:$0xff]  }
 0x1a5   : > { %v1838_v40 = vadd.f32 %v1726_v26, %v7743_v5  ;;  %v8015_v52 = vadd.f32 %v2215_v51, %v1836_v12  ;;  %6455 = vmatprep.mubr.msk.bf16.mxu1 %vm7140_vm0, %v7139_v1  ;;  %6527 = vmatprep.mubr.msk.bf16.mxu0 %vm7140_vm0, %v7139_v1  ;;  %v2987_v29 = vor.u32 %v2986_v41, %v2983_v35 }
 0x1a6   : > { %v6265_v15 = vpop.f32.mrf.mxu1  ;;  %v6337_v55 = vpop.f32.mrf.mxu0 }
 0x1a7   : > { %v2988_v51 = vsel %vm1486_vm3, %v2978_v11, %v2987_v29 }
 0x1a8   : > { %v1729_v32 = vpop.f32.mrf.mxu1  ;;  %v2218_v25 = vpop.f32.mrf.mxu0 }
 0x1a9   : > { %v1839_v5 = vadd.f32 %v1729_v32, %v7750_v17  ;;  %v8025_v50 = vadd.f32 %v2218_v25, %v1837_v19  ;;  %v2506_v17 = vrot.slane %v7046_v28, 3  ;;  %v2508_v32 = vrot.slane %v7050_v39, 3 }
 0x1aa   : > { %v6266_v62 = vpop.f32.mrf.mxu1  ;;  %v6338_v12 = vpop.f32.mrf.mxu0  ;;  %v2996_v25 = vor.u32 %v2995_v36, %v2992_v30 }
 0x1ab   : > { %v2507_v26 = vsel %vm1093_vm2, %v2504_v48, %v2506_v17  ;;  %v2509_v35 = vsel %vm1093_vm2, %v2506_v17, %v2508_v32 }
 0x1ac   : > { %v1734_v3 = vpop.f32.mrf.mxu1  ;;  %v2223_v58 = vpop.f32.mrf.mxu0  ;;  %6456 = vmatmul.mubr.bf16.gmra.mxu1 %v2505_v49  ;;  %6528 = vmatmul.mubr.bf16.gmra.mxu0 %v2979_v24  ;;  %v2997_v41 = vsel %vm1486_vm3, %v2987_v29, %v2996_v25 }
 0x1ad   : > { %v1840_v2 = vadd.f32 %v1734_v3, %v7756_v47  ;;  %v8029_v57 = vadd.f32 %v2223_v58, %v1838_v40  ;;  %6459 = vmatprep.mubr.msk.bf16.mxu1 %vm7140_vm0, %v7139_v1  ;;  %6531 = vmatprep.mubr.msk.bf16.mxu0 %vm7140_vm0, %v7139_v1  ;;  %v7052_v40 = vld [vmem:[%s7194_s23 + $0x174] ss:$0 sps:$4 sm:$0x77]  }
 0x1ae   : > { %v6269_v33 = vpop.f32.mrf.mxu1  ;;  %v6341_v56 = vpop.f32.mrf.mxu0  ;;  %v3002_v48 = vshll.u32 %v7052_v40, 16 }
 0x1b0   : > { %v1737_v19 = vpop.f32.mrf.mxu1  ;;  %v2226_v20 = vpop.f32.mrf.mxu0  ;;  %v3004_v3 = vrot.slane %v3002_v48, 3  ;;  %v8075_v48 = vld [vmem:[%s7194_s23 + $0x194] sm:$0xff]  }
 0x1b1   : > { %v1841_v47 = vadd.f32 %v1737_v19, %v7765_v61  ;;  %v8037_v63 = vadd.f32 %v2226_v20, %v1839_v5  ;;  %v2999_v61 = vshrl.u32 %v7052_v40, 16 }
 0x1b2   : > { %v6270_v44 = vpop.f32.mrf.mxu1  ;;  %v6342_v9 = vpop.f32.mrf.mxu0 }
 0x1b3   : > { %v3001_v12 = vrot.slane %v2999_v61, 2 }
 0x1b4   : > { %v1742_v15 = vpop.f32.mrf.mxu1  ;;  %v2231_v55 = vpop.f32.mrf.mxu0  ;;  %6460 = vmatmul.mubr.bf16.gmra.mxu1 %v2507_v26  ;;  %6532 = vmatmul.mubr.bf16.gmra.mxu0 %v2988_v51 }
 0x1b5   : > { %v1842_v49 = vadd.f32 %v1742_v15, %v7768_v6  ;;  %v8043_v24 = vadd.f32 %v2231_v55, %v1840_v2  ;;  %6463 = vmatprep.mubr.msk.bf16.mxu1 %vm7140_vm0, %v7139_v1  ;;  %6535 = vmatprep.mubr.msk.bf16.mxu0 %vm7140_vm0, %v7139_v1 }
 0x1b6   : > { %v6273_v11 = vpop.f32.mrf.mxu1  ;;  %v6345_v60 = vpop.f32.mrf.mxu0 }
 0x1b8   : > { %v1745_v5 = vpop.f32.mrf.mxu1  ;;  %v2234_v28 = vpop.f32.mrf.mxu0 }
 0x1b9   : > { %v1843_v6 = vadd.f32 %v1745_v5, %v7780_v59  ;;  %v8052_v62 = vadd.f32 %v2234_v28, %v1841_v47  ;;  %v3005_v59 = vor.u32 %v3004_v3, %v3001_v12  ;;  %v7056_v47 = vld [vmem:[%s7194_s23 + $0x18c] sm:$0xff]   ;;  %v7060_v28 = vld [vmem:[%s7194_s23 + $0x14] sm:$0xff]  }
 0x1ba   : > { %v6274_v58 = vpop.f32.mrf.mxu1  ;;  %v6346_v45 = vpop.f32.mrf.mxu0  ;;  %v3372_v55 = vrot.slane %v7056_v47, 2  ;;  %v7059_v5 = vld [vmem:[%s7194_s23 + $0xc] sm:$0xf8]   ;;  %v8107_v47 = vld [vmem:[%s7194_s23 + $0x19c] sm:$0xff]  }
 0x1bb   : > { %v3006_v36 = vsel %vm1486_vm3, %v2996_v25, %v3005_v59  ;;  %v3374_v45 = vrot.slane %v8075_v48, 2 }
 0x1bc   : > { %v1750_v0 = vpop.f32.mrf.mxu1  ;;  %v2239_v2 = vpop.f32.mrf.mxu0  ;;  %6464 = vmatmul.mubr.bf16.gmra.mxu1 %v2509_v35  ;;  %6536 = vmatmul.mubr.bf16.gmra.mxu0 %v2997_v41 }
 0x1bd   : > { %v1844_v33 = vadd.f32 %v1750_v0, %v7786_v8  ;;  %v8055_v56 = vadd.f32 %v2239_v2, %v1842_v49  ;;  %6467 = vmatprep.mubr.msk.bf16.mxu1 %vm7140_vm0, %v7139_v1  ;;  %6539 = vmatprep.mubr.msk.bf16.mxu0 %vm7140_vm0, %v7139_v1  ;;  %v7055_v8 = vld [vmem:[%s7194_s23 + $0x184] sm:$0xfc]   ;;  %v3763_v2 = vrot.slane %v7059_v5, 3 }
 0x1be   : > { %v6277_v17 = vpop.f32.mrf.mxu1  ;;  %v6349_v29 = vpop.f32.mrf.mxu0 }
 0x1c0   : > { %v1753_v19 = vpop.f32.mrf.mxu1  ;;  %v2242_v20 = vpop.f32.mrf.mxu0 }
 0x1c1   : > { %v1845_v39 = vadd.f32 %v1753_v19, %v7795_v4  ;;  %v8062_v30 = vadd.f32 %v2242_v20, %v1843_v6  ;;  %v3371_v4 = vrot.slane %v7055_v8, 2  ;;  %v7057_v6 = vld [vmem:[%s8713_s1 + $0x278] sm:$0xff]  }
 0x1c2   : > { %v6278_v26 = vpop.f32.mrf.mxu1  ;;  %v6350_v51 = vpop.f32.mrf.mxu0  ;;  %v7061_v8 = vld [vmem:[%s8713_s1 + $0x2b8] sm:$0xff]  }
 0x1c3   : > { %v3373_v60 = vsel %vm3370_vm4, %v3371_v4, %v3372_v55  ;;  %v8110_v26 = vld [vmem:[%s7194_s23 + $0x1c] sm:$0xff]  }
 0x1c4   : > { %v1758_v40 = vpop.f32.mrf.mxu1  ;;  %v2247_v44 = vpop.f32.mrf.mxu0  ;;  %6468 = vmatmul.mubr.bf16.gmra.mxu1 %v2508_v32  ;;  %6540 = vmatmul.mubr.bf16.gmra.mxu0 %v3006_v36 }
 0x1c5   : > { %v1846_v9 = vadd.f32 %v1758_v40, %v7804_v18  ;;  %v8068_v15 = vadd.f32 %v2247_v44, %v1844_v33  ;;  %6543 = vmatprep.mubr.msk.bf16.mxu0 %vm7140_vm0, %v7139_v1  ;;  %6563 = vmatprep.mubr.msk.bf16.mxu1 %vm7140_vm0, %v7139_v1  ;;  %v3764_v33 = vrot.slane %v7060_v28, 3 }
 0x1c6   : > { %v6281_v25 = vpop.f32.mrf.mxu1  ;;  %v6353_v49 = vpop.f32.mrf.mxu0 }
 0x1c7   : > { %v3765_v36 = vsel %vm1093_vm2, %v3763_v2, %v3764_v33  ;;  %v3376_v25 = vrot.slane %v8107_v47, 2  ;;  %v3766_v49 = vrot.slane %v8110_v26, 3  ;;  %v7071_v2 = vld [vmem:[%s8713_s1 + $0x2a8] sm:$0xff]  }
 0x1c8   : > { %v1761_v61 = vpop.f32.mrf.mxu1  ;;  %v2250_v32 = vpop.f32.mrf.mxu0 }
 0x1c9   : > { %v1847_v18 = vadd.f32 %v1761_v61, %v7819_v16  ;;  %v8078_v11 = vadd.f32 %v2250_v32, %v1845_v39  ;;  %v3375_v39 = vsel %vm3370_vm4, %v3372_v55, %v3374_v45  ;;  %v7067_v61 = vld [vmem:[%s8713_s1 + $0x2b0] sm:$0xff]  }
 0x1ca   : > { %v6282_v35 = vpop.f32.mrf.mxu1  ;;  %v6354_v41 = vpop.f32.mrf.mxu0 }
 0x1cb   : > { %v3377_v35 = vsel %vm3370_vm4, %v3374_v45, %v3376_v25  ;;  %v3767_v41 = vsel %vm1093_vm2, %v3764_v33, %v3766_v49 }
 0x1cc   : > { %v1766_v3 = vpop.f32.mrf.mxu1  ;;  %v2255_v58 = vpop.f32.mrf.mxu0  ;;  %6544 = vmatmul.mubr.bf16.gmra.mxu0 %v3001_v12  ;;  %6564 = vmatmul.mubr.bf16.vlgmr.msra.gmra.mxu1 %v3373_v60  ;;  %v7064_v12 = vld [vmem:[%s8713_s1 + $0x270] sm:$0xff]  }
 0x1cd   : > { %v1848_v16 = vadd.f32 %v1766_v3, %v7833_v42  ;;  %v8088_v0 = vadd.f32 %v2255_v58, %v1846_v9  ;;  %6567 = vmatprep.mubr.msk.bf16.mxu1 %vm7140_vm0, %v7139_v1  ;;  %6639 = vmatprep.mubr.msk.bf16.mxu0 %vm7140_vm0, %v7139_v1  ;;  %v8142_v3 = vld [vmem:[%s7194_s23 + $0x24] sm:$0xff]  }
 0x1ce   : > { %v6285_v59 = vpop.f32.mrf.mxu1  ;;  %v6357_v17 = vpop.f32.mrf.mxu0  ;;  %6700 = vmatpush3.bf16.msra.mxu1 %v7057_v6  ;;  %v8139_v6 = vld [vmem:[%s7194_s23 + $0x1a4] sm:$0xff]  }
 0x1cf   : > { %6701 = vmatprep.subr.bf16.mxu1 %v7139_v1 }
 0x1d0   : > { %v1769_v42 = vpop.f32.mrf.mxu1  ;;  %v2258_v29 = vpop.f32.mrf.mxu0 }
 0x1d1   : > { %v1849_v19 = vadd.f32 %v1769_v42, %v7853_v10  ;;  %v8099_v20 = vadd.f32 %v2258_v29, %v1847_v18  ;;  %v7070_v10 = vld [vmem:[%s8713_s1 + $0x268] sm:$0xff]   ;;  %v3768_v42 = vrot.slane %v8142_v3, 3 }
 0x1d2   : > { %v6286_v51 = vpop.f32.mrf.mxu1  ;;  %v6358_v40 = vpop.f32.mrf.mxu0  ;;  %6702 = vmatpush3.bf16.msra.mxu1 %v7064_v12  ;;  %v3378_v12 = vrot.slane %v8139_v6, 2 }
 0x1d3   : > { %6703 = vmatprep.subr.bf16.mxu1 %v7139_v1  ;;  %v3769_v40 = vsel %vm1093_vm2, %v3766_v49, %v3768_v42 }
 0x1d4   : > { %v1774_v44 = vpop.f32.mrf.mxu1  ;;  %v2263_v9 = vpop.f32.mrf.mxu0  ;;  %6568 = vmatmul.mubr.bf16.gmra.mxu1 %v3375_v39  ;;  %6640 = vmatmul.mubr.bf16.vlgmr.msra.gmra.mxu0 %v3765_v36  ;;  %v7088_v39 = vld [vmem:[%s8713_s1 + $0x250] sm:$0xff]   ;;  %v3379_v51 = vsel %vm3370_vm4, %v3376_v25, %v3378_v12 }
 0x1d5   : > { %v1850_v4 = vadd.f32 %v1774_v44, %v7864_v22  ;;  %v8117_v55 = vadd.f32 %v2263_v9, %v1848_v16  ;;  %6776 = vmatpush3.bf16.msra.mxu0 %v7061_v8  ;;  %6571 = vmatprep.mubr.msk.bf16.mxu1 %vm7140_vm0, %v7139_v1  ;;  %v7076_v22 = vld [vmem:[%s8713_s1 + $0x260] sm:$0xff]   ;;  %v8178_v44 = vld [vmem:[%s7194_s23 + $0x2c] sm:$0xff]  }
 0x1d6   : > { %v6289_v32 = vpop.f32.mrf.mxu1  ;;  %v6361_v48 = vpop.f32.mrf.mxu0  ;;  %6643 = vmatprep.mubr.msk.bf16.mxu0 %vm7140_vm0, %v7139_v1  ;;  %6777 = vmatprep.subr.bf16.mxu0 %v7139_v1 }
 0x1d7   : > { %6704 = vmatpush3.bf16.msra.mxu1 %v7070_v10  ;;  %v8175_v10 = vld [vmem:[%s7194_s23 + $0x1ac] sm:$0xff]  }
 0x1d8   : > { %v1777_v18 = vpop.f32.mrf.mxu1  ;;  %v2266_v60 = vpop.f32.mrf.mxu0  ;;  %6705 = vmatprep.subr.bf16.mxu1 %v7139_v1 }
 0x1d9   : > { %v1851_v5 = vadd.f32 %v1777_v18, %v7883_v43  ;;  %v8134_v28 = vadd.f32 %v2266_v60, %v1849_v19  ;;  %6778 = vmatpush3.bf16.msra.mxu0 %v7067_v61  ;;  %v7082_v43 = vld [vmem:[%s8713_s1 + $0x258] sm:$0xff]   ;;  %v3770_v18 = vrot.slane %v8178_v44, 3 }
 0x1da   : > { %v6290_v58 = vpop.f32.mrf.mxu1  ;;  %v6362_v16 = vpop.f32.mrf.mxu0  ;;  %6779 = vmatprep.subr.bf16.mxu0 %v7139_v1  ;;  %v7083_v61 = vld [vmem:[%s8713_s1 + $0x298] sm:$0xff]  }
 0x1db   : > { %6706 = vmatpush3.bf16.msra.mxu1 %v7076_v22  ;;  %v3380_v22 = vrot.slane %v8175_v10, 2 }
 0x1dc   : > { %v1782_v45 = vpop.f32.mrf.mxu1  ;;  %v2271_v33 = vpop.f32.mrf.mxu0  ;;  %6572 = vmatmul.mubr.bf16.gmra.mxu1 %v3377_v35  ;;  %6644 = vmatmul.mubr.bf16.gmra.mxu0 %v3767_v41  ;;  %v7099_v35 = vld [vmem:[%s8713_s1 + $0x240] sm:$0xff]  }
 0x1dd   : > { %v1852_v59 = vadd.f32 %v1782_v45, %v7896_v38  ;;  %v8152_v17 = vadd.f32 %v2271_v33, %v1850_v4  ;;  %6575 = vmatprep.mubr.msk.bf16.mxu1 %vm7140_vm0, %v7139_v1  ;;  %6647 = vmatprep.mubr.msk.bf16.mxu0 %vm7140_vm0, %v7139_v1  ;;  %v7077_v38 = vld [vmem:[%s8713_s1 + $0x2a0] sm:$0xff]   ;;  %v3381_v16 = vsel %vm3370_vm4, %v3378_v12, %v3380_v22  ;;  %v7073_v45 = vld [vmem:[%s7194_s23 + $0x34] sm:$0xff]  }
 0x1de   : > { %v6293_v29 = vpop.f32.mrf.mxu1  ;;  %v6365_v19 = vpop.f32.mrf.mxu0  ;;  %6780 = vmatpush3.bf16.msra.mxu0 %v7071_v2  ;;  %6707 = vmatprep.subr.bf16.mxu1 %v7139_v1  ;;  %v3771_v2 = vsel %vm1093_vm2, %v3768_v42, %v3770_v18 }
 0x1df   : > { %6781 = vmatprep.subr.bf16.mxu0 %v7139_v1  ;;  %6708 = vmatpush3.bf16.msra.mxu1 %v7082_v43  ;;  %v7072_v43 = vld [vmem:[%s7194_s23 + $0x1b4] sm:$0xff]   ;;  %v7095_v29 = vld [vmem:[%s8713_s1 + $0x288] sm:$0xff]  }
 0x1e0   : > { %v1785_v36 = vpop.f32.mrf.mxu1  ;;  %v2274_v8 = vpop.f32.mrf.mxu0  ;;  %6709 = vmatprep.subr.bf16.mxu1 %v7139_v1  ;;  %v3382_v42 = vrot.slane %v7072_v43, 2  ;;  %v7079_v43 = vld [vmem:[%s7194_s23 + $0x44] sm:$0xff]  }
 0x1e1   : > { %v1853_v47 = vadd.f32 %v1785_v36, %v7916_v34  ;;  %v8170_v26 = vadd.f32 %v2274_v8, %v1851_v5  ;;  %v7094_v34 = vld [vmem:[%s8713_s1 + $0x248] sm:$0xff]  }
 0x1e2   : > { %v6294_v9 = vpop.f32.mrf.mxu1  ;;  %v6366_v4 = vpop.f32.mrf.mxu0  ;;  %6782 = vmatpush3.bf16.msra.mxu0 %v7077_v38  ;;  %v3383_v44 = vsel %vm3370_vm4, %v3380_v22, %v3382_v42 }
 0x1e3   : > { %6783 = vmatprep.subr.bf16.mxu0 %v7139_v1  ;;  %6710 = vmatpush3.bf16.msra.mxu1 %v7088_v39  ;;  %v3772_v39 = vrot.slane %v7073_v45, 3  ;;  %v7074_v4 = vld [vmem:[%s7194_s23 + $0x1bc] sm:$0xff]  }
 0x1e4   : > { %v1790_v25 = vpop.f32.mrf.mxu1  ;;  %v2279_v49 = vpop.f32.mrf.mxu0  ;;  %6576 = vmatmul.mubr.bf16.gmra.mxu1 %v3379_v51  ;;  %6648 = vmatmul.mubr.bf16.gmra.mxu0 %v3769_v40  ;;  %v3384_v22 = vrot.slane %v7074_v4, 2 }
 0x1e5   : > { %v1854_v32 = vadd.f32 %v1790_v25, %v7926_v54  ;;  %v8188_v48 = vadd.f32 %v2279_v49, %v1852_v59  ;;  %6579 = vmatprep.mubr.msk.bf16.mxu1 %vm7140_vm0, %v7139_v1  ;;  %6651 = vmatprep.mubr.msk.bf16.mxu0 %vm7140_vm0, %v7139_v1  ;;  %v7089_v54 = vld [vmem:[%s8713_s1 + $0x290] sm:$0xff]   ;;  %v3773_v9 = vsel %vm1093_vm2, %v3770_v18, %v3772_v39 }
 0x1e6   : > { %v6297_v60 = vpop.f32.mrf.mxu1  ;;  %v6369_v5 = vpop.f32.mrf.mxu0  ;;  %6784 = vmatpush3.bf16.msra.mxu0 %v7083_v61  ;;  %6711 = vmatprep.subr.bf16.mxu1 %v7139_v1  ;;  %v7075_v61 = vld [vmem:[%s7194_s23 + $0x3c] sm:$0xff]  }
 0x1e7   : > { %6785 = vmatprep.subr.bf16.mxu0 %v7139_v1  ;;  %6712 = vmatpush3.bf16.msra.mxu1 %v7094_v34  ;;  %v3774_v18 = vrot.slane %v7075_v61, 3 }
 0x1e8   : > { %v1793_v41 = vpop.f32.mrf.mxu1  ;;  %v2282_v6 = vpop.f32.mrf.mxu0  ;;  %6713 = vmatprep.subr.bf16.mxu1 %v7139_v1 }
 0x1e9   : > { %v1855_v3 = vadd.f32 %v1793_v41, %v7940_v27  ;;  %v8206_v58 = vadd.f32 %v2282_v6, %v1853_v47  ;;  %v7100_v47 = vld [vmem:[%s8713_s1 + $0x280] sm:$0xff]  }
 0x1ea   : > { %v6298_v33 = vpop.f32.mrf.mxu1  ;;  %v6370_v59 = vpop.f32.mrf.mxu0  ;;  %6786 = vmatpush3.bf16.msra.mxu0 %v7089_v54 }
 0x1eb   : > { %6787 = vmatprep.subr.bf16.mxu0 %v7139_v1  ;;  %6714 = vmatpush3.bf16.msra.mxu1 %v7099_v35 }
 0x1ec   : > { %v1798_v19 = vpop.f32.mrf.mxu1  ;;  %v2287_v27 = vpop.f32.mrf.mxu0  ;;  %6580 = vmatmul.mubr.bf16.gmra.mxu1 %v3381_v16  ;;  %6652 = vmatmul.mubr.bf16.gmra.mxu0 %v3771_v2  ;;  %v3775_v16 = vsel %vm1093_vm2, %v3772_v39, %v3774_v18  ;;  %v7078_v2 = vld [vmem:[%s7194_s23 + $0x1c4] sm:$0xff]  }
 0x1ed   : > { %v1856_v12 = vadd.f32 %v1798_v19, %v7946_v13  ;;  %v8217_v38 = vadd.f32 %v2287_v27, %v1854_v32  ;;  %6583 = vmatprep.mubr.msk.bf16.mxu1 %vm7140_vm0, %v7139_v1  ;;  %6655 = vmatprep.mubr.msk.bf16.mxu0 %vm7140_vm0, %v7139_v1 }
 0x1ee   : > { %v6301_v36 = vpop.f32.mrf.mxu1  ;;  %v6373_v8 = vpop.f32.mrf.mxu0  ;;  %6788 = vmatpush3.bf16.msra.mxu0 %v7095_v29 }
 0x1ef   : > { %6789 = vmatprep.subr.bf16.mxu0 %v7139_v1 }
 0x1f0   : > { %v1801_v13 = vpop.f32.mrf.mxu1  ;;  %v2290_v51 = vpop.f32.mrf.mxu0 }
 0x1f1   : > { %v1857_v40 = vadd.f32 %v1801_v13, %v7955_v21  ;;  %v8228_v10 = vadd.f32 %v2290_v51, %v1855_v3 }
 0x1f2   : > { %v6302_v34 = vpop.f32.mrf.mxu1  ;;  %v6374_v25 = vpop.f32.mrf.mxu0  ;;  %6790 = vmatpush3.bf16.msra.mxu0 %v7100_v47 }
 0x1f4   : > { %v1806_v49 = vpop.f32.mrf.mxu1  ;;  %v2295_v32 = vpop.f32.mrf.mxu0  ;;  %6584 = vmatmul.mubr.bf16.gmra.mxu1 %v3383_v44  ;;  %6656 = vmatmul.mubr.bf16.gmra.mxu0 %v3773_v9  ;;  %v7081_v44 = vld [vmem:[%s7194_s23 + $0x4c] sm:$0xff]  }
 0x1f5   : > { %v1858_v60 = vadd.f32 %v1806_v49, %v7960_v14  ;;  %v8235_v21 = vadd.f32 %v2295_v32, %v1856_v12  ;;  %6587 = vmatprep.mubr.msk.bf16.mxu1 %vm7140_vm0, %v7139_v1  ;;  %6659 = vmatprep.mubr.msk.bf16.mxu0 %vm7140_vm0, %v7139_v1  ;;  %v3385_v14 = vsel %vm3370_vm4, %v3382_v42, %v3384_v22  ;;  %v3776_v12 = vrot.slane %v7079_v43, 3 }
 0x1f6   : > { %v6305_v5 = vpop.f32.mrf.mxu1  ;;  %v6377_v54 = vpop.f32.mrf.mxu0  ;;  %v3778_v32 = vrot.slane %v7081_v44, 3 }
 0x1f7   : > { %v3777_v51 = vsel %vm1093_vm2, %v3774_v18, %v3776_v12 }
 0x1f8   : > { %v1809_v35 = vpop.f32.mrf.mxu1  ;;  %v2298_v41 = vpop.f32.mrf.mxu0 }
 0x1f9   : > { %v1859_v6 = vadd.f32 %v1809_v35, %v7969_v37  ;;  %v8242_v3 = vadd.f32 %v2298_v41, %v1857_v40  ;;  %v3386_v37 = vrot.slane %v7078_v2, 2  ;;  %v7080_v40 = vld [vmem:[%s7194_s23 + $0x1cc] sm:$0xff]   ;;  %v3779_v41 = vsel %vm1093_vm2, %v3776_v12, %v3778_v32 }
 0x1fa   : > { %v6306_v45 = vpop.f32.mrf.mxu1  ;;  %v6378_v33 = vpop.f32.mrf.mxu0 }
 0x1fc   : > { %v1814_v59 = vpop.f32.mrf.mxu1  ;;  %v2303_v29 = vpop.f32.mrf.mxu0  ;;  %6588 = vmatmul.mubr.bf16.gmra.mxu1 %v3385_v14  ;;  %6660 = vmatmul.mubr.bf16.gmra.mxu0 %v3775_v16  ;;  %v7085_v14 = vld [vmem:[%s7194_s23 + $0x54] sm:$0xff]  }
 0x1fd   : > { %v1860_v19 = vadd.f32 %v1814_v59, %v7974_v7  ;;  %v8249_v27 = vadd.f32 %v2303_v29, %v1858_v60  ;;  %6591 = vmatprep.mubr.msk.bf16.mxu1 %vm7140_vm0, %v7139_v1  ;;  %6663 = vmatprep.mubr.msk.bf16.mxu0 %vm7140_vm0, %v7139_v1  ;;  %v3387_v7 = vsel %vm3370_vm4, %v3384_v22, %v3386_v37  ;;  %v3780_v29 = vrot.slane %v7085_v14, 3 }
 0x1fe   : > { %v6309_v42 = vpop.f32.mrf.mxu1  ;;  %v6381_v39 = vpop.f32.mrf.mxu0 }
 0x200   : > { %v1817_v36 = vpop.f32.mrf.mxu1  ;;  %v2306_v8 = vpop.f32.mrf.mxu0 }
 0x201   : > { %v1861_v47 = vadd.f32 %v1817_v36, %v7983_v31  ;;  %v8256_v13 = vadd.f32 %v2306_v8, %v1859_v6  ;;  %v3388_v31 = vrot.slane %v7080_v40, 2  ;;  %v7084_v6 = vld [vmem:[%s7194_s23 + $0x1d4] sm:$0xff]   ;;  %v7086_v8 = vld [vmem:[%s7194_s23 + $0x1dc] sm:$0xff]  }
 0x202   : > { %v6310_v9 = vpop.f32.mrf.mxu1  ;;  %v6382_v4 = vpop.f32.mrf.mxu0 }
 0x204   : > { %v1822_v61 = vpop.f32.mrf.mxu1  ;;  %v2311_v34 = vpop.f32.mrf.mxu0  ;;  %6592 = vmatmul.mubr.bf16.gmra.mxu1 %v3387_v7  ;;  %6664 = vmatmul.mubr.bf16.gmra.mxu0 %v3777_v51 }
 0x205   : > { %v1862_v25 = vadd.f32 %v1822_v61, %v7988_v23  ;;  %v8263_v49 = vadd.f32 %v2311_v34, %v1860_v19  ;;  %6595 = vmatprep.mubr.msk.bf16.mxu1 %vm7140_vm0, %v7139_v1  ;;  %6667 = vmatprep.mubr.msk.bf16.mxu0 %vm7140_vm0, %v7139_v1  ;;  %v3389_v23 = vsel %vm3370_vm4, %v3386_v37, %v3388_v31  ;;  %v3392_v61 = vrot.slane %v7086_v8, 2 }
 0x206   : > { %v6313_v60 = vpop.f32.mrf.mxu1  ;;  %v6385_v22 = vpop.f32.mrf.mxu0 }
 0x208   : > { %v1825_v18 = vpop.f32.mrf.mxu1  ;;  %v2314_v5 = vpop.f32.mrf.mxu0 }
 0x209   : > { %v1863_v54 = vadd.f32 %v1825_v18, %v7997_v53  ;;  %v8270_v35 = vadd.f32 %v2314_v5, %v1861_v47  ;;  %v3390_v53 = vrot.slane %v7084_v6, 2  ;;  %v7087_v47 = vld [vmem:[%s7194_s23 + $0x5c] sm:$0xff]  }
 0x20a   : > { %v6314_v16 = vpop.f32.mrf.mxu1  ;;  %v6386_v2 = vpop.f32.mrf.mxu0  ;;  %v3782_v34 = vrot.slane %v7087_v47, 3 }
 0x20b   : > { %v3391_v36 = vsel %vm3370_vm4, %v3388_v31, %v3390_v53  ;;  %v3393_v18 = vsel %vm3370_vm4, %v3390_v53, %v3392_v61 }
 0x20c   : > { %v1830_v43 = vpop.f32.mrf.mxu1  ;;  %v2319_v45 = vpop.f32.mrf.mxu0  ;;  %6596 = vmatmul.mubr.bf16.gmra.mxu1 %v3389_v23  ;;  %6668 = vmatmul.mubr.bf16.gmra.mxu0 %v3779_v41  ;;  %v3783_v5 = vsel %vm1093_vm2, %v3780_v29, %v3782_v34 }
 0x20d   : > { %v1864_v33 = vadd.f32 %v1830_v43, %v8002_v46  ;;  %v8277_v59 = vadd.f32 %v2319_v45, %v1862_v25  ;;  %6599 = vmatprep.mubr.msk.bf16.mxu1 %vm7140_vm0, %v7139_v1  ;;  %6671 = vmatprep.mubr.msk.bf16.mxu0 %vm7140_vm0, %v7139_v1  ;;  %v3781_v46 = vsel %vm1093_vm2, %v3778_v32, %v3780_v29 }
 0x20e   : > { %v6317_v19 = vpop.f32.mrf.mxu1  ;;  %v6389_v37 = vpop.f32.mrf.mxu0 }
 0x210   : > { %v1833_v12 = vpop.f32.mrf.mxu1  ;;  %v2322_v42 = vpop.f32.mrf.mxu0 }
 0x211   : > { %v8283_v39 = vadd.f32 %v2322_v42, %v1863_v54  ;;  %v7090_v54 = vld [vmem:[%s7194_s23 + $0x1e4] sm:$0xff]   ;;  %v7092_v42 = vld [vmem:[%s7194_s23 + $0x1ec] sm:$0xff]  }
 0x212   : > { %v6318_v7 = vpop.f32.mrf.mxu1  ;;  %v6390_v51 = vpop.f32.mrf.mxu0 }
 0x214   : > { %v2327_v40 = vpop.f32.mrf.mxu0  ;;  %v2607_v44 = vpop.f32.mrf.mxu1  ;;  %6600 = vmatmul.mubr.bf16.gmra.mxu1 %v3391_v36  ;;  %6672 = vmatmul.mubr.bf16.gmra.mxu0 %v3781_v46  ;;  %v7093_v36 = vld [vmem:[%s7194_s23 + $0x6c] sm:$0xff]  }
 0x215   : > { %v8289_v9 = vadd.f32 %v2327_v40, %v1864_v33  ;;  %v2725_v4 = vadd.f32 %v2607_v44, %v8015_v52  ;;  %6603 = vmatprep.mubr.msk.bf16.mxu1 %vm7140_vm0, %v7139_v1  ;;  %6675 = vmatprep.mubr.msk.bf16.mxu0 %vm7140_vm0, %v7139_v1  ;;  %v7091_v52 = vld [vmem:[%s7194_s23 + $0x64] sm:$0xff]   ;;  %v3786_v44 = vrot.slane %v7093_v36, 3 }
 0x216   : > { %v6393_v25 = vpop.f32.mrf.mxu0  ;;  %v6413_v31 = vpop.f32.mrf.mxu1  ;;  %v3784_v43 = vrot.slane %v7091_v52, 3 }
 0x218   : > { %v2330_v32 = vpop.f32.mrf.mxu0  ;;  %v2610_v60 = vpop.f32.mrf.mxu1  ;;  %v3785_v12 = vsel %vm1093_vm2, %v3782_v34, %v3784_v43 }
 0x219   : > { %v2726_v22 = vadd.f32 %v2610_v60, %v8025_v50  ;;  %v3394_v50 = vrot.slane %v7090_v54, 2  ;;  %v3787_v60 = vsel %vm1093_vm2, %v3784_v43, %v3786_v44 }
 0x21a   : > { %v6394_v23 = vpop.f32.mrf.mxu0  ;;  %v6414_v41 = vpop.f32.mrf.mxu1 }
 0x21c   : > { %v2615_v6 = vpop.f32.mrf.mxu1  ;;  %v3104_v14 = vpop.f32.mrf.mxu0  ;;  %6604 = vmatmul.mubr.bf16.gmra.mxu1 %v3393_v18  ;;  %6676 = vmatmul.mubr.bf16.gmra.mxu0 %v3783_v5  ;;  %v7097_v18 = vld [vmem:[%s7194_s23 + $0x74] sm:$0xff]  }
 0x21d   : > { %v2727_v16 = vadd.f32 %v2615_v6, %v8029_v57  ;;  %v8302_v2 = vadd.f32 %v3104_v14, %v2725_v4  ;;  %6607 = vmatprep.mubr.msk.bf16.mxu1 %vm7140_vm0, %v7139_v1  ;;  %6679 = vmatprep.mubr.msk.bf16.mxu0 %vm7140_vm0, %v7139_v1  ;;  %v3395_v57 = vsel %vm3370_vm4, %v3392_v61, %v3394_v50  ;;  %v3788_v14 = vrot.slane %v7097_v18, 3  ;;  %v7103_v18 = vld [vmem:[%s7194_s23 + $0x9c] sm:$0xff]  }
 0x21e   : > { %v6417_v45 = vpop.f32.mrf.mxu1  ;;  %v6489_v33 = vpop.f32.mrf.mxu0 }
 0x21f   : > { %v8337_v33 = vld [vmem:[%s7194_s23 + $0x7c] ss:$0 sps:$4 sm:$0xff]  }
 0x220   : > { %v2618_v53 = vpop.f32.mrf.mxu1  ;;  %v3107_v29 = vpop.f32.mrf.mxu0 }
 0x221   : > { %v2728_v19 = vadd.f32 %v2618_v53, %v8037_v63  ;;  %v8309_v37 = vadd.f32 %v3107_v29, %v2726_v22  ;;  %v3396_v63 = vrot.slane %v7092_v42, 2  ;;  %v7096_v22 = vld [vmem:[%s7194_s23 + $0x1f4] ss:$0 sps:$4 sm:$0x77]   ;;  %v7101_v53 = vld [vmem:[%s7194_s23 + $0x8c] sm:$0xfc]  }
 0x222   : > { %v6418_v46 = vpop.f32.mrf.mxu1  ;;  %v6490_v8 = vpop.f32.mrf.mxu0  ;;  %v3398_v6 = vrot.slane %v7096_v22, 2 }
 0x224   : > { %v2623_v47 = vpop.f32.mrf.mxu1  ;;  %v3112_v7 = vpop.f32.mrf.mxu0  ;;  %6608 = vmatmul.mubr.bf16.gmra.mxu1 %v3395_v57  ;;  %6680 = vmatmul.mubr.bf16.gmra.mxu0 %v3785_v12  ;;  %v3789_v57 = vsel %vm1093_vm2, %v3786_v44, %v3788_v14  ;;  %v7102_v12 = vld [vmem:[%s7194_s23 + $0x94] sm:$0xff]  }
 0x225   : > { %v2729_v51 = vadd.f32 %v2623_v47, %v8043_v24  ;;  %v8316_v40 = vadd.f32 %v3112_v7, %v2727_v16  ;;  %6611 = vmatprep.mubr.msk.bf16.mxu1 %vm7140_vm0, %v7139_v1  ;;  %6683 = vmatprep.mubr.msk.bf16.mxu0 %vm7140_vm0, %v7139_v1  ;;  %v3397_v24 = vsel %vm3370_vm4, %v3394_v50, %v3396_v63  ;;  %v3790_v47 = vrot.slane %v8337_v33, 3 }
 0x226   : > { %v6421_v4 = vpop.f32.mrf.mxu1  ;;  %v6493_v61 = vpop.f32.mrf.mxu0  ;;  %v4156_v7 = vshrl.u32 %v7101_v53, 16  ;;  %v4167_v44 = vshll.u32 %v7102_v12, 16  ;;  %v4176_v33 = vshll.u32 %v7103_v18, 16 }
 0x228   : > { %v2626_v34 = vpop.f32.mrf.mxu1  ;;  %v3115_v25 = vpop.f32.mrf.mxu0 }
 0x229   : > { %v2730_v31 = vadd.f32 %v2626_v34, %v8052_v62  ;;  %v8323_v32 = vadd.f32 %v3115_v25, %v2728_v19  ;;  %v3399_v19 = vsel %vm3370_vm4, %v3396_v63, %v3398_v6  ;;  %v4164_v63 = vshrl.u32 %v7102_v12, 16 }
 0x22a   : > { %v6422_v5 = vpop.f32.mrf.mxu1  ;;  %v6494_v54 = vpop.f32.mrf.mxu0 }
 0x22b   : > { %v4166_v54 = vrot.slane %v4164_v63, 2 }
 0x22c   : > { %v2631_v52 = vpop.f32.mrf.mxu1  ;;  %v3120_v23 = vpop.f32.mrf.mxu0  ;;  %6612 = vmatmul.mubr.bf16.gmra.mxu1 %v3397_v24  ;;  %6684 = vmatmul.mubr.bf16.gmra.mxu0 %v3787_v60  ;;  %v3791_v24 = vsel %vm1093_vm2, %v3788_v14, %v3790_v47  ;;  %v4158_v60 = vrot.slane %v4156_v7, 2  ;;  %v7104_v7 = vld [vmem:[%s7194_s23 + $0x10c] sm:$0xfc]  }
 0x22d   : > { %v2731_v41 = vadd.f32 %v2631_v52, %v8055_v56  ;;  %v8330_v62 = vadd.f32 %v3120_v23, %v2729_v51  ;;  %6615 = vmatprep.mubr.msk.bf16.mxu1 %vm7140_vm0, %v7139_v1  ;;  %6687 = vmatprep.mubr.msk.bf16.mxu0 %vm7140_vm0, %v7139_v1  ;;  %v4159_v51 = vshll.u32 %v7101_v53, 16  ;;  %v4169_v52 = vrot.slane %v4167_v44, 3 }
 0x22e   : > { %v6425_v16 = vpop.f32.mrf.mxu1  ;;  %v6497_v50 = vpop.f32.mrf.mxu0 }
 0x22f   : > { %v4161_v22 = vrot.slane %v4159_v51, 3  ;;  %v7105_v51 = vld [vmem:[%s7194_s23 + $0x114] sm:$0xff]  }
 0x230   : > { %v2634_v43 = vpop.f32.mrf.mxu1  ;;  %v3123_v45 = vpop.f32.mrf.mxu0 }
 0x231   : > { %v2732_v56 = vadd.f32 %v2634_v43, %v8062_v30  ;;  %v8341_v29 = vadd.f32 %v3123_v45, %v2730_v31  ;;  %v4162_v43 = vor.u32 %v4161_v22, %v4158_v60  ;;  %v4173_v45 = vshrl.u32 %v7103_v18, 16 }
 0x232   : > { %v6426_v42 = vpop.f32.mrf.mxu1  ;;  %v6498_v36 = vpop.f32.mrf.mxu0  ;;  %v4653_v22 = vrot.slane %v7105_v51, 2 }
 0x233   : > { %v4175_v12 = vrot.slane %v4173_v45, 2  ;;  %v4178_v42 = vrot.slane %v4176_v33, 3  ;;  %v7106_v36 = vld [vmem:[%s7194_s23 + $0xa4] sm:$0xff]   ;;  %v7108_v45 = vld [vmem:[%s7194_s23 + $0xac] sm:$0xff]  }
 0x234   : > { %v2639_v46 = vpop.f32.mrf.mxu1  ;;  %v3128_v8 = vpop.f32.mrf.mxu0  ;;  %6616 = vmatmul.mubr.bf16.gmra.mxu1 %v3399_v19  ;;  %6688 = vmatmul.mubr.bf16.gmra.mxu0 %v3789_v57 }
 0x235   : > { %v2733_v30 = vadd.f32 %v2639_v46, %v8068_v15  ;;  %v8348_v4 = vadd.f32 %v3128_v8, %v2731_v41  ;;  %6619 = vmatprep.mubr.msk.bf16.mxu1 %vm7140_vm0, %v7139_v1  ;;  %6691 = vmatprep.mubr.msk.bf16.mxu0 %vm7140_vm0, %v7139_v1 }
 0x236   : > { %v6429_v61 = vpop.f32.mrf.mxu1  ;;  %v6501_v34 = vpop.f32.mrf.mxu0 }
 0x237   : > { %v4179_v34 = vor.u32 %v4178_v42, %v4175_v12 }
 0x238   : > { %v2642_v25 = vpop.f32.mrf.mxu1  ;;  %v3131_v31 = vpop.f32.mrf.mxu0 }
 0x239   : > { %v2734_v15 = vadd.f32 %v2642_v25, %v8078_v11  ;;  %v8357_v5 = vadd.f32 %v3131_v31, %v2732_v56  ;;  %v4170_v11 = vor.u32 %v4169_v52, %v4166_v54  ;;  %v4182_v25 = vshrl.u32 %v7106_v36, 16 }
 0x23a   : > { %v6430_v23 = vpop.f32.mrf.mxu1  ;;  %v6502_v41 = vpop.f32.mrf.mxu0  ;;  %v4185_v31 = vshll.u32 %v7106_v36, 16 }
 0x23b   : > { %v4171_v8 = vsel %vm1486_vm3, %v4162_v43, %v4170_v11  ;;  %v4184_v52 = vrot.slane %v4182_v25, 2  ;;  %v7107_v41 = vld [vmem:[%s7194_s23 + $0x11c] sm:$0xff]  }
 0x23c   : > { %v2647_v16 = vpop.f32.mrf.mxu1  ;;  %v3136_v50 = vpop.f32.mrf.mxu0  ;;  %6620 = vmatmul.mubr.bf16.gmra.mxu1 %v3398_v6  ;;  %6692 = vmatmul.mubr.bf16.gmra.mxu0 %v3791_v24  ;;  %v4187_v23 = vrot.slane %v4185_v31, 3  ;;  %v7109_v31 = vld [vmem:[%s7194_s23 + $0x124] sm:$0xff]  }
 0x23d   : > { %v2735_v14 = vadd.f32 %v2647_v16, %v8088_v0  ;;  %v8360_v53 = vadd.f32 %v3136_v50, %v2733_v30  ;;  %6695 = vmatprep.mubr.msk.bf16.mxu0 %vm7140_vm0, %v7139_v1  ;;  %6715 = vmatprep.mubr.msk.bf16.mxu1 %vm7140_vm0, %v7139_v1  ;;  %v4180_v50 = vsel %vm1486_vm3, %v4170_v11, %v4179_v34  ;;  %v4194_v11 = vshll.u32 %v7108_v45, 16 }
 0x23e   : > { %v6433_v56 = vpop.f32.mrf.mxu1  ;;  %v6505_v6 = vpop.f32.mrf.mxu0 }
 0x23f   : > { %v4196_v25 = vrot.slane %v4194_v11, 3 }
 0x240   : > { %v2650_v19 = vpop.f32.mrf.mxu1  ;;  %v3139_v57 = vpop.f32.mrf.mxu0 }
 0x241   : > { %v2736_v46 = vadd.f32 %v2650_v19, %v8099_v20  ;;  %v8368_v0 = vadd.f32 %v3139_v57, %v2734_v15  ;;  %v4652_v20 = vrot.slane %v7104_v7, 2  ;;  %v4188_v19 = vor.u32 %v4187_v23, %v4184_v52 }
 0x242   : > { %v6434_v30 = vpop.f32.mrf.mxu1  ;;  %v6506_v63 = vpop.f32.mrf.mxu0  ;;  %v4655_v57 = vrot.slane %v7107_v41, 2  ;;  %v4657_v52 = vrot.slane %v7109_v31, 2 }
 0x243   : > { %v4654_v43 = vsel %vm3370_vm4, %v4652_v20, %v4653_v22  ;;  %v4189_v51 = vsel %vm1486_vm3, %v4179_v34, %v4188_v19 }
 0x244   : > { %v2655_v44 = vpop.f32.mrf.mxu1  ;;  %v3144_v61 = vpop.f32.mrf.mxu0  ;;  %6696 = vmatmul.mubr.bf16.gmra.mxu0 %v3790_v47  ;;  %6716 = vmatmul.mubr.bf16.vlgmr.msra.gmra.mxu1 %v4171_v8  ;;  %v4656_v30 = vsel %vm3370_vm4, %v4653_v22, %v4655_v57 }
 0x245   : > { %v2737_v24 = vadd.f32 %v2655_v44, %v8117_v55  ;;  %v8374_v60 = vadd.f32 %v3144_v61, %v2735_v14  ;;  %6719 = vmatprep.mubr.msk.bf16.mxu1 %vm7140_vm0, %v7139_v1  ;;  %6791 = vmatprep.mubr.msk.bf16.mxu0 %vm7140_vm0, %v7139_v1 }
 0x246   : > { %v6437_v18 = vpop.f32.mrf.mxu1  ;;  %v6509_v47 = vpop.f32.mrf.mxu0 }
 0x248   : > { %v2658_v15 = vpop.f32.mrf.mxu1  ;;  %v3147_v54 = vpop.f32.mrf.mxu0 }
 0x249   : > { %v2738_v55 = vadd.f32 %v2658_v15, %v8134_v28  ;;  %v8382_v16 = vadd.f32 %v3147_v54, %v2736_v46  ;;  %v4191_v28 = vshrl.u32 %v7108_v45, 16 }
 0x24a   : > { %v6438_v33 = vpop.f32.mrf.mxu1  ;;  %v6510_v14 = vpop.f32.mrf.mxu0 }
 0x24b   : > { %v4193_v61 = vrot.slane %v4191_v28, 2  ;;  %v7111_v33 = vld [vmem:[%s7194_s23 + $0x12c] sm:$0xff]  }
 0x24c   : > { %v2663_v56 = vpop.f32.mrf.mxu1  ;;  %v3152_v6 = vpop.f32.mrf.mxu0  ;;  %6720 = vmatmul.mubr.bf16.gmra.mxu1 %v4180_v50  ;;  %6792 = vmatmul.mubr.bf16.vlgmr.msra.gmra.mxu0 %v4654_v43 }
 0x24d   : > { %v2739_v12 = vadd.f32 %v2663_v56, %v8152_v17  ;;  %v8388_v42 = vadd.f32 %v3152_v6, %v2737_v24  ;;  %6723 = vmatprep.mubr.msk.bf16.mxu1 %vm7140_vm0, %v7139_v1  ;;  %6795 = vmatprep.mubr.msk.bf16.mxu0 %vm7140_vm0, %v7139_v1  ;;  %v7110_v17 = vld [vmem:[%s7194_s23 + $0xb4] sm:$0xff]   ;;  %v4658_v6 = vsel %vm3370_vm4, %v4655_v57, %v4657_v52 }
 0x24e   : > { %v6441_v36 = vpop.f32.mrf.mxu1  ;;  %v6513_v46 = vpop.f32.mrf.mxu0  ;;  %v4200_v15 = vshrl.u32 %v7110_v17, 16  ;;  %v4203_v54 = vshll.u32 %v7110_v17, 16 }
 0x250   : > { %v2666_v8 = vpop.f32.mrf.mxu1  ;;  %v3155_v7 = vpop.f32.mrf.mxu0  ;;  %v4202_v43 = vrot.slane %v4200_v15, 2  ;;  %v4205_v45 = vrot.slane %v4203_v54, 3  ;;  %v7113_v15 = vld [vmem:[%s7194_s23 + $0x134] sm:$0xff]  }
 0x251   : > { %v2740_v63 = vadd.f32 %v2666_v8, %v8170_v26  ;;  %v8398_v44 = vadd.f32 %v3155_v7, %v2738_v55  ;;  %v4197_v26 = vor.u32 %v4196_v25, %v4193_v61  ;;  %v4659_v7 = vrot.slane %v7111_v33, 2 }
 0x252   : > { %v6442_v24 = vpop.f32.mrf.mxu1  ;;  %v6514_v20 = vpop.f32.mrf.mxu0  ;;  %v4206_v8 = vor.u32 %v4205_v45, %v4202_v43  ;;  %v4661_v43 = vrot.slane %v7113_v15, 2 }
 0x253   : > { %v4198_v56 = vsel %vm1486_vm3, %v4188_v19, %v4197_v26  ;;  %v4660_v31 = vsel %vm3370_vm4, %v4657_v52, %v4659_v7 }
 0x254   : > { %v2671_v18 = vpop.f32.mrf.mxu1  ;;  %v3160_v47 = vpop.f32.mrf.mxu0  ;;  %6724 = vmatmul.mubr.bf16.gmra.mxu1 %v4189_v51  ;;  %6796 = vmatmul.mubr.bf16.gmra.mxu0 %v4656_v30  ;;  %v4207_v25 = vsel %vm1486_vm3, %v4197_v26, %v4206_v8 }
 0x255   : > { %v2741_v34 = vadd.f32 %v2671_v18, %v8188_v48  ;;  %v8402_v22 = vadd.f32 %v3160_v47, %v2739_v12  ;;  %6727 = vmatprep.mubr.msk.bf16.mxu1 %vm7140_vm0, %v7139_v1  ;;  %6799 = vmatprep.mubr.msk.bf16.mxu0 %vm7140_vm0, %v7139_v1  ;;  %v7112_v12 = vld [vmem:[%s7194_s23 + $0xbc] sm:$0xff]  }
 0x256   : > { %v6445_v23 = vpop.f32.mrf.mxu1  ;;  %v6517_v41 = vpop.f32.mrf.mxu0  ;;  %v4212_v19 = vshll.u32 %v7112_v12, 16 }
 0x258   : > { %v2674_v55 = vpop.f32.mrf.mxu1  ;;  %v3163_v50 = vpop.f32.mrf.mxu0  ;;  %v4214_v47 = vrot.slane %v4212_v19, 3 }
 0x259   : > { %v2742_v48 = vadd.f32 %v2674_v55, %v8206_v58  ;;  %v8410_v14 = vadd.f32 %v3163_v50, %v2740_v63  ;;  %v4209_v58 = vshrl.u32 %v7112_v12, 16 }
 0x25a   : > { %v6446_v28 = vpop.f32.mrf.mxu1  ;;  %v6518_v11 = vpop.f32.mrf.mxu0 }
 0x25b   : > { %v4211_v18 = vrot.slane %v4209_v58, 2  ;;  %v7115_v28 = vld [vmem:[%s7194_s23 + $0x13c] sm:$0xff]  }
 0x25c   : > { %v2679_v36 = vpop.f32.mrf.mxu1  ;;  %v3168_v46 = vpop.f32.mrf.mxu0  ;;  %6728 = vmatmul.mubr.bf16.gmra.mxu1 %v4198_v56  ;;  %6800 = vmatmul.mubr.bf16.gmra.mxu0 %v4658_v6 }
 0x25d   : > { %v2743_v51 = vadd.f32 %v2679_v36, %v8217_v38  ;;  %v8416_v30 = vadd.f32 %v3168_v46, %v2741_v34  ;;  %6731 = vmatprep.mubr.msk.bf16.mxu1 %vm7140_vm0, %v7139_v1  ;;  %6803 = vmatprep.mubr.msk.bf16.mxu0 %vm7140_vm0, %v7139_v1  ;;  %v7114_v38 = vld [vmem:[%s7194_s23 + $0xc4] sm:$0xff]   ;;  %v4662_v46 = vsel %vm3370_vm4, %v4659_v7, %v4661_v43 }
 0x25e   : > { %v6449_v57 = vpop.f32.mrf.mxu1  ;;  %v6521_v17 = vpop.f32.mrf.mxu0  ;;  %v4218_v55 = vshrl.u32 %v7114_v38, 16  ;;  %v4221_v50 = vshll.u32 %v7114_v38, 16 }
 0x260   : > { %v2682_v63 = vpop.f32.mrf.mxu1  ;;  %v3171_v61 = vpop.f32.mrf.mxu0  ;;  %v4220_v6 = vrot.slane %v4218_v55, 2  ;;  %v4223_v12 = vrot.slane %v4221_v50, 3  ;;  %v7117_v55 = vld [vmem:[%s7194_s23 + $0x144] sm:$0xff]  }
 0x261   : > { %v2744_v24 = vadd.f32 %v2682_v63, %v8228_v10  ;;  %v8426_v20 = vadd.f32 %v3171_v61, %v2742_v48  ;;  %v4215_v10 = vor.u32 %v4214_v47, %v4211_v18  ;;  %v4663_v61 = vrot.slane %v7115_v28, 2 }
 0x262   : > { %v6450_v54 = vpop.f32.mrf.mxu1  ;;  %v6522_v34 = vpop.f32.mrf.mxu0  ;;  %v4224_v63 = vor.u32 %v4223_v12, %v4220_v6  ;;  %v4665_v6 = vrot.slane %v7117_v55, 2 }
 0x263   : > { %v4216_v36 = vsel %vm1486_vm3, %v4206_v8, %v4215_v10  ;;  %v4664_v15 = vsel %vm3370_vm4, %v4661_v43, %v4663_v61 }
 0x264   : > { %v2687_v23 = vpop.f32.mrf.mxu1  ;;  %v3176_v41 = vpop.f32.mrf.mxu0  ;;  %6732 = vmatmul.mubr.bf16.gmra.mxu1 %v4207_v25  ;;  %6804 = vmatmul.mubr.bf16.gmra.mxu0 %v4660_v31  ;;  %v4225_v47 = vsel %vm1486_vm3, %v4215_v10, %v4224_v63 }
 0x265   : > { %v2745_v26 = vadd.f32 %v2687_v23, %v8235_v21  ;;  %v8430_v52 = vadd.f32 %v3176_v41, %v2743_v51  ;;  %6735 = vmatprep.mubr.msk.bf16.mxu1 %vm7140_vm0, %v7139_v1  ;;  %6807 = vmatprep.mubr.msk.bf16.mxu0 %vm7140_vm0, %v7139_v1  ;;  %v7116_v51 = vld [vmem:[%s7194_s23 + $0xcc] sm:$0xff]  }
 0x266   : > { %v6453_v45 = vpop.f32.mrf.mxu1  ;;  %v6525_v33 = vpop.f32.mrf.mxu0  ;;  %v4230_v8 = vshll.u32 %v7116_v51, 16 }
 0x268   : > { %v2690_v48 = vpop.f32.mrf.mxu1  ;;  %v3179_v56 = vpop.f32.mrf.mxu0  ;;  %v4232_v41 = vrot.slane %v4230_v8, 3 }
 0x269   : > { %v2746_v21 = vadd.f32 %v2690_v48, %v8242_v3  ;;  %v8438_v11 = vadd.f32 %v3179_v56, %v2744_v24  ;;  %v4227_v3 = vshrl.u32 %v7116_v51, 16 }
 0x26a   : > { %v6454_v58 = vpop.f32.mrf.mxu1  ;;  %v6526_v19 = vpop.f32.mrf.mxu0 }
 0x26b   : > { %v4229_v23 = vrot.slane %v4227_v3, 2  ;;  %v7119_v58 = vld [vmem:[%s7194_s23 + $0x14c] sm:$0xff]  }
 0x26c   : > { %v2695_v57 = vpop.f32.mrf.mxu1  ;;  %v3184_v17 = vpop.f32.mrf.mxu0  ;;  %6736 = vmatmul.mubr.bf16.gmra.mxu1 %v4216_v36  ;;  %6808 = vmatmul.mubr.bf16.gmra.mxu0 %v4662_v46 }
 0x26d   : > { %v2747_v25 = vadd.f32 %v2695_v57, %v8249_v27  ;;  %v8444_v31 = vadd.f32 %v3184_v17, %v2745_v26  ;;  %6739 = vmatprep.mubr.msk.bf16.mxu1 %vm7140_vm0, %v7139_v1  ;;  %6811 = vmatprep.mubr.msk.bf16.mxu0 %vm7140_vm0, %v7139_v1  ;;  %v7118_v27 = vld [vmem:[%s7194_s23 + $0xd4] sm:$0xff]   ;;  %v4666_v17 = vsel %vm3370_vm4, %v4663_v61, %v4665_v6 }
 0x26e   : > { %v6457_v7 = vpop.f32.mrf.mxu1  ;;  %v6529_v38 = vpop.f32.mrf.mxu0  ;;  %v4236_v48 = vshrl.u32 %v7118_v27, 16  ;;  %v4239_v56 = vshll.u32 %v7118_v27, 16 }
 0x270   : > { %v2698_v24 = vpop.f32.mrf.mxu1  ;;  %v3187_v18 = vpop.f32.mrf.mxu0  ;;  %v4238_v46 = vrot.slane %v4236_v48, 2  ;;  %v4241_v51 = vrot.slane %v4239_v56, 3  ;;  %v7121_v48 = vld [vmem:[%s7194_s23 + $0x154] sm:$0xff]  }
 0x271   : > { %v2748_v54 = vadd.f32 %v2698_v24, %v8256_v13  ;;  %v8454_v34 = vadd.f32 %v3187_v18, %v2746_v21  ;;  %v4233_v13 = vor.u32 %v4232_v41, %v4229_v23  ;;  %v4667_v18 = vrot.slane %v7119_v58, 2 }
 0x272   : > { %v6458_v50 = vpop.f32.mrf.mxu1  ;;  %v6530_v26 = vpop.f32.mrf.mxu0  ;;  %v4242_v24 = vor.u32 %v4241_v51, %v4238_v46  ;;  %v4669_v46 = vrot.slane %v7121_v48, 2  ;;  %v7126_v48 = vld [vmem:[%s7194_s23 + $0xf4] sm:$0xff]  }
 0x273   : > { %v4234_v57 = vsel %vm1486_vm3, %v4224_v63, %v4233_v13  ;;  %v4668_v55 = vsel %vm3370_vm4, %v4665_v6, %v4667_v18 }
 0x274   : > { %v2703_v45 = vpop.f32.mrf.mxu1  ;;  %v3192_v33 = vpop.f32.mrf.mxu0  ;;  %6740 = vmatmul.mubr.bf16.gmra.mxu1 %v4225_v47  ;;  %6812 = vmatmul.mubr.bf16.gmra.mxu0 %v4664_v15  ;;  %v4243_v41 = vsel %vm1486_vm3, %v4233_v13, %v4242_v24 }
 0x275   : > { %v2749_v10 = vadd.f32 %v2703_v45, %v8263_v49  ;;  %v8458_v43 = vadd.f32 %v3192_v33, %v2747_v25  ;;  %6743 = vmatprep.mubr.msk.bf16.mxu1 %vm7140_vm0, %v7139_v1  ;;  %6815 = vmatprep.mubr.msk.bf16.mxu0 %vm7140_vm0, %v7139_v1  ;;  %v7120_v25 = vld [vmem:[%s7194_s23 + $0xdc] sm:$0xff]  }
 0x276   : > { %v6461_v12 = vpop.f32.mrf.mxu1  ;;  %v6533_v28 = vpop.f32.mrf.mxu0  ;;  %v4248_v63 = vshll.u32 %v7120_v25, 16 }
 0x278   : > { %v2706_v21 = vpop.f32.mrf.mxu1  ;;  %v3195_v36 = vpop.f32.mrf.mxu0  ;;  %v4250_v33 = vrot.slane %v4248_v63, 3 }
 0x279   : > { %v2750_v49 = vadd.f32 %v2706_v21, %v8270_v35  ;;  %v8466_v19 = vadd.f32 %v3195_v36, %v2748_v54  ;;  %v4245_v35 = vshrl.u32 %v7120_v25, 16 }
 0x27a   : > { %v6462_v3 = vpop.f32.mrf.mxu1  ;;  %v6534_v8 = vpop.f32.mrf.mxu0 }
 0x27b   : > { %v4247_v45 = vrot.slane %v4245_v35, 2  ;;  %v7123_v3 = vld [vmem:[%s7194_s23 + $0x15c] sm:$0xff]  }
 0x27c   : > { %v2711_v7 = vpop.f32.mrf.mxu1  ;;  %v3200_v38 = vpop.f32.mrf.mxu0  ;;  %6744 = vmatmul.mubr.bf16.gmra.mxu1 %v4234_v57  ;;  %6816 = vmatmul.mubr.bf16.gmra.mxu0 %v4666_v17 }
 0x27d   : > { %v2751_v47 = vadd.f32 %v2711_v7, %v8277_v59  ;;  %v8472_v15 = vadd.f32 %v3200_v38, %v2749_v10  ;;  %6747 = vmatprep.mubr.msk.bf16.mxu1 %vm7140_vm0, %v7139_v1  ;;  %6819 = vmatprep.mubr.msk.bf16.mxu0 %vm7140_vm0, %v7139_v1  ;;  %v7122_v59 = vld [vmem:[%s7194_s23 + $0xe4] sm:$0xff]   ;;  %v4670_v7 = vsel %vm3370_vm4, %v4667_v18, %v4669_v46  ;;  %v7124_v38 = vld [vmem:[%s7194_s23 + $0xec] sm:$0xff]  }
 0x27e   : > { %v6465_v61 = vpop.f32.mrf.mxu1  ;;  %v6537_v27 = vpop.f32.mrf.mxu0  ;;  %v4254_v21 = vshrl.u32 %v7122_v59, 16  ;;  %v4257_v36 = vshll.u32 %v7122_v59, 16  ;;  %v4266_v18 = vshll.u32 %v7124_v38, 16 }
 0x280   : > { %v2714_v54 = vpop.f32.mrf.mxu1  ;;  %v3203_v23 = vpop.f32.mrf.mxu0  ;;  %v4256_v17 = vrot.slane %v4254_v21, 2  ;;  %v4259_v25 = vrot.slane %v4257_v36, 3 }
 0x281   : > { %v2752_v50 = vadd.f32 %v2714_v54, %v8283_v39  ;;  %v8482_v26 = vadd.f32 %v3203_v23, %v2750_v49  ;;  %v4251_v39 = vor.u32 %v4250_v33, %v4247_v45  ;;  %v4671_v54 = vrot.slane %v7123_v3, 2 }
 0x282   : > { %v6466_v56 = vpop.f32.mrf.mxu1  ;;  %v6538_v10 = vpop.f32.mrf.mxu0  ;;  %v4260_v27 = vor.u32 %v4259_v25, %v4256_v17 }
 0x283   : > { %v4672_v10 = vsel %vm3370_vm4, %v4669_v46, %v4671_v54 }
 0x284   : > { %v2719_v12 = vpop.f32.mrf.mxu1  ;;  %v3208_v28 = vpop.f32.mrf.mxu0  ;;  %6748 = vmatmul.mubr.bf16.gmra.mxu1 %v4243_v41  ;;  %6820 = vmatmul.mubr.bf16.gmra.mxu0 %v4668_v55  ;;  %v4261_v33 = vsel %vm1486_vm3, %v4251_v39, %v4260_v27 }
 0x285   : > { %v2753_v13 = vadd.f32 %v2719_v12, %v8289_v9  ;;  %v8486_v6 = vadd.f32 %v3208_v28, %v2751_v47  ;;  %6751 = vmatprep.mubr.msk.bf16.mxu1 %vm7140_vm0, %v7139_v1  ;;  %6823 = vmatprep.mubr.msk.bf16.mxu0 %vm7140_vm0, %v7139_v1  ;;  %v4252_v9 = vsel %vm1486_vm3, %v4242_v24, %v4251_v39  ;;  %v4263_v24 = vshrl.u32 %v7124_v38, 16  ;;  %v7125_v28 = vld [vmem:[%s7194_s23 + $0x164] sm:$0xff]  }
 0x286   : > { %v6469_v51 = vpop.f32.mrf.mxu1  ;;  %v6541_v58 = vpop.f32.mrf.mxu0  ;;  %v4268_v12 = vrot.slane %v4266_v18, 3  ;;  %v4673_v46 = vrot.slane %v7125_v28, 2 }
 0x287   : > { %v4272_v58 = vshrl.u32 %v7126_v48, 16 }
 0x288   : > { %v2722_v49 = vpop.f32.mrf.mxu1  ;;  %v3211_v57 = vpop.f32.mrf.mxu0 }
 0x289   : > { %v8493_v8 = vadd.f32 %v3211_v57, %v2752_v50  ;;  %v4275_v49 = vshll.u32 %v7126_v48, 16 }
 0x28a   : > { %v6470_v47 = vpop.f32.mrf.mxu1  ;;  %v6542_v35 = vpop.f32.mrf.mxu0 }
 0x28b   : > { %v4277_v38 = vrot.slane %v4275_v49, 3  ;;  %v7127_v47 = vld [vmem:[%s7194_s23 + $0x16c] sm:$0xff]  }
 0x28c   : > { %v3216_v63 = vpop.f32.mrf.mxu0  ;;  %v3497_v61 = vpop.f32.mrf.mxu1  ;;  %6752 = vmatmul.mubr.bf16.gmra.mxu1 %v4252_v9  ;;  %6824 = vmatmul.mubr.bf16.gmra.mxu0 %v4670_v7  ;;  %v4274_v7 = vrot.slane %v4272_v58, 2 }
 0x28d   : > { %v8498_v23 = vadd.f32 %v3216_v63, %v2753_v13  ;;  %v3615_v41 = vadd.f32 %v3497_v61, %v8302_v2  ;;  %6755 = vmatprep.mubr.msk.bf16.mxu1 %vm7140_vm0, %v7139_v1  ;;  %6827 = vmatprep.mubr.msk.bf16.mxu0 %vm7140_vm0, %v7139_v1  ;;  %v4265_v2 = vrot.slane %v4263_v24, 2  ;;  %v4674_v61 = vsel %vm3370_vm4, %v4671_v54, %v4673_v46 }
 0x28e   : > { %v6545_v55 = vpop.f32.mrf.mxu0  ;;  %v6565_v59 = vpop.f32.mrf.mxu1 }
 0x290   : > { %v3219_v50 = vpop.f32.mrf.mxu0  ;;  %v3500_v45 = vpop.f32.mrf.mxu1 }
 0x291   : > { %v3616_v56 = vadd.f32 %v3500_v45, %v8309_v37  ;;  %v4269_v37 = vor.u32 %v4268_v12, %v4265_v2  ;;  %v4278_v50 = vor.u32 %v4277_v38, %v4274_v7  ;;  %v4675_v45 = vrot.slane %v7127_v47, 2 }
 0x292   : > { %v6546_v21 = vpop.f32.mrf.mxu0  ;;  %v6566_v36 = vpop.f32.mrf.mxu1 }
 0x293   : > { %v4270_v63 = vsel %vm1486_vm3, %v4260_v27, %v4269_v37  ;;  %v4279_v12 = vsel %vm1486_vm3, %v4269_v37, %v4278_v50  ;;  %v4676_v28 = vsel %vm3370_vm4, %v4673_v46, %v4675_v45 }
 0x294   : > { %v3505_v13 = vpop.f32.mrf.mxu1  ;;  %v3889_v51 = vpop.f32.mrf.mxu0  ;;  %6756 = vmatmul.mubr.bf16.gmra.mxu1 %v4261_v33  ;;  %6828 = vmatmul.mubr.bf16.gmra.mxu0 %v4672_v10 }
 0x295   : > { %v3617_v57 = vadd.f32 %v3505_v13, %v8316_v40  ;;  %v8511_v39 = vadd.f32 %v3889_v51, %v3615_v41  ;;  %6759 = vmatprep.mubr.msk.bf16.mxu1 %vm7140_vm0, %v7139_v1  ;;  %6831 = vmatprep.mubr.msk.bf16.mxu0 %vm7140_vm0, %v7139_v1  ;;  %v7128_v41 = vld [vmem:[%s7194_s23 + $0xfc] ss:$0 sps:$4 sm:$0x77]   ;;  %v7129_v51 = vld [vmem:[%s7194_s23 + $0x174] sm:$0xff]  }
 0x296   : > { %v6569_v17 = vpop.f32.mrf.mxu1  ;;  %v6641_v25 = vpop.f32.mrf.mxu0  ;;  %v4284_v27 = vshll.u32 %v7128_v41, 16  ;;  %v4677_v37 = vrot.slane %v7129_v51, 2 }
 0x298   : > { %v3508_v3 = vpop.f32.mrf.mxu1  ;;  %v3892_v9 = vpop.f32.mrf.mxu0  ;;  %v4286_v13 = vrot.slane %v4284_v27, 3 }
 0x299   : > { %v3618_v40 = vadd.f32 %v3508_v3, %v8323_v32  ;;  %v8519_v35 = vadd.f32 %v3892_v9, %v3616_v56  ;;  %v4281_v32 = vshrl.u32 %v7128_v41, 16 }
 0x29a   : > { %v6570_v24 = vpop.f32.mrf.mxu1  ;;  %v6642_v18 = vpop.f32.mrf.mxu0 }
 0x29b   : > { %v4283_v36 = vrot.slane %v4281_v32, 2 }
 0x29c   : > { %v3513_v55 = vpop.f32.mrf.mxu1  ;;  %v3897_v59 = vpop.f32.mrf.mxu0  ;;  %6760 = vmatmul.mubr.bf16.gmra.mxu1 %v4270_v63  ;;  %6832 = vmatmul.mubr.bf16.gmra.mxu0 %v4674_v61  ;;  %v4678_v63 = vsel %vm3370_vm4, %v4675_v45, %v4677_v37  ;;  %v7130_v61 = vld [vmem:[%s7194_s23 + $0x17c] ss:$0 sps:$4 sm:$0x77]  }
 0x29d   : > { %v3619_v33 = vadd.f32 %v3513_v55, %v8330_v62  ;;  %v8525_v48 = vadd.f32 %v3897_v59, %v3617_v57  ;;  %6763 = vmatprep.mubr.msk.bf16.mxu1 %vm7140_vm0, %v7139_v1  ;;  %6835 = vmatprep.mubr.msk.bf16.mxu0 %vm7140_vm0, %v7139_v1 }
 0x29e   : > { %v6573_v54 = vpop.f32.mrf.mxu1  ;;  %v6645_v56 = vpop.f32.mrf.mxu0 }
 0x2a0   : > { %v3516_v10 = vpop.f32.mrf.mxu1  ;;  %v3900_v2 = vpop.f32.mrf.mxu0 }
 0x2a1   : > { %v3620_v62 = vadd.f32 %v3516_v10, %v8341_v29  ;;  %v8534_v21 = vadd.f32 %v3900_v2, %v3618_v40  ;;  %v4287_v29 = vor.u32 %v4286_v13, %v4283_v36 }
 0x2a2   : > { %v6574_v58 = vpop.f32.mrf.mxu1  ;;  %v6646_v49 = vpop.f32.mrf.mxu0 }
 0x2a4   : > { %v3521_v57 = vpop.f32.mrf.mxu1  ;;  %v3905_v17 = vpop.f32.mrf.mxu0  ;;  %6764 = vmatmul.mubr.bf16.gmra.mxu1 %v4279_v12  ;;  %6836 = vmatmul.mubr.bf16.gmra.mxu0 %v4676_v28 }
 0x2a5   : > { %v3621_v25 = vadd.f32 %v3521_v57, %v8348_v4  ;;  %v8538_v3 = vadd.f32 %v3905_v17, %v3619_v33  ;;  %6767 = vmatprep.mubr.msk.bf16.mxu1 %vm7140_vm0, %v7139_v1  ;;  %6839 = vmatprep.mubr.msk.bf16.mxu0 %vm7140_vm0, %v7139_v1  ;;  %v4288_v4 = vsel %vm1486_vm3, %v4278_v50, %v4287_v29 }
 0x2a6   : > { %v6577_v46 = vpop.f32.mrf.mxu1  ;;  %v6649_v9 = vpop.f32.mrf.mxu0 }
 0x2a8   : > { %v3524_v7 = vpop.f32.mrf.mxu1  ;;  %v3908_v38 = vpop.f32.mrf.mxu0 }
 0x2a9   : > { %v3622_v47 = vadd.f32 %v3524_v7, %v8357_v5  ;;  %v8545_v40 = vadd.f32 %v3908_v38, %v3620_v62  ;;  %v4679_v5 = vrot.slane %v7130_v61, 2 }
 0x2aa   : > { %v6578_v41 = vpop.f32.mrf.mxu1  ;;  %v6650_v24 = vpop.f32.mrf.mxu0 }
 0x2ab   : > { %v4680_v10 = vsel %vm3370_vm4, %v4677_v37, %v4679_v5 }
 0x2ac   : > { %v3529_v18 = vpop.f32.mrf.mxu1  ;;  %v3913_v55 = vpop.f32.mrf.mxu0  ;;  %6768 = vmatmul.mubr.bf16.gmra.mxu1 %v4288_v4  ;;  %6840 = vmatmul.mubr.bf16.gmra.mxu0 %v4678_v63 }
 0x2ad   : > { %v3623_v59 = vadd.f32 %v3529_v18, %v8360_v53  ;;  %v8551_v33 = vadd.f32 %v3913_v55, %v3621_v25  ;;  %6771 = vmatprep.mubr.msk.bf16.mxu1 %vm7140_vm0, %v7139_v1  ;;  %6843 = vmatprep.mubr.msk.bf16.mxu0 %vm7140_vm0, %v7139_v1 }
 0x2ae   : > { %v6581_v50 = vpop.f32.mrf.mxu1  ;;  %v6653_v45 = vpop.f32.mrf.mxu0 }
 0x2b0   : > { %v3532_v32 = vpop.f32.mrf.mxu1  ;;  %v3916_v27 = vpop.f32.mrf.mxu0 }
 0x2b1   : > { %v3624_v54 = vadd.f32 %v3532_v32, %v8368_v0  ;;  %v8558_v56 = vadd.f32 %v3916_v27, %v3622_v47 }
 0x2b2   : > { %v6582_v53 = vpop.f32.mrf.mxu1  ;;  %v6654_v2 = vpop.f32.mrf.mxu0 }
 0x2b4   : > { %v3537_v12 = vpop.f32.mrf.mxu1  ;;  %v3921_v28 = vpop.f32.mrf.mxu0  ;;  %6772 = vmatmul.mubr.bf16.gmra.mxu1 %v4283_v36  ;;  %6844 = vmatmul.mubr.bf16.gmra.mxu0 %v4680_v10 }
 0x2b5   : > { %v3625_v62 = vadd.f32 %v3537_v12, %v8374_v60  ;;  %v8562_v13 = vadd.f32 %v3921_v28, %v3623_v59  ;;  %6847 = vmatprep.mubr.msk.bf16.mxu0 %vm7140_vm0, %v7139_v1 }
 0x2b6   : > { %v6585_v51 = vpop.f32.mrf.mxu1  ;;  %v6657_v58 = vpop.f32.mrf.mxu0 }
 0x2b8   : > { %v3540_v0 = vpop.f32.mrf.mxu1  ;;  %v3924_v49 = vpop.f32.mrf.mxu0 }
 0x2b9   : > { %v3626_v57 = vadd.f32 %v3540_v0, %v8382_v16  ;;  %v8567_v17 = vadd.f32 %v3924_v49, %v3624_v54 }
 0x2ba   : > { %v6586_v25 = vpop.f32.mrf.mxu1  ;;  %v6658_v29 = vpop.f32.mrf.mxu0 }
 0x2bc   : > { %v3545_v37 = vpop.f32.mrf.mxu1  ;;  %v3929_v36 = vpop.f32.mrf.mxu0  ;;  %6848 = vmatmul.mubr.bf16.gmra.mxu0 %v4679_v5 }
 0x2bd   : > { %v3627_v60 = vadd.f32 %v3545_v37, %v8388_v42  ;;  %v8570_v46 = vadd.f32 %v3929_v36, %v3625_v62 }
 0x2be   : > { %v6589_v9 = vpop.f32.mrf.mxu1  ;;  %v6661_v7 = vpop.f32.mrf.mxu0 }
 0x2c0   : > { %v3548_v1 = vpop.f32.mrf.mxu1  ;;  %v3932_v38 = vpop.f32.mrf.mxu0 }
 0x2c1   : > { %v3628_v47 = vadd.f32 %v3548_v1, %v8398_v44  ;;  %v8573_v4 = vadd.f32 %v3932_v38, %v3626_v57 }
 0x2c2   : > { %v6590_v16 = vpop.f32.mrf.mxu1  ;;  %v6662_v63 = vpop.f32.mrf.mxu0 }
 0x2c4   : > { %v3553_v61 = vpop.f32.mrf.mxu1  ;;  %v3937_v41 = vpop.f32.mrf.mxu0 }
 0x2c5   : > { %v3629_v24 = vadd.f32 %v3553_v61, %v8402_v22  ;;  %v8576_v18 = vadd.f32 %v3937_v41, %v3627_v60 }
 0x2c6   : > { %v6593_v55 = vpop.f32.mrf.mxu1  ;;  %v6665_v42 = vpop.f32.mrf.mxu0 }
 0x2c8   : > { %v3556_v59 = vpop.f32.mrf.mxu1  ;;  %v3940_v5 = vpop.f32.mrf.mxu0 }
 0x2c9   : > { %v3630_v50 = vadd.f32 %v3556_v59, %v8410_v14  ;;  %v8579_v45 = vadd.f32 %v3940_v5, %v3628_v47 }
 0x2ca   : > { %v6594_v32 = vpop.f32.mrf.mxu1  ;;  %v6666_v44 = vpop.f32.mrf.mxu0 }
 0x2cc   : > { %v3561_v27 = vpop.f32.mrf.mxu1  ;;  %v3945_v54 = vpop.f32.mrf.mxu0 }
 0x2cd   : > { %v3631_v10 = vadd.f32 %v3561_v27, %v8416_v30  ;;  %v8582_v53 = vadd.f32 %v3945_v54, %v3629_v24 }
 0x2ce   : > { %v6597_v2 = vpop.f32.mrf.mxu1  ;;  %v6669_v22 = vpop.f32.mrf.mxu0 }
 0x2d0   : > { %v3564_v12 = vpop.f32.mrf.mxu1  ;;  %v3948_v28 = vpop.f32.mrf.mxu0 }
 0x2d1   : > { %v3632_v62 = vadd.f32 %v3564_v12, %v8426_v20  ;;  %v8585_v51 = vadd.f32 %v3948_v28, %v3630_v50 }
 0x2d2   : > { %v6598_v58 = vpop.f32.mrf.mxu1  ;;  %v6670_v14 = vpop.f32.mrf.mxu0 }
 0x2d4   : > { %v3569_v0 = vpop.f32.mrf.mxu1  ;;  %v3953_v49 = vpop.f32.mrf.mxu0 }
 0x2d5   : > { %v3633_v57 = vadd.f32 %v3569_v0, %v8430_v52  ;;  %v8588_v25 = vadd.f32 %v3953_v49, %v3631_v10 }
 0x2d6   : > { %v6601_v29 = vpop.f32.mrf.mxu1  ;;  %v6673_v30 = vpop.f32.mrf.mxu0 }
 0x2d8   : > { %v3572_v37 = vpop.f32.mrf.mxu1  ;;  %v3956_v36 = vpop.f32.mrf.mxu0 }
 0x2d9   : > { %v3634_v60 = vadd.f32 %v3572_v37, %v8438_v11  ;;  %v8591_v9 = vadd.f32 %v3956_v36, %v3632_v62 }
 0x2da   : > { %v6602_v7 = vpop.f32.mrf.mxu1  ;;  %v6674_v20 = vpop.f32.mrf.mxu0 }
 0x2dc   : > { %v3577_v1 = vpop.f32.mrf.mxu1  ;;  %v3961_v38 = vpop.f32.mrf.mxu0 }
 0x2dd   : > { %v3635_v47 = vadd.f32 %v3577_v1, %v8444_v31  ;;  %v8594_v16 = vadd.f32 %v3961_v38, %v3633_v57 }
 0x2de   : > { %v6605_v63 = vpop.f32.mrf.mxu1  ;;  %v6677_v52 = vpop.f32.mrf.mxu0 }
 0x2e0   : > { %v3580_v61 = vpop.f32.mrf.mxu1  ;;  %v3964_v41 = vpop.f32.mrf.mxu0 }
 0x2e1   : > { %v3636_v24 = vadd.f32 %v3580_v61, %v8454_v34  ;;  %v8597_v55 = vadd.f32 %v3964_v41, %v3634_v60 }
 0x2e2   : > { %v6606_v42 = vpop.f32.mrf.mxu1  ;;  %v6678_v11 = vpop.f32.mrf.mxu0 }
 0x2e4   : > { %v3585_v59 = vpop.f32.mrf.mxu1  ;;  %v3969_v5 = vpop.f32.mrf.mxu0 }
 0x2e5   : > { %v3637_v50 = vadd.f32 %v3585_v59, %v8458_v43  ;;  %v8600_v32 = vadd.f32 %v3969_v5, %v3635_v47 }
 0x2e6   : > { %v6609_v44 = vpop.f32.mrf.mxu1  ;;  %v6681_v31 = vpop.f32.mrf.mxu0 }
 0x2e8   : > { %v3588_v27 = vpop.f32.mrf.mxu1  ;;  %v3972_v54 = vpop.f32.mrf.mxu0 }
 0x2e9   : > { %v3638_v10 = vadd.f32 %v3588_v27, %v8466_v19  ;;  %v8603_v2 = vadd.f32 %v3972_v54, %v3636_v24 }
 0x2ea   : > { %v6610_v22 = vpop.f32.mrf.mxu1  ;;  %v6682_v34 = vpop.f32.mrf.mxu0 }
 0x2ec   : > { %v3593_v12 = vpop.f32.mrf.mxu1  ;;  %v3977_v28 = vpop.f32.mrf.mxu0 }
 0x2ed   : > { %v3639_v62 = vadd.f32 %v3593_v12, %v8472_v15  ;;  %v8606_v58 = vadd.f32 %v3977_v28, %v3637_v50 }
 0x2ee   : > { %v6613_v14 = vpop.f32.mrf.mxu1  ;;  %v6685_v43 = vpop.f32.mrf.mxu0 }
 0x2f0   : > { %v3596_v0 = vpop.f32.mrf.mxu1  ;;  %v3980_v49 = vpop.f32.mrf.mxu0 }
 0x2f1   : > { %v3640_v57 = vadd.f32 %v3596_v0, %v8482_v26  ;;  %v8609_v29 = vadd.f32 %v3980_v49, %v3638_v10  ;;  %v8628_v49 = vld [vmem:[%s8714_s2] ss:$0 sm:$0xff] }
 0x2f2   : > { %v6614_v30 = vpop.f32.mrf.mxu1  ;;  %v6686_v19 = vpop.f32.mrf.mxu0 }
 0x2f4   : > { %v3601_v37 = vpop.f32.mrf.mxu1  ;;  %v3985_v36 = vpop.f32.mrf.mxu0 }
 0x2f5   : > { %v3641_v60 = vadd.f32 %v3601_v37, %v8486_v6  ;;  %v8612_v7 = vadd.f32 %v3985_v36, %v3639_v62 }
 0x2f6   : > { %v6617_v20 = vpop.f32.mrf.mxu1  ;;  %v6689_v15 = vpop.f32.mrf.mxu0 }
 0x2f8   : > { %v3604_v1 = vpop.f32.mrf.mxu1  ;;  %v3988_v38 = vpop.f32.mrf.mxu0 }
 0x2f9   : > { %v3642_v47 = vadd.f32 %v3604_v1, %v8493_v8  ;;  %v8615_v63 = vadd.f32 %v3988_v38, %v3640_v57 }
 0x2fa   : > { %v6618_v52 = vpop.f32.mrf.mxu1  ;;  %v6690_v26 = vpop.f32.mrf.mxu0 }
 0x2fc   : > { %v3609_v61 = vpop.f32.mrf.mxu1  ;;  %v3993_v41 = vpop.f32.mrf.mxu0 }
 0x2fd   : > { %v3643_v24 = vadd.f32 %v3609_v61, %v8498_v23  ;;  %v8618_v42 = vadd.f32 %v3993_v41, %v3641_v60 }
 0x2fe   : > { %v6621_v11 = vpop.f32.mrf.mxu1  ;;  %v6693_v6 = vpop.f32.mrf.mxu0 }
 0x300   : > { %v3612_v59 = vpop.f32.mrf.mxu1  ;;  %v3996_v5 = vpop.f32.mrf.mxu0 }
 0x301   : > { %v8620_v50 = vadd.f32 %v3996_v5, %v3642_v47 }
 0x302   : > { %v6622_v44 = vpop.f32.mrf.mxu1  ;;  %v6694_v31 = vpop.f32.mrf.mxu0 }
 0x304   : > { %v4001_v27 = vpop.f32.mrf.mxu0  ;;  %v4386_v8 = vpop.f32.mrf.mxu1 }
 0x305   : > { %v8622_v54 = vadd.f32 %v4001_v27, %v3643_v24  ;;  %v4504_v62 = vadd.f32 %v4386_v8, %v8511_v39 }
 0x306   : > { %v6697_v10 = vpop.f32.mrf.mxu0  ;;  %v6717_v22 = vpop.f32.mrf.mxu1 }
 0x308   : > { %v4004_v34 = vpop.f32.mrf.mxu0  ;;  %v4389_v12 = vpop.f32.mrf.mxu1 }
 0x309   : > { %v4505_v19 = vadd.f32 %v4389_v12, %v8519_v35 }
 0x30a   : > { %v6698_v23 = vpop.f32.mrf.mxu0  ;;  %v6718_v28 = vpop.f32.mrf.mxu1 }
 0x30c   : > { %v4394_v14 = vpop.f32.mrf.mxu1  ;;  %v4778_v43 = vpop.f32.mrf.mxu0 }
 0x30d   : > { %v4896_v0 = vadd.f32 %v4778_v43, %v4504_v62  ;;  %v4506_v1 = vadd.f32 %v4394_v14, %v8525_v48 }
 0x30e   : > { %v6721_v57 = vpop.f32.mrf.mxu1  ;;  %v6793_v30 = vpop.f32.mrf.mxu0 }
 0x30f   : > { %v4932_v60 = vadd.f32 %v8628_v49, %v4896_v0 }
 0x310   : > { %v4397_v37 = vpop.f32.mrf.mxu1  ;;  %v4781_v36 = vpop.f32.mrf.mxu0 }
 0x311   : > { %v4897_v20 = vadd.f32 %v4781_v36, %v4505_v19  ;;  %v4961_v26 = vmax.f32 %v4932_v60, 0.0  ;;  %v4507_v11 = vadd.f32 %v4397_v37, %v8534_v21 }
 0x312   : > { %v6722_v15 = vpop.f32.mrf.mxu1  ;;  %v6794_v39 = vpop.f32.mrf.mxu0 }
 0x313   : > { %v4933_v38 = vadd.f32 %v8628_v49, %v4897_v20 }
 0x314   : > { %v4402_v47 = vpop.f32.mrf.mxu1  ;;  %v4786_v52 = vpop.f32.mrf.mxu0 }
 0x315   : > { %v4962_v61 = vmax.f32 %v4933_v38, 0.0  ;;  %v4898_v41 = vadd.f32 %v4786_v52, %v4506_v1  ;;  %v4508_v8 = vadd.f32 %v4402_v47, %v8538_v3 }
 0x316   : > { %v6725_v35 = vpop.f32.mrf.mxu1  ;;  %v6797_v24 = vpop.f32.mrf.mxu0 }
 0x317   : > { %v5682_v6 = vpack.c.bf16 %v4962_v61, %v4961_v26  ;;  %v4934_v5 = vadd.f32 %v8628_v49, %v4898_v41 }
 0x318   : > { %v4405_v59 = vpop.f32.mrf.mxu1  ;;  %v4789_v48 = vpop.f32.mrf.mxu0 }
 0x319   : > { %5683 = vst [vmem:[%s8638_s30] sm:$0xff] %v5682_v6   ;;  %v4899_v44 = vadd.f32 %v4789_v48, %v4507_v11  ;;  %v4963_v12 = vmax.f32 %v4934_v5, 0.0  ;;  %v4509_v14 = vadd.f32 %v4405_v59, %v8545_v40 }
 0x31a   : > { %v6726_v31 = vpop.f32.mrf.mxu1  ;;  %v6798_v27 = vpop.f32.mrf.mxu0 }
 0x31b   : > { %v4935_v10 = vadd.f32 %v8628_v49, %v4899_v44 }
 0x31c   : > { %v4410_v22 = vpop.f32.mrf.mxu1  ;;  %v4794_v34 = vpop.f32.mrf.mxu0 }
 0x31d   : > { %v4964_v23 = vmax.f32 %v4935_v10, 0.0  ;;  %v4900_v28 = vadd.f32 %v4794_v34, %v4508_v8  ;;  %v4510_v36 = vadd.f32 %v4410_v22, %v8551_v33 }
 0x31e   : > { %v6729_v21 = vpop.f32.mrf.mxu1  ;;  %v6801_v62 = vpop.f32.mrf.mxu0 }
 0x31f   : > { %v5687_v43 = vpack.c.bf16 %v4964_v23, %v4963_v12  ;;  %v4936_v30 = vadd.f32 %v8628_v49, %v4900_v28 }
 0x320   : > { %v4413_v0 = vpop.f32.mrf.mxu1  ;;  %v4797_v57 = vpop.f32.mrf.mxu0 }
 0x321   : > { %5749 = vst [vmem:[%s8638_s30 + $0x8] sm:$0xff] %v5687_v43   ;;  %v4901_v19 = vadd.f32 %v4797_v57, %v4509_v14  ;;  %v4965_v39 = vmax.f32 %v4936_v30, 0.0  ;;  %v4511_v52 = vadd.f32 %v4413_v0, %v8558_v56 }
 0x322   : > { %v6730_v3 = vpop.f32.mrf.mxu1  ;;  %v6802_v37 = vpop.f32.mrf.mxu0 }
 0x323   : > { %v4937_v60 = vadd.f32 %v8628_v49, %v4901_v19 }
 0x324   : > { %v4418_v20 = vpop.f32.mrf.mxu1  ;;  %v4802_v15 = vpop.f32.mrf.mxu0 }
 0x325   : > { %v4966_v1 = vmax.f32 %v4937_v60, 0.0  ;;  %v4902_v38 = vadd.f32 %v4802_v15, %v4510_v36  ;;  %v4512_v6 = vadd.f32 %v4418_v20, %v8562_v13 }
 0x326   : > { %v6733_v40 = vpop.f32.mrf.mxu1  ;;  %v6805_v47 = vpop.f32.mrf.mxu0 }
 0x327   : > { %v5692_v26 = vpack.c.bf16 %v4966_v1, %v4965_v39  ;;  %v4938_v35 = vadd.f32 %v8628_v49, %v4902_v38 }
 0x328   : > { %v4421_v61 = vpop.f32.mrf.mxu1  ;;  %v4805_v41 = vpop.f32.mrf.mxu0 }
 0x329   : > { %5750 = vst [vmem:[%s8638_s30 + $0x10] sm:$0xff] %v5692_v26   ;;  %v4903_v24 = vadd.f32 %v4805_v41, %v4511_v52  ;;  %v4967_v44 = vmax.f32 %v4938_v35, 0.0  ;;  %v4513_v10 = vadd.f32 %v4421_v61, %v8567_v17 }
 0x32a   : > { %v6734_v33 = vpop.f32.mrf.mxu1  ;;  %v6806_v11 = vpop.f32.mrf.mxu0 }
 0x32b   : > { %v4939_v59 = vadd.f32 %v8628_v49, %v4903_v24 }
 0x32c   : > { %v4426_v48 = vpop.f32.mrf.mxu1  ;;  %v4810_v5 = vpop.f32.mrf.mxu0 }
 0x32d   : > { %v4968_v31 = vmax.f32 %v4939_v59, 0.0  ;;  %v4904_v27 = vadd.f32 %v4810_v5, %v4512_v6  ;;  %v4514_v62 = vadd.f32 %v4426_v48, %v8570_v46 }
 0x32e   : > { %v6737_v56 = vpop.f32.mrf.mxu1  ;;  %v6809_v8 = vpop.f32.mrf.mxu0 }
 0x32f   : > { %v5697_v22 = vpack.c.bf16 %v4968_v31, %v4967_v44  ;;  %v4940_v23 = vadd.f32 %v8628_v49, %v4904_v27 }
 0x330   : > { %v4429_v34 = vpop.f32.mrf.mxu1  ;;  %v4813_v12 = vpop.f32.mrf.mxu0 }
 0x331   : > { %5751 = vst [vmem:[%s8638_s30 + $0x18] sm:$0xff] %v5697_v22   ;;  %v4905_v28 = vadd.f32 %v4813_v12, %v4513_v10  ;;  %v4969_v57 = vmax.f32 %v4940_v23, 0.0  ;;  %v4515_v37 = vadd.f32 %v4429_v34, %v8573_v4 }
 0x332   : > { %v6738_v13 = vpop.f32.mrf.mxu1  ;;  %v6810_v21 = vpop.f32.mrf.mxu0 }
 0x333   : > { %v4941_v14 = vadd.f32 %v8628_v49, %v4905_v28 }
 0x334   : > { %v4434_v43 = vpop.f32.mrf.mxu1  ;;  %v4818_v0 = vpop.f32.mrf.mxu0 }
 0x335   : > { %v4970_v30 = vmax.f32 %v4941_v14, 0.0  ;;  %v4906_v19 = vadd.f32 %v4818_v0, %v4514_v62  ;;  %v4516_v38 = vadd.f32 %v4434_v43, %v8576_v18 }
 0x336   : > { %v6741_v17 = vpop.f32.mrf.mxu1  ;;  %v6813_v3 = vpop.f32.mrf.mxu0 }
 0x337   : > { %v5702_v36 = vpack.c.bf16 %v4970_v30, %v4969_v57  ;;  %v4942_v15 = vadd.f32 %v8628_v49, %v4906_v19 }
 0x338   : > { %v4437_v60 = vpop.f32.mrf.mxu1  ;;  %v4821_v20 = vpop.f32.mrf.mxu0 }
 0x339   : > { %5752 = vst [vmem:[%s8638_s30 + $0x20] sm:$0xff] %v5702_v36   ;;  %v4907_v39 = vadd.f32 %v4821_v20, %v4515_v37  ;;  %v4971_v26 = vmax.f32 %v4942_v15, 0.0  ;;  %v4517_v24 = vadd.f32 %v4437_v60, %v8579_v45 }
 0x33a   : > { %v6742_v46 = vpop.f32.mrf.mxu1  ;;  %v6814_v1 = vpop.f32.mrf.mxu0 }
 0x33b   : > { %v4943_v40 = vadd.f32 %v8628_v49, %v4907_v39 }
 0x33c   : > { %v4442_v47 = vpop.f32.mrf.mxu1  ;;  %v4826_v52 = vpop.f32.mrf.mxu0 }
 0x33d   : > { %v4972_v61 = vmax.f32 %v4943_v40, 0.0  ;;  %v4908_v41 = vadd.f32 %v4826_v52, %v4516_v38  ;;  %v4518_v44 = vadd.f32 %v4442_v47, %v8582_v53 }
 0x33e   : > { %v6745_v4 = vpop.f32.mrf.mxu1  ;;  %v6817_v35 = vpop.f32.mrf.mxu0 }
 0x33f   : > { %v5707_v33 = vpack.c.bf16 %v4972_v61, %v4971_v26  ;;  %v4944_v59 = vadd.f32 %v8628_v49, %v4908_v41 }
 0x340   : > { %v4445_v11 = vpop.f32.mrf.mxu1  ;;  %v4829_v6 = vpop.f32.mrf.mxu0 }
 0x341   : > { %5753 = vst [vmem:[%s8638_s30 + $0x28] sm:$0xff] %v5707_v33   ;;  %v4909_v48 = vadd.f32 %v4829_v6, %v4517_v24  ;;  %v4973_v8 = vmax.f32 %v4944_v59, 0.0  ;;  %v4519_v12 = vadd.f32 %v4445_v11, %v8585_v51 }
 0x342   : > { %v6746_v18 = vpop.f32.mrf.mxu1  ;;  %v6818_v5 = vpop.f32.mrf.mxu0 }
 0x343   : > { %v4945_v31 = vadd.f32 %v8628_v49, %v4909_v48 }
 0x344   : > { %v4450_v27 = vpop.f32.mrf.mxu1  ;;  %v4834_v56 = vpop.f32.mrf.mxu0 }
 0x345   : > { %v4974_v10 = vmax.f32 %v4945_v31, 0.0  ;;  %v4910_v22 = vadd.f32 %v4834_v56, %v4518_v44  ;;  %v4520_v43 = vadd.f32 %v4450_v27, %v8588_v25 }
 0x346   : > { %v6749_v45 = vpop.f32.mrf.mxu1  ;;  %v6821_v34 = vpop.f32.mrf.mxu0 }
 0x347   : > { %v5712_v23 = vpack.c.bf16 %v4974_v10, %v4973_v8  ;;  %v4946_v21 = vadd.f32 %v8628_v49, %v4910_v22 }
 0x348   : > { %v4453_v28 = vpop.f32.mrf.mxu1  ;;  %v4837_v13 = vpop.f32.mrf.mxu0 }
 0x349   : > { %5754 = vst [vmem:[%s8638_s30 + $0x30] sm:$0xff] %v5712_v23   ;;  %v4911_v62 = vadd.f32 %v4837_v13, %v4519_v12  ;;  %v4975_v19 = vmax.f32 %v4946_v21, 0.0  ;;  %v4521_v36 = vadd.f32 %v4453_v28, %v8591_v9 }
 0x34a   : > { %v6750_v53 = vpop.f32.mrf.mxu1  ;;  %v6822_v14 = vpop.f32.mrf.mxu0 }
 0x34b   : > { %v4947_v0 = vadd.f32 %v8628_v49, %v4911_v62 }
 0x34c   : > { %v4458_v57 = vpop.f32.mrf.mxu1  ;;  %v4842_v30 = vpop.f32.mrf.mxu0 }
 0x34d   : > { %v4976_v17 = vmax.f32 %v4947_v0, 0.0  ;;  %v4912_v3 = vadd.f32 %v4842_v30, %v4520_v43  ;;  %v4522_v38 = vadd.f32 %v4458_v57, %v8594_v16 }
 0x34e   : > { %v6753_v51 = vpop.f32.mrf.mxu1  ;;  %v6825_v37 = vpop.f32.mrf.mxu0 }
 0x34f   : > { %v5717_v60 = vpack.c.bf16 %v4976_v17, %v4975_v19  ;;  %v4948_v39 = vadd.f32 %v8628_v49, %v4912_v3 }
 0x350   : > { %v4461_v20 = vpop.f32.mrf.mxu1  ;;  %v4845_v15 = vpop.f32.mrf.mxu0 }
 0x351   : > { %5755 = vst [vmem:[%s8638_s30 + $0x38] sm:$0xff] %v5717_v60   ;;  %v4913_v46 = vadd.f32 %v4845_v15, %v4521_v36  ;;  %v4977_v26 = vmax.f32 %v4948_v39, 0.0  ;;  %v4523_v35 = vadd.f32 %v4461_v20, %v8597_v55 }
 0x352   : > { %v6754_v25 = vpop.f32.mrf.mxu1  ;;  %v6826_v1 = vpop.f32.mrf.mxu0 }
 0x353   : > { %v4949_v40 = vadd.f32 %v8628_v49, %v4913_v46 }
 0x354   : > { %v4466_v47 = vpop.f32.mrf.mxu1  ;;  %v4850_v52 = vpop.f32.mrf.mxu0 }
 0x355   : > { %v4978_v61 = vmax.f32 %v4949_v40, 0.0  ;;  %v4914_v41 = vadd.f32 %v4850_v52, %v4522_v38  ;;  %v4524_v18 = vadd.f32 %v4466_v47, %v8600_v32 }
 0x356   : > { %v6757_v9 = vpop.f32.mrf.mxu1  ;;  %v6829_v4 = vpop.f32.mrf.mxu0 }
 0x357   : > { %v5722_v24 = vpack.c.bf16 %v4978_v61, %v4977_v26  ;;  %v4950_v6 = vadd.f32 %v8628_v49, %v4914_v41 }
 0x358   : > { %v4469_v33 = vpop.f32.mrf.mxu1  ;;  %v4853_v11 = vpop.f32.mrf.mxu0 }
 0x359   : > { %5756 = vst [vmem:[%s8638_s30 + $0x40] sm:$0xff] %v5722_v24   ;;  %v4915_v59 = vadd.f32 %v4853_v11, %v4523_v35  ;;  %v4979_v27 = vmax.f32 %v4950_v6, 0.0  ;;  %v4525_v22 = vadd.f32 %v4469_v33, %v8603_v2 }
 0x35a   : > { %v6758_v16 = vpop.f32.mrf.mxu1  ;;  %v6830_v48 = vpop.f32.mrf.mxu0 }
 0x35b   : > { %v4951_v5 = vadd.f32 %v8628_v49, %v4915_v59 }
 0x35c   : > { %v4474_v44 = vpop.f32.mrf.mxu1  ;;  %v4858_v31 = vpop.f32.mrf.mxu0 }
 0x35d   : > { %v4980_v56 = vmax.f32 %v4951_v5, 0.0  ;;  %v4916_v8 = vadd.f32 %v4858_v31, %v4524_v18  ;;  %v4526_v21 = vadd.f32 %v4474_v44, %v8606_v58 }
 0x35e   : > { %v6761_v55 = vpop.f32.mrf.mxu1  ;;  %v6833_v10 = vpop.f32.mrf.mxu0 }
 0x35f   : > { %v5727_v45 = vpack.c.bf16 %v4980_v56, %v4979_v27  ;;  %v4952_v23 = vadd.f32 %v8628_v49, %v4916_v8 }
 0x360   : > { %v4477_v34 = vpop.f32.mrf.mxu1  ;;  %v4861_v12 = vpop.f32.mrf.mxu0 }
 0x361   : > { %5757 = vst [vmem:[%s8638_s30 + $0x48] sm:$0xff] %v5727_v45   ;;  %v4917_v28 = vadd.f32 %v4861_v12, %v4525_v22  ;;  %v4981_v43 = vmax.f32 %v4952_v23, 0.0  ;;  %v4527_v19 = vadd.f32 %v4477_v34, %v8609_v29 }
 0x362   : > { %v6762_v32 = vpop.f32.mrf.mxu1  ;;  %v6834_v13 = vpop.f32.mrf.mxu0 }
 0x363   : > { %v4953_v62 = vadd.f32 %v8628_v49, %v4917_v28 }
 0x364   : > { %v4482_v53 = vpop.f32.mrf.mxu1  ;;  %v4866_v14 = vpop.f32.mrf.mxu0 }
 0x365   : > { %v4982_v0 = vmax.f32 %v4953_v62, 0.0  ;;  %v4918_v57 = vadd.f32 %v4866_v14, %v4526_v21  ;;  %v4528_v20 = vadd.f32 %v4482_v53, %v8612_v7  ;;  %v5138_v21 = vld [vmem:[%s8638_s30 + $0x70] sm:$0x1] }
 0x366   : > { %v6765_v2 = vpop.f32.mrf.mxu1  ;;  %v6837_v30 = vpop.f32.mrf.mxu0 }
 0x367   : > { %v5732_v17 = vpack.c.bf16 %v4982_v0, %v4981_v43  ;;  %v4954_v37 = vadd.f32 %v8628_v49, %v4918_v57 }
 0x368   : > { %v4485_v3 = vpop.f32.mrf.mxu1  ;;  %v4869_v51 = vpop.f32.mrf.mxu0 }
 0x369   : > { %5758 = vst [vmem:[%s8638_s30 + $0x50] sm:$0xff] %v5732_v17   ;;  %v4919_v36 = vadd.f32 %v4869_v51, %v4527_v19  ;;  %v4983_v25 = vmax.f32 %v4954_v37, 0.0  ;;  %v4529_v47 = vadd.f32 %v4485_v3, %v8615_v63 }
 0x36a   : > { %v6766_v58 = vpop.f32.mrf.mxu1  ;;  %v6838_v60 = vpop.f32.mrf.mxu0 }
 0x36b   : > { %v4955_v15 = vadd.f32 %v8628_v49, %v4919_v36 }
 0x36c   : > { %v4490_v39 = vpop.f32.mrf.mxu1  ;;  %v4874_v46 = vpop.f32.mrf.mxu0 }
 0x36d   : > { %v4984_v1 = vmax.f32 %v4955_v15, 0.0  ;;  %v4920_v38 = vadd.f32 %v4874_v46, %v4528_v20  ;;  %v4530_v35 = vadd.f32 %v4490_v39, %v8618_v42 }
 0x36e   : > { %v6769_v29 = vpop.f32.mrf.mxu1  ;;  %v6841_v40 = vpop.f32.mrf.mxu0 }
 0x36f   : > { %v5737_v52 = vpack.c.bf16 %v4984_v1, %v4983_v25  ;;  %v4956_v41 = vadd.f32 %v8628_v49, %v4920_v38 }
 0x370   : > { %v4493_v26 = vpop.f32.mrf.mxu1  ;;  %v4877_v61 = vpop.f32.mrf.mxu0 }
 0x371   : > { %5759 = vst [vmem:[%s8638_s30 + $0x58] sm:$0xff] %v5737_v52   ;;  %v4921_v9 = vadd.f32 %v4877_v61, %v4529_v47  ;;  %v4985_v6 = vmax.f32 %v4956_v41, 0.0  ;;  %v4531_v18 = vadd.f32 %v4493_v26, %v8620_v50 }
 0x372   : > { %v6770_v7 = vpop.f32.mrf.mxu1  ;;  %v6842_v4 = vpop.f32.mrf.mxu0 }
 0x373   : > { %v4957_v24 = vadd.f32 %v8628_v49, %v4921_v9 }
 0x374   : > { %v4498_v33 = vpop.f32.mrf.mxu1  ;;  %v4882_v11 = vpop.f32.mrf.mxu0 }
 0x375   : > { %v4986_v59 = vmax.f32 %v4957_v24, 0.0  ;;  %v4922_v16 = vadd.f32 %v4882_v11, %v4530_v35  ;;  %v4532_v55 = vadd.f32 %v4498_v33, %v8622_v54 }
 0x376   : > { %v6845_v63 = vpop.f32.mrf.mxu0  ;;  %v6773_v48 = vpop.f32.mrf.mxu1 }
 0x377   : > { %v5742_v5 = vpack.c.bf16 %v4986_v59, %v4985_v6  ;;  %v4958_v27 = vadd.f32 %v8628_v49, %v4922_v16 }
 0x378   : > { %v4885_v44 = vpop.f32.mrf.mxu0  ;;  %v4501_v31 = vpop.f32.mrf.mxu1 }
 0x379   : > { %5760 = vst [vmem:[%s8638_s30 + $0x60] sm:$0xff] %v5742_v5   ;;  %v4923_v56 = vadd.f32 %v4885_v44, %v4531_v18  ;;  %v4987_v45 = vmax.f32 %v4958_v27, 0.0 }
 0x37a   : > { %v6846_v42 = vpop.f32.mrf.mxu0  ;;  %v6774_v8 = vpop.f32.mrf.mxu1 }
 0x37b   : > { %v4959_v10 = vadd.f32 %v8628_v49, %v4923_v56 }
 0x37c   : > { %v4890_v22 = vpop.f32.mrf.mxu0 }
 0x37d   : > { %v4988_v34 = vmax.f32 %v4959_v10, 0.0  ;;  %v4924_v50 = vadd.f32 %v4890_v22, %v4532_v55 }
 0x37e   : > { %v6849_v12 = vpop.f32.mrf.mxu0 }
 0x37f   : > { %v5747_v23 = vpack.c.bf16 %v4988_v34, %v4987_v45  ;;  %v4960_v28 = vadd.f32 %v8628_v49, %v4924_v50 }
 0x380   : > { %v4893_v32 = vpop.f32.mrf.mxu0 }
 0x381   : > { %5761 = vst [vmem:[%s8638_s30 + $0x68] sm:$0xff] %v5747_v23   ;;  %v4989_v13 = vmax.f32 %v4960_v28, 0.0 }
 0x382   : > { %v6850_v62 = vpop.f32.mrf.mxu0 }
 0x383   : > { %v5678_v54 = vpack.c.bf16 %v4989_v13, %v4989_v13 }
 0x385   : > { %v5139_v53 = vsel %vm5137_vm7, %v5678_v54, %v5138_v21 }
 0x386   : > { %5140 = vst [vmem:[%s8638_s30 + $0x70] sm:$0x1] %v5139_v53 }
 0x387 PF: > { %s13_s12 = sadd.s32 1, %s7137_s12  }
 0x388   : > { %p10_p4 = scmp.ge.s32.totalorder %s13_s12, 4  }
 0x38a   :  { %12 = sbr.rel (!%p10_p4) target bundleno = 1 (0x1), region = 72 }

// kernel: quantized_alexnet_forward.6
= control target key start
LH: loop header
LB: loop body
LE: loop exit
PB: predicated region body
PF: predicated region fallthrough
CT: control target
= control target key end

     0   :  { %s1625_s12 = smov 0   ;;  %s1816_s0 = inlined_call_operand.vmem [shape: bf16[2,77,128], index: 0, kind: input, shape index: {}]   ;;  %s1817_s1 = inlined_call_operand.vmem [shape: bf16[5,128,128], index: 1, kind: input, shape index: {}]   ;;  %s1818_s2 = inlined_call_operand.vmem [shape: f32[1,128], index: 2, kind: input, shape index: {}]   ;;  %s1819_s3 = inlined_call_operand.vmem [shape: bf16[2,49,128], index: 3, kind: output, shape index: {}]  }
   0x1 LB: > { %s1170_s13 = sadd.s32 4294967295, %s1603_s12   ;;  %p1174_p0 = scmp.ge.s32.totalorder %s1603_s12, 1  ;;  %s1603_s12 = sphi %s1625_s12, %s13_s12  }
   0x2   : > { %p137_p1 = scmp.lt.s32.totalorder %s1603_s12, 3 }
   0x4   : > { %p138_p2 = pnand %p1174_p0, %p137_p1 }
   0x5   : > { %p161_p3 = scmp.lt.s32.totalorder (!%p138_p2), %s1170_s13, 1 }
   0x6   : > { %141 = sbr.rel (%p138_p2) target bundleno = 317 (0x13d), region = 32 }
   0xb   : > { %v1539_v0 = vld [vmem:[%s1817_s1 + $0x78] sm:$0xff]   ;;  %v1541_v2 = vld [vmem:[%s1817_s1 + $0x70] sm:$0xff]   ;;  %v1543_v4 = vld [vmem:[%s1817_s1 + $0x68] sm:$0xff]   ;;  %s1821_s13 = smov (!%p161_p3, %s1170_s13), 1  ;;  %vm232_vm0 = vsmask.f32 4352 }
   0xc   : > { %v1540_v1 = vld [vmem:[%s1817_s1 + $0x38] sm:$0xff]   ;;  %1393 = vmatprep.subr.bf16.mxu0 %v1539_v0  ;;  %v1542_v3 = vld [vmem:[%s1817_s1 + $0x30] sm:$0xff]   ;;  %v1544_v5 = vld [vmem:[%s1817_s1 + $0x28] sm:$0xff]   ;;  %s1529_s30 = smul.u32 40, %s1821_s13  ;;  %vm548_vm1 = vcmask 1044480   ;;  %vm922_vm3 = vcmask 1045504  }
   0xd   : > { %1417 = vmatprep.subr.bf16.mxu1 %v1540_v1  ;;  %1394 = vmatpush3.bf16.msra.mxu0 %v1539_v0  ;;  %v1545_v6 = vld [vmem:[%s1817_s1 + $0x60] sm:$0xff]   ;;  %v1547_v8 = vld [vmem:[%s1817_s1 + $0x58] sm:$0xff]   ;;  %v1549_v10 = vld [vmem:[%s1817_s1 + $0x50] sm:$0xff]   ;;  %vm721_vm2 = vsmask.f32 5376  ;;  %s1530_s24 = smul.u32 28, %s1821_s13 }
   0xe   : > { %1418 = vmatpush3.bf16.msra.mxu1 %v1540_v1  ;;  %1395 = vmatprep.subr.bf16.mxu0 %v1541_v2  ;;  %v1546_v7 = vld [vmem:[%s1817_s1 + $0x20] sm:$0xff]   ;;  %v1548_v9 = vld [vmem:[%s1817_s1 + $0x18] sm:$0xff]   ;;  %s1669_s10 = scalar_lea.vmem %s1816_s0, %s1529_s30  ;;  %v1550_v11 = vld [vmem:[%s1817_s1 + $0x10] sm:$0xff]   ;;  %vm1109_vm4 = vcmask 1040384   ;;  %vm1110_vm5 = vsmask.f32 256 }
   0xf   : > { %1419 = vmatprep.subr.bf16.mxu1 %v1542_v3  ;;  %v173_v12 = vld [vmem:[%s1669_s10 + $0x4] sm:$0xf]  ;;  %v195_v13 = vld [vmem:[%s1669_s10] sm:$0x8]  ;;  %v1556_v14 = vld [vmem:[%s1669_s10 + $0x8] sm:$0xff]   ;;  %s1806_s29 = scalar_lea.vmem %s1819_s3, %s1530_s24 }
  0x10   : > { %v1558_v15 = vld [vmem:[%s1669_s10 + $0x10] sm:$0xff]   ;;  %v1193_v16 = vcombine.low %v195_v13, %v173_v12  ;;  %v172_v17 = vld [vmem:[%s1669_s10] sm:$0xf]  ;;  %v1551_v18 = vld [vmem:[%s1817_s1 + $0x48] sm:$0xff]   ;;  %v242_v19 = vshrl.u32 %v1556_v14, 16  ;;  %v245_v20 = vshll.u32 %v1556_v14, 16 }
  0x11   : > { %1396 = vmatpush3.bf16.msra.mxu0 %v1541_v2  ;;  %v1205_v21 = vcombine.low %v172_v17, %v173_v12  ;;  %v251_v22 = vshrl.u32 %v1558_v15, 16  ;;  %v1552_v23 = vld [vmem:[%s1817_s1 + $0x8] sm:$0xff]   ;;  %v254_v26 = vshll.u32 %v1558_v15, 16  ;;  %v1553_v29 = vld [vmem:[%s1817_s1 + $0x40] sm:$0xff]   ;;  %v1559_v39 = vld [vmem:[%s1817_s1 + $0xb8] sm:$0xff]  }
  0x12   : > { %1420 = vmatpush3.bf16.msra.mxu1 %v1542_v3  ;;  %1397 = vmatprep.subr.bf16.mxu0 %v1543_v4  ;;  %v234_v24 = vshrl.u32 %v1193_v16, 16  ;;  %v237_v25 = vshll.u32 %v1193_v16, 16  ;;  %v244_v27 = vrot.slane %v242_v19, 3  ;;  %v247_v28 = vrot.slane %v245_v20, 4  ;;  %v1554_v36 = vld [vmem:[%s1817_s1] sm:$0xff]   ;;  %v1560_v40 = vld [vmem:[%s1817_s1 + $0xf8] sm:$0xff]   ;;  %vm1111_vm6 = vmand %vm1109_vm4, %vm1110_vm5 }
  0x13   : > { %1421 = vmatprep.subr.bf16.mxu1 %v1544_v5  ;;  %1433 = vmatprep.mubr.bf16.mxu1 %v1205_v21  ;;  %v253_v32 = vrot.slane %v251_v22, 3  ;;  %v256_v33 = vrot.slane %v254_v26, 4  ;;  %v1569_v41 = vld [vmem:[%s1669_s10 + $0x18] ss:$0 sps:$4 sm:$0xff]   ;;  %v1561_v43 = vld [vmem:[%s1817_s1 + $0xb0] sm:$0xff]   ;;  %v1563_v49 = vld [vmem:[%s1817_s1 + $0xa8] sm:$0xff]  }
  0x14   : > { %v236_v30 = vrot.slane %v234_v24, 3  ;;  %v239_v31 = vrot.slane %v237_v25, 4  ;;  %v248_v34 = vor.u32 %v247_v28, %v244_v27  ;;  %v260_v44 = vshrl.u32 %v1569_v41, 16  ;;  %v1562_v46 = vld [vmem:[%s1817_s1 + $0xf0] sm:$0xff]   ;;  %v1564_v51 = vld [vmem:[%s1817_s1 + $0xe8] sm:$0xff]   ;;  %v1565_v53 = vld [vmem:[%s1817_s1 + $0xa0] sm:$0xff]  }
  0x15   : > { %1398 = vmatpush3.bf16.msra.mxu0 %v1543_v4  ;;  %v257_v38 = vor.u32 %v256_v33, %v253_v32  ;;  %v263_v45 = vshll.u32 %v1569_v41, 16  ;;  %v1570_v52 = vld [vmem:[%s1669_s10 + $0x18] ss:$0 sps:$4 sm:$0x11]   ;;  %v1566_v55 = vld [vmem:[%s1817_s1 + $0xe0] sm:$0xff]   ;;  %v1725_v57 = vld [vmem:[%s1669_s10 + $0xc] sm:$0xff]  }
  0x16   : > { %1422 = vmatpush3.bf16.msra.mxu1 %v1544_v5  ;;  %1399 = vmatprep.subr.bf16.mxu0 %v1545_v6  ;;  %v240_v35 = vor.u32 %v239_v31, %v236_v30  ;;  %v262_v47 = vrot.slane %v260_v44, 3  ;;  %v1577_v56 = vld [vmem:[%s1669_s10 + $0x4] sm:$0xf8]   ;;  %v1580_v59 = vld [vmem:[%s1669_s10 + $0x10] sm:$0xff]   ;;  %v1567_v60 = vld [vmem:[%s1817_s1 + $0x98] sm:$0xff]   ;;  %v550_v61 = vrot.slane %v1725_v57, 3 }
  0x17   : > { %1423 = vmatprep.subr.bf16.mxu1 %v1546_v7  ;;  %v258_v42 = vsel %vm232_vm0, %v248_v34, %v257_v38  ;;  %v265_v48 = vrot.slane %v263_v45, 4  ;;  %v549_v58 = vrot.slane %v1577_v56, 3  ;;  %v1579_v62 = vld [vmem:[%s1669_s10 + $0x8] sm:$0xfc]   ;;  %v731_v63 = vshrl.u32 %v1580_v59, 16  ;;  %v1568_v1 = vld [vmem:[%s1817_s1 + $0xd8] sm:$0xff]  }
  0x18   : > { %v249_v37 = vsel %vm232_vm0, %v240_v35, %v248_v34  ;;  %v734_v0 = vshll.u32 %v1580_v59, 16  ;;  %v723_v3 = vshrl.u32 %v1579_v62, 16  ;;  %v726_v4 = vshll.u32 %v1579_v62, 16  ;;  %v1582_v5 = vld [vmem:[%s1669_s10 + $0x18] sm:$0xff]   ;;  %v1572_v13 = vld [vmem:[%s1817_s1 + $0xd0] sm:$0xff]   ;;  %v1574_v19 = vld [vmem:[%s1817_s1 + $0xc8] sm:$0xff]  }
  0x19   : > { %1400 = vmatpush3.bf16.msra.mxu0 %v1545_v6  ;;  %1409 = vmatprep.mubr.bf16.mxu0 %v249_v37  ;;  %v266_v50 = vor.u32 %v265_v48, %v262_v47  ;;  %v551_v2 = vsel %vm548_vm1, %v549_v58, %v550_v61  ;;  %v733_v6 = vrot.slane %v731_v63, 2  ;;  %v743_v16 = vshll.u32 %v1582_v5, 16  ;;  %v1587_v17 = vld [vmem:[%s1669_s10 + $0x20] ss:$0 sps:$4 sm:$0x77]   ;;  %v1581_v20 = vld [vmem:[%s1669_s10 + $0x14] sm:$0xff]  }
  0x1a   : > { %1424 = vmatpush3.bf16.msra.mxu1 %v1546_v7  ;;  %1401 = vmatprep.subr.bf16.mxu0 %v1547_v8  ;;  %v736_v7 = vrot.slane %v734_v0, 3  ;;  %v1575_v21 = vld [vmem:[%s1817_s1 + $0x80] sm:$0xff]   ;;  %v749_v24 = vshrl.u32 %v1587_v17, 16  ;;  %v752_v25 = vshll.u32 %v1587_v17, 16  ;;  %v1585_v27 = vld [vmem:[%s1669_s10 + $0x1c] ss:$0 sps:$4 sm:$0xff]  }
  0x1b   : > { %1425 = vmatprep.subr.bf16.mxu1 %v1548_v9  ;;  %v267_v54 = vsel %vm232_vm0, %v257_v38, %v266_v50  ;;  %v1576_v26 = vld [vmem:[%s1817_s1 + $0xc0] sm:$0xff]   ;;  %v552_v28 = vrot.slane %v1581_v20, 3  ;;  %v1583_v32 = vld [vmem:[%s1817_s1 + $0x138] sm:$0xff]   ;;  %v554_v33 = vrot.slane %v1585_v27, 3  ;;  %v1584_v37 = vld [vmem:[%s1817_s1 + $0x130] sm:$0xff]  }
  0x1c   : > { %v754_v30 = vrot.slane %v752_v25, 3  ;;  %v1586_v44 = vld [vmem:[%s1817_s1 + $0x128] sm:$0xff]  }
  0x1d   : > { %1402 = vmatpush3.bf16.msra.mxu0 %v1547_v8  ;;  %v725_v8 = vrot.slane %v723_v3, 2  ;;  %v553_v34 = vsel %vm548_vm1, %v550_v61, %v552_v28  ;;  %v555_v38 = vsel %vm548_vm1, %v552_v28, %v554_v33 }
  0x1e   : > { %1426 = vmatpush3.bf16.msra.mxu1 %v1548_v9  ;;  %1403 = vmatprep.subr.bf16.mxu0 %v1549_v10  ;;  %v728_v9 = vrot.slane %v726_v4, 3 }
  0x1f   : > { %1427 = vmatprep.subr.bf16.mxu1 %v1550_v11 }
  0x20   : > { %v729_v12 = vor.u32 %v728_v9, %v725_v8 }
  0x21   : > { %1404 = vmatpush3.bf16.msra.mxu0 %v1549_v10  ;;  %v737_v10 = vor.u32 %v736_v7, %v733_v6 }
  0x22   : > { %1428 = vmatpush3.bf16.msra.mxu1 %v1550_v11  ;;  %1405 = vmatprep.subr.bf16.mxu0 %v1551_v18  ;;  %v1571_v11 = vld [vmem:[%s1817_s1 + $0x90] sm:$0xff]  }
  0x23   : > { %1429 = vmatprep.subr.bf16.mxu1 %v1552_v23 }
  0x25   : > { %1406 = vmatpush3.bf16.msra.mxu0 %v1551_v18  ;;  %v1573_v18 = vld [vmem:[%s1817_s1 + $0x88] sm:$0xff]  }
  0x26   : > { %1430 = vmatpush3.bf16.msra.mxu1 %v1552_v23  ;;  %1407 = vmatprep.subr.bf16.mxu0 %v1553_v29  ;;  %v745_v23 = vrot.slane %v743_v16, 3 }
  0x27   : > { %1431 = vmatprep.subr.bf16.mxu1 %v1554_v36 }
  0x29   : > { %1408 = vmatpush3.bf16.msra.mxu0 %v1553_v29  ;;  %v751_v29 = vrot.slane %v749_v24, 2 }
  0x2a   : > { %1432 = vmatpush3.bf16.msra.mxu1 %v1554_v36  ;;  %1441 = vmatprep.subr.bf16.mxu0 %v1559_v39 }
  0x2b   : > { %1465 = vmatprep.subr.bf16.mxu1 %v1560_v40  ;;  %v755_v35 = vor.u32 %v754_v30, %v751_v29 }
  0x2c   : > { %1410 = vmatmul.mubr.bf16.vlgmr.msra.gmra.mxu0 %v258_v42  ;;  %v1595_v42 = vld [vmem:[%s1669_s10 + $0x1c] sm:$0xff]  }
  0x2d   : > { %1434 = vmatmul.mubr.bf16.vlgmr.msra.gmra.mxu1 %v1556_v14  ;;  %1442 = vmatpush3.bf16.msra.mxu0 %v1559_v39  ;;  %v740_v14 = vshrl.u32 %v1582_v5, 16  ;;  %v1593_v39 = vld [vmem:[%s1669_s10 + $0xc] sm:$0xfc]  }
  0x2e   : > { %1466 = vmatpush3.bf16.msra.mxu1 %v1560_v40  ;;  %1443 = vmatprep.subr.bf16.mxu0 %v1561_v43  ;;  %v1594_v40 = vld [vmem:[%s1669_s10 + $0x14] sm:$0xff]   ;;  %v923_v45 = vrot.slane %v1593_v39, 2 }
  0x2f   : > { %1467 = vmatprep.subr.bf16.mxu1 %v1562_v46  ;;  %1437 = vmatprep.mubr.bf16.mxu1 %v1558_v15  ;;  %v738_v15 = vsel %vm721_vm2, %v729_v12, %v737_v10  ;;  %v742_v22 = vrot.slane %v740_v14, 2 }
  0x30   : > { %1413 = vmatprep.mubr.bf16.mxu0 %v267_v54  ;;  %v1591_v54 = vld [vmem:[%s1817_s1 + $0x108] sm:$0xff]  }
  0x31   : > { %1444 = vmatpush3.bf16.msra.mxu0 %v1561_v43  ;;  %v746_v31 = vor.u32 %v745_v23, %v742_v22  ;;  %v1596_v43 = vld [vmem:[%s1669_s10 + $0x24] ss:$0 sps:$4 sm:$0x77]  }
  0x32   : > { %1468 = vmatpush3.bf16.msra.mxu1 %v1562_v46  ;;  %1445 = vmatprep.subr.bf16.mxu0 %v1563_v49  ;;  %v924_v46 = vrot.slane %v1594_v40, 2  ;;  %v928_v48 = vrot.slane %v1596_v43, 2  ;;  %v1299_v43 = vld [vmem:[%s1818_s2] ss:$0 sm:$0xff] }
  0x33   : > { %1469 = vmatprep.subr.bf16.mxu1 %v1564_v51  ;;  %v747_v36 = vsel %vm721_vm2, %v737_v10, %v746_v31  ;;  %v756_v41 = vsel %vm721_vm2, %v746_v31, %v755_v35 }
  0x34   : > { %1414 = vmatmul.mubr.bf16.gmra.mxu0 %v262_v47  ;;  %v926_v47 = vrot.slane %v1595_v42, 2  ;;  %v925_v50 = vsel %vm922_vm3, %v923_v45, %v924_v46 }
  0x35   : > { %1446 = vmatpush3.bf16.msra.mxu0 %v1563_v49  ;;  %1438 = vmatmul.mubr.bf16.gmra.mxu1 %v1570_v52  ;;  %v1588_v49 = vld [vmem:[%s1817_s1 + $0x120] sm:$0xff]   ;;  %v1589_v52 = vld [vmem:[%s1817_s1 + $0x118] sm:$0xff]  }
  0x36   : > { %1470 = vmatpush3.bf16.msra.mxu1 %v1564_v51  ;;  %1447 = vmatprep.subr.bf16.mxu0 %v1565_v53  ;;  %v929_v51 = vsel %vm922_vm3, %v926_v47, %v928_v48  ;;  %v927_v56 = vsel %vm922_vm3, %v924_v46, %v926_v47 }
  0x37   : > { %1471 = vmatprep.subr.bf16.mxu1 %v1566_v55  ;;  %1457 = vmatprep.mubr.bf16.mxu0 %v551_v2 }
  0x38   : > { %1481 = vmatprep.mubr.bf16.mxu1 %v738_v15 }
  0x39   : > { %1448 = vmatpush3.bf16.msra.mxu0 %v1565_v53  ;;  %v1590_v53 = vld [vmem:[%s1817_s1 + $0x110] sm:$0xff]  }
  0x3a   : > { %1472 = vmatpush3.bf16.msra.mxu1 %v1566_v55  ;;  %1449 = vmatprep.subr.bf16.mxu0 %v1567_v60  ;;  %v1592_v55 = vld [vmem:[%s1817_s1 + $0x100] sm:$0xff]  }
  0x3b   : > { %1473 = vmatprep.subr.bf16.mxu1 %v1568_v1 }
  0x3d   : > { %1450 = vmatpush3.bf16.msra.mxu0 %v1567_v60 }
  0x3e   : > { %1474 = vmatpush3.bf16.msra.mxu1 %v1568_v1  ;;  %1451 = vmatprep.subr.bf16.mxu0 %v1571_v11 }
  0x3f   : > { %1475 = vmatprep.subr.bf16.mxu1 %v1572_v13 }
  0x41   : > { %1452 = vmatpush3.bf16.msra.mxu0 %v1571_v11 }
  0x42   : > { %1476 = vmatpush3.bf16.msra.mxu1 %v1572_v13  ;;  %1453 = vmatprep.subr.bf16.mxu0 %v1573_v18 }
  0x43   : > { %1477 = vmatprep.subr.bf16.mxu1 %v1574_v19 }
  0x45   : > { %1454 = vmatpush3.bf16.msra.mxu0 %v1573_v18 }
  0x46   : > { %1478 = vmatpush3.bf16.msra.mxu1 %v1574_v19  ;;  %1455 = vmatprep.subr.bf16.mxu0 %v1575_v21 }
  0x47   : > { %1479 = vmatprep.subr.bf16.mxu1 %v1576_v26 }
  0x49   : > { %1456 = vmatpush3.bf16.msra.mxu0 %v1575_v21 }
  0x4a   : > { %1480 = vmatpush3.bf16.msra.mxu1 %v1576_v26  ;;  %1489 = vmatprep.subr.bf16.mxu0 %v1583_v32 }
  0x4b   : > { %1513 = vmatprep.subr.bf16.mxu1 %v1583_v32 }
  0x4c   : > { %1458 = vmatmul.mubr.bf16.vlgmr.msra.gmra.mxu0 %v553_v34 }
  0x4d   : > { %1482 = vmatmul.mubr.bf16.vlgmr.msra.gmra.mxu1 %v747_v36  ;;  %1490 = vmatpush3.bf16.msra.mxu0 %v1583_v32 }
  0x4e   : > { %1521 = vmatpush3.bf16.msra.mxu1 %v1583_v32  ;;  %1491 = vmatprep.subr.bf16.mxu0 %v1584_v37 }
  0x4f   : > { %1514 = vmatprep.subr.bf16.mxu1 %v1584_v37  ;;  %1461 = vmatprep.mubr.bf16.mxu0 %v555_v38 }
  0x50   : > { %1485 = vmatprep.mubr.bf16.mxu1 %v756_v41 }
  0x51   : > { %1492 = vmatpush3.bf16.msra.mxu0 %v1584_v37 }
  0x52   : > { %1522 = vmatpush3.bf16.msra.mxu1 %v1584_v37  ;;  %1493 = vmatprep.subr.bf16.mxu0 %v1586_v44 }
  0x53   : > { %1515 = vmatprep.subr.bf16.mxu1 %v1586_v44 }
  0x54   : > { %1462 = vmatmul.mubr.bf16.gmra.mxu0 %v554_v33 }
  0x55   : > { %1494 = vmatpush3.bf16.msra.mxu0 %v1586_v44  ;;  %1486 = vmatmul.mubr.bf16.gmra.mxu1 %v751_v29 }
  0x56   : > { %1523 = vmatpush3.bf16.msra.mxu1 %v1586_v44  ;;  %1495 = vmatprep.subr.bf16.mxu0 %v1588_v49 }
  0x57   : > { %1516 = vmatprep.subr.bf16.mxu1 %v1588_v49  ;;  %1505 = vmatprep.mubr.bf16.mxu0 %v925_v50 }
  0x58   : > { %1509 = vmatprep.mubr.bf16.mxu1 %v929_v51 }
  0x59   : > { %1496 = vmatpush3.bf16.msra.mxu0 %v1588_v49 }
  0x5a   : > { %1524 = vmatpush3.bf16.msra.mxu1 %v1588_v49  ;;  %1497 = vmatprep.subr.bf16.mxu0 %v1589_v52 }
  0x5b   : > { %1517 = vmatprep.subr.bf16.mxu1 %v1589_v52 }
  0x5d   : > { %1498 = vmatpush3.bf16.msra.mxu0 %v1589_v52 }
  0x5e   : > { %1525 = vmatpush3.bf16.msra.mxu1 %v1589_v52  ;;  %1499 = vmatprep.subr.bf16.mxu0 %v1590_v53 }
  0x5f   : > { %1518 = vmatprep.subr.bf16.mxu1 %v1590_v53 }
  0x61   : > { %1500 = vmatpush3.bf16.msra.mxu0 %v1590_v53 }
  0x62   : > { %1526 = vmatpush3.bf16.msra.mxu1 %v1590_v53  ;;  %1501 = vmatprep.subr.bf16.mxu0 %v1591_v54 }
  0x63   : > { %1519 = vmatprep.subr.bf16.mxu1 %v1591_v54 }
  0x65   : > { %1502 = vmatpush3.bf16.msra.mxu0 %v1591_v54 }
  0x66   : > { %1527 = vmatpush3.bf16.msra.mxu1 %v1591_v54  ;;  %1503 = vmatprep.subr.bf16.mxu0 %v1592_v55 }
  0x67   : > { %1520 = vmatprep.subr.bf16.mxu1 %v1592_v55 }
  0x69   : > { %1504 = vmatpush3.bf16.msra.mxu0 %v1592_v55 }
  0x6a   : > { %1528 = vmatpush3.bf16.msra.mxu1 %v1592_v55 }
  0x6c   : > { %1506 = vmatmul.mubr.bf16.vlgmr.msra.gmra.mxu0 %v927_v56 }
  0x6d   : > { %1510 = vmatmul.mubr.bf16.vlgmr.msra.gmra.mxu1 %v928_v48 }
  0xec   : > { %v1411_v57 = vpop.f32.mrf.mxu0 }
  0xed   : > { %v1435_v58 = vpop.f32.mrf.mxu1 }
  0xee   : > { %v354_v59 = vpop.f32.mrf.mxu0  ;;  %v485_v23 = vadd.f32 %v1435_v58, %v1411_v57 }
  0xef   : > { %v476_v60 = vpop.f32.mrf.mxu1 }
  0xf0   : > { %v1412_v61 = vpop.f32.mrf.mxu0  ;;  %v477_v25 = vadd.f32 %v476_v60, %v354_v59 }
  0xf1   : > { %v1436_v62 = vpop.f32.mrf.mxu1 }
  0xf2   : > { %v357_v63 = vpop.f32.mrf.mxu0  ;;  %v488_v29 = vadd.f32 %v1436_v62, %v1412_v61  ;;  %v1112_v62 = vld [vmem:[%s1806_s29 + $0x18] sm:$0x1] }
  0xf3   : > { %v479_v0 = vpop.f32.mrf.mxu1 }
  0xf4   : > { %v1415_v1 = vpop.f32.mrf.mxu0  ;;  %v480_v33 = vadd.f32 %v479_v0, %v357_v63 }
  0xf5   : > { %v1439_v2 = vpop.f32.mrf.mxu1 }
  0xf6   : > { %v370_v3 = vpop.f32.mrf.mxu0  ;;  %v501_v24 = vadd.f32 %v1439_v2, %v1415_v1 }
  0xf7   : > { %v492_v4 = vpop.f32.mrf.mxu1 }
  0xf8   : > { %v1416_v5 = vpop.f32.mrf.mxu0  ;;  %v493_v27 = vadd.f32 %v492_v4, %v370_v3 }
  0xf9   : > { %v1440_v6 = vpop.f32.mrf.mxu1 }
  0xfa   : > { %v373_v7 = vpop.f32.mrf.mxu0 }
  0xfb   : > { %v495_v8 = vpop.f32.mrf.mxu1 }
  0xfc   : > { %v496_v37 = vadd.f32 %v495_v8, %v373_v7 }
 0x10c   : > { %v1459_v9 = vpop.f32.mrf.mxu0 }
 0x10d   : > { %v1483_v10 = vpop.f32.mrf.mxu1  ;;  %v674_v26 = vadd.f32 %v1459_v9, %v485_v23 }
 0x10e   : > { %v642_v11 = vpop.f32.mrf.mxu0 }
 0x10f   : > { %v843_v12 = vpop.f32.mrf.mxu1  ;;  %v672_v30 = vadd.f32 %v642_v11, %v477_v25  ;;  %v875_v34 = vadd.f32 %v1483_v10, %v674_v26 }
 0x110   : > { %v1460_v13 = vpop.f32.mrf.mxu0 }
 0x111   : > { %v1484_v14 = vpop.f32.mrf.mxu1  ;;  %v675_v35 = vadd.f32 %v1460_v13, %v488_v29  ;;  %v873_v40 = vadd.f32 %v843_v12, %v672_v30 }
 0x112   : > { %v645_v15 = vpop.f32.mrf.mxu0 }
 0x113   : > { %v846_v16 = vpop.f32.mrf.mxu1  ;;  %v673_v41 = vadd.f32 %v645_v15, %v480_v33  ;;  %v876_v49 = vadd.f32 %v1484_v14, %v675_v35 }
 0x114   : > { %v1463_v17 = vpop.f32.mrf.mxu0 }
 0x115   : > { %v1487_v18 = vpop.f32.mrf.mxu1  ;;  %v678_v28 = vadd.f32 %v1463_v17, %v501_v24  ;;  %v874_v55 = vadd.f32 %v846_v16, %v673_v41 }
 0x116   : > { %v658_v19 = vpop.f32.mrf.mxu0 }
 0x117   : > { %v859_v20 = vpop.f32.mrf.mxu1  ;;  %v676_v31 = vadd.f32 %v658_v19, %v493_v27  ;;  %v879_v38 = vadd.f32 %v1487_v18, %v678_v28 }
 0x118   : > { %v1464_v21 = vpop.f32.mrf.mxu0 }
 0x119   : > { %v1488_v22 = vpop.f32.mrf.mxu1  ;;  %v877_v45 = vadd.f32 %v859_v20, %v676_v31 }
 0x11a   : > { %v661_v32 = vpop.f32.mrf.mxu0 }
 0x11b   : > { %v862_v36 = vpop.f32.mrf.mxu1  ;;  %v677_v46 = vadd.f32 %v661_v32, %v496_v37 }
 0x11d   : > { %v878_v59 = vadd.f32 %v862_v36, %v677_v46 }
 0x12c   : > { %v1507_v39 = vpop.f32.mrf.mxu0 }
 0x12d   : > { %v1048_v42 = vadd.f32 %v1507_v39, %v875_v34  ;;  %v1511_v44 = vpop.f32.mrf.mxu1 }
 0x12e   : > { %v1052_v47 = vadd.f32 %v1511_v44, %v879_v38  ;;  %v1016_v48 = vpop.f32.mrf.mxu0 }
 0x12f   : > { %v1046_v50 = vadd.f32 %v1016_v48, %v873_v40  ;;  %v1032_v51 = vpop.f32.mrf.mxu1  ;;  %v1062_v56 = vadd.f32 %v1299_v43, %v1048_v42 }
 0x130   : > { %v1066_v52 = vadd.f32 %v1299_v43, %v1052_v47  ;;  %v1050_v53 = vadd.f32 %v1032_v51, %v877_v45  ;;  %v1508_v54 = vpop.f32.mrf.mxu0 }
 0x131   : > { %v1049_v57 = vadd.f32 %v1508_v54, %v876_v49  ;;  %v1512_v58 = vpop.f32.mrf.mxu1  ;;  %v1060_v63 = vadd.f32 %v1299_v43, %v1046_v50  ;;  %v1069_v6 = vmax.f32 %v1062_v56, 0.0 }
 0x132   : > { %v1073_v60 = vmax.f32 %v1066_v52, 0.0  ;;  %v1019_v61 = vpop.f32.mrf.mxu0  ;;  %v1064_v4 = vadd.f32 %v1299_v43, %v1050_v53 }
 0x133   : > { %v1063_v0 = vadd.f32 %v1299_v43, %v1049_v57  ;;  %v1047_v1 = vadd.f32 %v1019_v61, %v874_v55  ;;  %v1035_v2 = vpop.f32.mrf.mxu1  ;;  %v1067_v11 = vmax.f32 %v1060_v63, 0.0 }
 0x134   : > { %v1315_v3 = vpack.c.bf16 %v1073_v60, %v1073_v60  ;;  %v1051_v5 = vadd.f32 %v1035_v2, %v878_v59  ;;  %v1071_v14 = vmax.f32 %v1064_v4, 0.0 }
 0x135   : > { %v1070_v7 = vmax.f32 %v1063_v0, 0.0  ;;  %v1061_v8 = vadd.f32 %v1299_v43, %v1047_v1 }
 0x136   : > { %v1113_v9 = vsel %vm1111_vm6, %v1315_v3, %v1112_v62  ;;  %v1065_v10 = vadd.f32 %v1299_v43, %v1051_v5 }
 0x137   : > { %1114 = vst [vmem:[%s1806_s29 + $0x18] sm:$0x1] %v1113_v9  ;;  %v1324_v12 = vpack.c.bf16 %v1070_v7, %v1069_v6  ;;  %v1068_v13 = vmax.f32 %v1061_v8, 0.0 }
 0x138   : > { %v1072_v15 = vmax.f32 %v1065_v10, 0.0 }
 0x139   : > { %1331 = vst [vmem:[%s1806_s29 + $0x8] sm:$0xff] %v1324_v12   ;;  %v1319_v16 = vpack.c.bf16 %v1068_v13, %v1067_v11 }
 0x13a   : > { %v1329_v17 = vpack.c.bf16 %v1072_v15, %v1071_v14 }
 0x13b   : > { %1320 = vst [vmem:[%s1806_s29] sm:$0xff] %v1319_v16  }
 0x13c   : > { %1332 = vst [vmem:[%s1806_s29 + $0x10] sm:$0xff] %v1329_v17  }
 0x13d PF: > { %s13_s12 = sadd.s32 1, %s1603_s12  }
 0x13e   : > { %p10_p4 = scmp.ge.s32.totalorder %s13_s12, 4  }
 0x140   :  { %12 = sbr.rel (!%p10_p4) target bundleno = 1 (0x1), region = 66 }

// kernel: quantized_alexnet_forward.7
= control target key start
LH: loop header
LB: loop body
LE: loop exit
PB: predicated region body
PF: predicated region fallthrough
CT: control target
= control target key end

     0   :  { %s836_s12 = smov 0   ;;  %s970_s0 = inlined_call_operand.vmem [shape: bf16[2,15,128], index: 0, kind: input, shape index: {}]   ;;  %s971_s1 = inlined_call_operand.vmem [shape: bf16[3,128,128], index: 1, kind: input, shape index: {}]   ;;  %s972_s2 = inlined_call_operand.vmem [shape: f32[1,128], index: 2, kind: input, shape index: {}]   ;;  %s973_s3 = inlined_call_operand.vmem [shape: bf16[2,9,128], index: 3, kind: output, shape index: {}]  }
   0x1 LB: > { %s605_s13 = sadd.s32 4294967295, %s812_s12   ;;  %p609_p0 = scmp.ge.s32.totalorder %s812_s12, 1  ;;  %s812_s12 = sphi %s836_s12, %s13_s12  }
   0x2   : > { %p137_p1 = scmp.lt.s32.totalorder %s812_s12, 3 }
   0x4   : > { %p138_p2 = pnand %p609_p0, %p137_p1 }
   0x5   : > { %p161_p3 = scmp.lt.s32.totalorder (!%p138_p2), %s605_s13, 1 }
   0x6   : > { %141 = sbr.rel (%p138_p2) target bundleno = 283 (0x11b), region = 32 }
   0xb   : > { %v779_v0 = vld [vmem:[%s971_s1 + $0x78] sm:$0xff]   ;;  %v814_v1 = vmov 0.0   ;;  %v781_v3 = vld [vmem:[%s971_s1 + $0x70] sm:$0xff]   ;;  %vm815_vm0 = vmmov 0   ;;  %v783_v5 = vld [vmem:[%s971_s1 + $0x68] sm:$0xff]   ;;  %s975_s13 = smov (!%p161_p3, %s605_s13), 1 }
   0xc   : > { %709 = vmatprep.subr.bf16.mxu0 %v814_v1  ;;  %729 = vmatprep.subr.bf16.mxu1 %v814_v1  ;;  %v780_v2 = vld [vmem:[%s971_s1 + $0x38] sm:$0xff]   ;;  %v782_v4 = vld [vmem:[%s971_s1 + $0x30] sm:$0xff]   ;;  %v784_v6 = vld [vmem:[%s971_s1 + $0x28] sm:$0xff]   ;;  %s678_s28 = sshll.u32 %s975_s13, 3  ;;  %vm544_vm1 = vcmask 1040384  }
   0xd   : > { %710 = vmatpush3.bf16.msra.mxu0 %v779_v0  ;;  %725 = vmatprep.mubr.msk.bf16.mxu0 %vm815_vm0, %v814_v1  ;;  %v785_v7 = vld [vmem:[%s971_s1 + $0x60] sm:$0xff]   ;;  %s888_s6 = scalar_lea.vmem %s970_s0, %s678_s28  ;;  %v787_v9 = vld [vmem:[%s971_s1 + $0x58] sm:$0xff]   ;;  %v789_v12 = vld [vmem:[%s971_s1 + $0x50] sm:$0xff]   ;;  %s170_s21 = scalar_lea.vmem %s973_s3, %s678_s28  ;;  %vm545_vm2 = vsmask.f32 256 }
   0xe   : > { %730 = vmatpush3.bf16.msra.mxu1 %v780_v2  ;;  %711 = vmatprep.subr.bf16.mxu0 %v814_v1  ;;  %v786_v8 = vld [vmem:[%s971_s1 + $0x20] sm:$0xff]   ;;  %v788_v10 = vld [vmem:[%s971_s1 + $0x18] sm:$0xff]   ;;  %v790_v13 = vld [vmem:[%s971_s1 + $0x10] sm:$0xff]  }
   0xf   : > { %731 = vmatprep.subr.bf16.mxu1 %v814_v1  ;;  %745 = vmatprep.mubr.msk.bf16.mxu1 %vm815_vm0, %v814_v1  ;;  %v795_v11 = vld [vmem:[%s888_s6] sm:$0x3e]   ;;  %v791_v16 = vld [vmem:[%s971_s1 + $0x48] sm:$0xff]   ;;  %v797_v24 = vld [vmem:[%s971_s1 + $0xb8] sm:$0xff]  }
  0x10   : > { %v215_v14 = vshrl.u32 %v795_v11, 16  ;;  %v218_v15 = vshll.u32 %v795_v11, 16  ;;  %v792_v17 = vld [vmem:[%s971_s1 + $0x8] sm:$0xff]   ;;  %v793_v20 = vld [vmem:[%s971_s1 + $0x40] sm:$0xff]   ;;  %v798_v25 = vld [vmem:[%s971_s1 + $0xb0] sm:$0xff]  }
  0x11   : > { %712 = vmatpush3.bf16.msra.mxu0 %v781_v3  ;;  %v794_v21 = vld [vmem:[%s971_s1] sm:$0xff]   ;;  %v799_v26 = vld [vmem:[%s971_s1 + $0xa8] sm:$0xff]   ;;  %v801_v28 = vld [vmem:[%s971_s1 + $0x98] sm:$0xff]  }
  0x12   : > { %732 = vmatpush3.bf16.msra.mxu1 %v782_v4  ;;  %713 = vmatprep.subr.bf16.mxu0 %v814_v1  ;;  %v217_v18 = vrot.slane %v215_v14, 1  ;;  %v220_v19 = vrot.slane %v218_v15, 2  ;;  %v796_v23 = vld [vmem:[%s888_s6] sm:$0x1f]   ;;  %v802_v29 = vld [vmem:[%s971_s1 + $0x90] sm:$0xff]   ;;  %v803_v30 = vld [vmem:[%s971_s1 + $0x88] sm:$0xff]  }
  0x13   : > { %733 = vmatprep.subr.bf16.mxu1 %v814_v1  ;;  %v800_v27 = vld [vmem:[%s971_s1 + $0xa0] sm:$0xff]   ;;  %vm546_vm3 = vmand %vm544_vm1, %vm545_vm2 }
  0x14   : > { %v221_v22 = vor.u32 %v220_v19, %v217_v18  ;;  %v805_v31 = vld [vmem:[%s888_s6] sm:$0xf8]   ;;  %v673_v44 = vld [vmem:[%s972_s2] ss:$0 sm:$0xff] }
  0x15   : > { %714 = vmatpush3.bf16.msra.mxu0 %v783_v5  ;;  %v804_v32 = vld [vmem:[%s971_s1 + $0x80] sm:$0xff]   ;;  %v431_v33 = vrot.slane %v805_v31, 3 }
  0x16   : > { %734 = vmatpush3.bf16.msra.mxu1 %v784_v6  ;;  %715 = vmatprep.subr.bf16.mxu0 %v814_v1  ;;  %v547_v56 = vld [vmem:[%s170_s21 + $0x4] sm:$0x1] }
  0x17   : > { %735 = vmatprep.subr.bf16.mxu1 %v814_v1 }
  0x19   : > { %716 = vmatpush3.bf16.msra.mxu0 %v785_v7 }
  0x1a   : > { %736 = vmatpush3.bf16.msra.mxu1 %v786_v8  ;;  %717 = vmatprep.subr.bf16.mxu0 %v814_v1 }
  0x1b   : > { %737 = vmatprep.subr.bf16.mxu1 %v814_v1 }
  0x1d   : > { %718 = vmatpush3.bf16.msra.mxu0 %v787_v9 }
  0x1e   : > { %738 = vmatpush3.bf16.msra.mxu1 %v788_v10  ;;  %719 = vmatprep.subr.bf16.mxu0 %v814_v1 }
  0x1f   : > { %739 = vmatprep.subr.bf16.mxu1 %v814_v1 }
  0x21   : > { %720 = vmatpush3.bf16.msra.mxu0 %v789_v12 }
  0x22   : > { %740 = vmatpush3.bf16.msra.mxu1 %v790_v13  ;;  %721 = vmatprep.subr.bf16.mxu0 %v814_v1 }
  0x23   : > { %741 = vmatprep.subr.bf16.mxu1 %v814_v1 }
  0x25   : > { %722 = vmatpush3.bf16.msra.mxu0 %v791_v16 }
  0x26   : > { %742 = vmatpush3.bf16.msra.mxu1 %v792_v17  ;;  %723 = vmatprep.subr.bf16.mxu0 %v814_v1 }
  0x27   : > { %743 = vmatprep.subr.bf16.mxu1 %v814_v1 }
  0x29   : > { %724 = vmatpush3.bf16.msra.mxu0 %v793_v20 }
  0x2a   : > { %744 = vmatpush3.bf16.msra.mxu1 %v794_v21  ;;  %749 = vmatprep.subr.bf16.mxu0 %v814_v1 }
  0x2c   : > { %726 = vmatmul.mubr.bf16.vlgmr.msra.gmra.mxu0 %v221_v22 }
  0x2d   : > { %746 = vmatmul.mubr.bf16.vlgmr.msra.gmra.mxu1 %v796_v23  ;;  %750 = vmatpush3.bf16.msra.mxu0 %v797_v24 }
  0x2e   : > { %751 = vmatprep.subr.bf16.mxu0 %v814_v1  ;;  %765 = vmatprep.mubr.msk.bf16.mxu0 %vm815_vm0, %v814_v1 }
  0x31   : > { %752 = vmatpush3.bf16.msra.mxu0 %v798_v25 }
  0x32   : > { %753 = vmatprep.subr.bf16.mxu0 %v814_v1 }
  0x35   : > { %754 = vmatpush3.bf16.msra.mxu0 %v799_v26 }
  0x36   : > { %755 = vmatprep.subr.bf16.mxu0 %v814_v1 }
  0x39   : > { %756 = vmatpush3.bf16.msra.mxu0 %v800_v27 }
  0x3a   : > { %757 = vmatprep.subr.bf16.mxu0 %v814_v1 }
  0x3d   : > { %758 = vmatpush3.bf16.msra.mxu0 %v801_v28 }
  0x3e   : > { %759 = vmatprep.subr.bf16.mxu0 %v814_v1 }
  0x41   : > { %760 = vmatpush3.bf16.msra.mxu0 %v802_v29 }
  0x42   : > { %761 = vmatprep.subr.bf16.mxu0 %v814_v1 }
  0x45   : > { %762 = vmatpush3.bf16.msra.mxu0 %v803_v30 }
  0x46   : > { %763 = vmatprep.subr.bf16.mxu0 %v814_v1 }
  0x49   : > { %764 = vmatpush3.bf16.msra.mxu0 %v804_v32 }
  0x4c   : > { %766 = vmatmul.mubr.bf16.vlgmr.msra.gmra.mxu0 %v431_v33 }
  0xec   : > { %v305_v34 = vpop.f32.mrf.mxu0 }
  0xed   : > { %v400_v35 = vpop.f32.mrf.mxu1 }
  0xee   : > { %v727_v36 = vpop.f32.mrf.mxu0  ;;  %v401_v42 = vadd.f32 %v400_v35, %v305_v34 }
  0xef   : > { %v747_v37 = vpop.f32.mrf.mxu1 }
  0xf0   : > { %v308_v38 = vpop.f32.mrf.mxu0 }
  0xf1   : > { %v403_v39 = vpop.f32.mrf.mxu1 }
  0xf2   : > { %v728_v40 = vpop.f32.mrf.mxu0  ;;  %v404_v47 = vadd.f32 %v403_v39, %v308_v38 }
  0xf3   : > { %v748_v41 = vpop.f32.mrf.mxu1 }
 0x10c   : > { %v515_v43 = vpop.f32.mrf.mxu0 }
 0x10d   : > { %v522_v45 = vadd.f32 %v515_v43, %v401_v42 }
 0x10e   : > { %v767_v46 = vpop.f32.mrf.mxu0 }
 0x10f   : > { %v531_v48 = vadd.f32 %v673_v44, %v522_v45 }
 0x110   : > { %v518_v49 = vpop.f32.mrf.mxu0 }
 0x111   : > { %v533_v50 = vmax.f32 %v531_v48, 0.0  ;;  %v523_v51 = vadd.f32 %v518_v49, %v404_v47 }
 0x112   : > { %v768_v52 = vpop.f32.mrf.mxu0 }
 0x113   : > { %v680_v53 = vpack.c.bf16 %v533_v50, %v533_v50  ;;  %v532_v54 = vadd.f32 %v673_v44, %v523_v51 }
 0x115   : > { %543 = vst [vmem:[%s170_s21] sm:$0xf] %v680_v53  ;;  %v534_v55 = vmax.f32 %v532_v54, 0.0 }
 0x117   : > { %v681_v57 = vpack.c.bf16 %v534_v55, %v534_v55 }
 0x119   : > { %v548_v58 = vsel %vm546_vm3, %v681_v57, %v547_v56 }
 0x11a   : > { %549 = vst [vmem:[%s170_s21 + $0x4] sm:$0x1] %v548_v58 }
 0x11b PF: > { %s13_s12 = sadd.s32 1, %s812_s12  }
 0x11c   : > { %p10_p4 = scmp.ge.s32.totalorder %s13_s12, 4  }
 0x11e   :  { %12 = sbr.rel (!%p10_p4) target bundleno = 1 (0x1), region = 64 }

// kernel: quantized_alexnet_forward.8
= control target key start
LH: loop header
LB: loop body
LE: loop exit
PB: predicated region body
PF: predicated region fallthrough
CT: control target
= control target key end

     0   :  { %s1113_s12 = smov 0   ;;  %s1293_s0 = inlined_call_operand.vmem [shape: bf16[2,15,256], index: 0, kind: input, shape index: {}]   ;;  %s1294_s1 = inlined_call_operand.vmem [shape: bf16[3,256,128], index: 1, kind: input, shape index: {}]   ;;  %s1295_s2 = inlined_call_operand.vmem [shape: f32[1,128], index: 2, kind: input, shape index: {}]   ;;  %s1296_s3 = inlined_call_operand.vmem [shape: bf16[2,9,128], index: 3, kind: output, shape index: {}]  }
   0x1 LB: > { %s818_s13 = sadd.s32 4294967295, %s1091_s12   ;;  %p822_p0 = scmp.ge.s32.totalorder %s1091_s12, 1  ;;  %s1091_s12 = sphi %s1113_s12, %s13_s12  }
   0x2   : > { %p137_p1 = scmp.lt.s32.totalorder %s1091_s12, 3 }
   0x4   : > { %p138_p2 = pnand %p822_p0, %p137_p1 }
   0x5   : > { %p161_p3 = scmp.lt.s32.totalorder (!%p138_p2), %s818_s13, 1 }
   0x6   : > { %141 = sbr.rel (%p138_p2) target bundleno = 288 (0x120), region = 32 }
   0xb   : > { %v1028_v0 = vld [vmem:[%s1294_s1 + $0xf8] sm:$0xff]   ;;  %v1032_v4 = vld [vmem:[%s1294_s1 + $0xf0] sm:$0xff]   ;;  %v1036_v8 = vld [vmem:[%s1294_s1 + $0xe8] sm:$0xff]   ;;  %s1298_s13 = smov (!%p161_p3, %s818_s13), 1  ;;  %vm757_vm0 = vcmask 1040384  }
   0xc   : > { %v1029_v1 = vld [vmem:[%s1294_s1 + $0x78] sm:$0xff]   ;;  %954 = vmatprep.subr.bf16.mxu0 %v1028_v0  ;;  %v1033_v5 = vld [vmem:[%s1294_s1 + $0x70] sm:$0xff]   ;;  %v1037_v9 = vld [vmem:[%s1294_s1 + $0x68] sm:$0xff]   ;;  %s950_s20 = sshll.u32 %s1298_s13, 4  ;;  %s951_s16 = sshll.u32 %s1298_s13, 3 }
   0xd   : > { %v1030_v2 = vld [vmem:[%s1294_s1 + $0xb8] sm:$0xff]   ;;  %976 = vmatprep.subr.bf16.mxu1 %v1029_v1  ;;  %v1034_v6 = vld [vmem:[%s1294_s1 + $0xb0] sm:$0xff]   ;;  %v1038_v10 = vld [vmem:[%s1294_s1 + $0xa8] sm:$0xff]   ;;  %s1224_s29 = scalar_lea.vmem %s1293_s0, %s950_s20  ;;  %s170_s19 = scalar_lea.vmem %s1296_s3, %s951_s16  ;;  %vm758_vm1 = vsmask.f32 256 }
   0xe   : > { %v1031_v3 = vld [vmem:[%s1294_s1 + $0x38] sm:$0xff]   ;;  %955 = vmatpush3.bf16.msra.mxu0 %v1030_v2  ;;  %v1035_v7 = vld [vmem:[%s1294_s1 + $0x30] sm:$0xff]   ;;  %v1039_v11 = vld [vmem:[%s1294_s1 + $0x28] sm:$0xff]  }
   0xf   : > { %977 = vmatpush3.bf16.msra.mxu1 %v1031_v3  ;;  %956 = vmatprep.subr.bf16.mxu0 %v1032_v4  ;;  %v1040_v12 = vld [vmem:[%s1294_s1 + $0xe0] sm:$0xff]   ;;  %v1044_v16 = vld [vmem:[%s1294_s1 + $0xd8] sm:$0xff]   ;;  %v1048_v20 = vld [vmem:[%s1294_s1 + $0xd0] sm:$0xff]  }
  0x10   : > { %978 = vmatprep.subr.bf16.mxu1 %v1033_v5  ;;  %v1041_v13 = vld [vmem:[%s1294_s1 + $0x60] sm:$0xff]   ;;  %v1045_v17 = vld [vmem:[%s1294_s1 + $0x58] sm:$0xff]   ;;  %v1049_v21 = vld [vmem:[%s1294_s1 + $0x50] sm:$0xff]  }
  0x11   : > { %v1042_v14 = vld [vmem:[%s1294_s1 + $0xa0] sm:$0xff]   ;;  %v1046_v18 = vld [vmem:[%s1294_s1 + $0x98] sm:$0xff]   ;;  %v1050_v22 = vld [vmem:[%s1294_s1 + $0x90] sm:$0xff]  }
  0x12   : > { %957 = vmatpush3.bf16.msra.mxu0 %v1034_v6  ;;  %v1043_v15 = vld [vmem:[%s1294_s1 + $0x20] sm:$0xff]   ;;  %v1047_v19 = vld [vmem:[%s1294_s1 + $0x18] sm:$0xff]   ;;  %v1051_v23 = vld [vmem:[%s1294_s1 + $0x10] sm:$0xff]  }
  0x13   : > { %979 = vmatpush3.bf16.msra.mxu1 %v1035_v7  ;;  %958 = vmatprep.subr.bf16.mxu0 %v1036_v8  ;;  %v1052_v24 = vld [vmem:[%s1294_s1 + $0xc8] sm:$0xff]   ;;  %v1056_v28 = vld [vmem:[%s1294_s1 + $0xc0] sm:$0xff]   ;;  %v1066_v35 = vld [vmem:[%s1294_s1 + $0x178] sm:$0xff]  }
  0x14   : > { %980 = vmatprep.subr.bf16.mxu1 %v1037_v9  ;;  %v1053_v25 = vld [vmem:[%s1294_s1 + $0x48] sm:$0xff]   ;;  %v1057_v29 = vld [vmem:[%s1294_s1 + $0x40] sm:$0xff]   ;;  %v1067_v45 = vld [vmem:[%s1294_s1 + $0x138] sm:$0xff]  }
  0x15   : > { %v1054_v26 = vld [vmem:[%s1294_s1 + $0x88] sm:$0xff]   ;;  %v1058_v30 = vld [vmem:[%s1294_s1 + $0x80] sm:$0xff]   ;;  %v1068_v48 = vld [vmem:[%s1294_s1 + $0x170] sm:$0xff]  }
  0x16   : > { %959 = vmatpush3.bf16.msra.mxu0 %v1038_v10  ;;  %v1055_v27 = vld [vmem:[%s1294_s1 + $0x8] sm:$0xff]   ;;  %v1059_v31 = vld [vmem:[%s1294_s1] sm:$0xff]   ;;  %v1069_v49 = vld [vmem:[%s1294_s1 + $0x130] sm:$0xff]  }
  0x17   : > { %981 = vmatpush3.bf16.msra.mxu1 %v1039_v11  ;;  %960 = vmatprep.subr.bf16.mxu0 %v1040_v12  ;;  %v1060_v32 = vld [vmem:[%s1224_s29] ss:$8 sps:$4 sm:$0x3e]   ;;  %v1062_v33 = vld [vmem:[%s1224_s29 + $0x4] ss:$8 sps:$4 sm:$0x3e]   ;;  %vm759_vm2 = vmand %vm757_vm0, %vm758_vm1 }
  0x18   : > { %982 = vmatprep.subr.bf16.mxu1 %v1041_v13  ;;  %v1063_v34 = vld [vmem:[%s1224_s29] ss:$8 sps:$4 sm:$0x1f]   ;;  %v258_v36 = vshrl.u32 %v1062_v33, 16  ;;  %v261_v37 = vshll.u32 %v1062_v33, 16  ;;  %v250_v39 = vshrl.u32 %v1060_v32, 16 }
  0x19   : > { %v1065_v38 = vld [vmem:[%s1224_s29 + $0x4] ss:$8 sps:$4 sm:$0x1f]   ;;  %v253_v40 = vshll.u32 %v1060_v32, 16  ;;  %v1074_v54 = vld [vmem:[%s1294_s1 + $0x158] sm:$0xff]   ;;  %v1076_v58 = vld [vmem:[%s1294_s1 + $0x150] sm:$0xff]  }
  0x1a   : > { %961 = vmatpush3.bf16.msra.mxu0 %v1042_v14  ;;  %v260_v41 = vrot.slane %v258_v36, 1  ;;  %v263_v42 = vrot.slane %v261_v37, 2  ;;  %542 = vmatprep.mubr.bf16.mxu1 %v1065_v38  ;;  %v252_v43 = vrot.slane %v250_v39, 1  ;;  %v1070_v50 = vld [vmem:[%s1294_s1 + $0x168] sm:$0xff]   ;;  %v1072_v52 = vld [vmem:[%s1294_s1 + $0x160] sm:$0xff]   ;;  %v1075_v56 = vld [vmem:[%s1294_s1 + $0x118] sm:$0xff]  }
  0x1b   : > { %983 = vmatpush3.bf16.msra.mxu1 %v1043_v15  ;;  %962 = vmatprep.subr.bf16.mxu0 %v1044_v16  ;;  %v255_v44 = vrot.slane %v253_v40, 2  ;;  %v1071_v51 = vld [vmem:[%s1294_s1 + $0x128] sm:$0xff]   ;;  %v1073_v53 = vld [vmem:[%s1294_s1 + $0x120] sm:$0xff]   ;;  %v1077_v59 = vld [vmem:[%s1294_s1 + $0x110] sm:$0xff]  }
  0x1c   : > { %984 = vmatprep.subr.bf16.mxu1 %v1045_v17  ;;  %v264_v46 = vor.u32 %v263_v42, %v260_v41  ;;  %v1084_v55 = vld [vmem:[%s1224_s29 + $0x4] ss:$8 sps:$4 sm:$0xf8]   ;;  %v1082_v63 = vld [vmem:[%s1224_s29] ss:$8 sps:$4 sm:$0xf8]  }
  0x1d   : > { %v256_v47 = vor.u32 %v255_v44, %v252_v43  ;;  %v595_v57 = vrot.slane %v1084_v55, 3  ;;  %v1078_v60 = vld [vmem:[%s1294_s1 + $0x148] sm:$0xff]   ;;  %v1080_v62 = vld [vmem:[%s1294_s1 + $0x140] sm:$0xff]   ;;  %v594_v1 = vrot.slane %v1082_v63, 3 }
  0x1e   : > { %963 = vmatpush3.bf16.msra.mxu0 %v1046_v18  ;;  %395 = vmatprep.mubr.bf16.mxu0 %v264_v46  ;;  %v1079_v61 = vld [vmem:[%s1294_s1 + $0x108] sm:$0xff]   ;;  %v1081_v0 = vld [vmem:[%s1294_s1 + $0x100] sm:$0xff]  }
  0x1f   : > { %985 = vmatpush3.bf16.msra.mxu1 %v1047_v19  ;;  %964 = vmatprep.subr.bf16.mxu0 %v1048_v20  ;;  %v945_v18 = vld [vmem:[%s1295_s2] ss:$0 sm:$0xff] }
  0x20   : > { %986 = vmatprep.subr.bf16.mxu1 %v1049_v21 }
  0x22   : > { %965 = vmatpush3.bf16.msra.mxu0 %v1050_v22 }
  0x23   : > { %987 = vmatpush3.bf16.msra.mxu1 %v1051_v23  ;;  %966 = vmatprep.subr.bf16.mxu0 %v1052_v24 }
  0x24   : > { %988 = vmatprep.subr.bf16.mxu1 %v1053_v25 }
  0x26   : > { %967 = vmatpush3.bf16.msra.mxu0 %v1054_v26 }
  0x27   : > { %989 = vmatpush3.bf16.msra.mxu1 %v1055_v27  ;;  %968 = vmatprep.subr.bf16.mxu0 %v1056_v28 }
  0x28   : > { %990 = vmatprep.subr.bf16.mxu1 %v1057_v29 }
  0x2a   : > { %969 = vmatpush3.bf16.msra.mxu0 %v1058_v30  ;;  %v760_v30 = vld [vmem:[%s170_s19 + $0x4] sm:$0x1] }
  0x2b   : > { %991 = vmatpush3.bf16.msra.mxu1 %v1059_v31  ;;  %998 = vmatprep.subr.bf16.mxu0 %v1066_v35 }
  0x2d   : > { %396 = vmatmul.mubr.bf16.vlgmr.msra.gmra.mxu0 %v256_v47 }
  0x2e   : > { %543 = vmatmul.mubr.bf16.vlgmr.msra.gmra.mxu1 %v1063_v34  ;;  %999 = vmatpush3.bf16.msra.mxu0 %v1067_v45 }
  0x2f   : > { %1000 = vmatprep.subr.bf16.mxu0 %v1068_v48  ;;  %726 = vmatprep.mubr.bf16.mxu0 %v595_v57 }
  0x32   : > { %1001 = vmatpush3.bf16.msra.mxu0 %v1069_v49 }
  0x33   : > { %1002 = vmatprep.subr.bf16.mxu0 %v1070_v50 }
  0x36   : > { %1003 = vmatpush3.bf16.msra.mxu0 %v1071_v51 }
  0x37   : > { %1004 = vmatprep.subr.bf16.mxu0 %v1072_v52 }
  0x3a   : > { %1005 = vmatpush3.bf16.msra.mxu0 %v1073_v53 }
  0x3b   : > { %1006 = vmatprep.subr.bf16.mxu0 %v1074_v54 }
  0x3e   : > { %1007 = vmatpush3.bf16.msra.mxu0 %v1075_v56 }
  0x3f   : > { %1008 = vmatprep.subr.bf16.mxu0 %v1076_v58 }
  0x42   : > { %1009 = vmatpush3.bf16.msra.mxu0 %v1077_v59 }
  0x43   : > { %1010 = vmatprep.subr.bf16.mxu0 %v1078_v60 }
  0x46   : > { %1011 = vmatpush3.bf16.msra.mxu0 %v1079_v61 }
  0x47   : > { %1012 = vmatprep.subr.bf16.mxu0 %v1080_v62 }
  0x4a   : > { %1013 = vmatpush3.bf16.msra.mxu0 %v1081_v0 }
  0x4d   : > { %727 = vmatmul.mubr.bf16.vlgmr.msra.gmra.mxu0 %v594_v1 }
  0xed   : > { %v970_v2 = vpop.f32.mrf.mxu0 }
  0xee   : > { %v992_v3 = vpop.f32.mrf.mxu1 }
  0xef   : > { %v971_v4 = vpop.f32.mrf.mxu0 }
  0xf0   : > { %v993_v5 = vpop.f32.mrf.mxu1  ;;  %v972_v9 = vadd.f32 %v971_v4, %v970_v2 }
  0xf1   : > { %v973_v6 = vpop.f32.mrf.mxu0  ;;  %v994_v10 = vadd.f32 %v993_v5, %v992_v3 }
  0xf2   : > { %v995_v7 = vpop.f32.mrf.mxu1 }
  0xf3   : > { %v974_v8 = vpop.f32.mrf.mxu0  ;;  %v545_v14 = vadd.f32 %v994_v10, %v972_v9 }
  0xf4   : > { %v996_v11 = vpop.f32.mrf.mxu1  ;;  %v975_v15 = vadd.f32 %v974_v8, %v973_v6 }
  0xf5   : > { %v997_v16 = vadd.f32 %v996_v11, %v995_v7 }
  0xf7   : > { %v548_v22 = vadd.f32 %v997_v16, %v975_v15 }
 0x10d   : > { %v1014_v12 = vpop.f32.mrf.mxu0 }
 0x10f   : > { %v1015_v13 = vpop.f32.mrf.mxu0 }
 0x110   : > { %v1016_v17 = vadd.f32 %v1015_v13, %v1014_v12 }
 0x111   : > { %v1017_v19 = vpop.f32.mrf.mxu0 }
 0x112   : > { %v735_v20 = vadd.f32 %v1016_v17, %v545_v14 }
 0x113   : > { %v1018_v21 = vpop.f32.mrf.mxu0 }
 0x114   : > { %v744_v23 = vadd.f32 %v945_v18, %v735_v20  ;;  %v1019_v24 = vadd.f32 %v1018_v21, %v1017_v19 }
 0x116   : > { %v746_v25 = vmax.f32 %v744_v23, 0.0  ;;  %v736_v26 = vadd.f32 %v1019_v24, %v548_v22 }
 0x118   : > { %v952_v27 = vpack.c.bf16 %v746_v25, %v746_v25  ;;  %v745_v28 = vadd.f32 %v945_v18, %v736_v26 }
 0x11a   : > { %756 = vst [vmem:[%s170_s19] sm:$0xf] %v952_v27  ;;  %v747_v29 = vmax.f32 %v745_v28, 0.0 }
 0x11c   : > { %v953_v31 = vpack.c.bf16 %v747_v29, %v747_v29 }
 0x11e   : > { %v761_v32 = vsel %vm759_vm2, %v953_v31, %v760_v30 }
 0x11f   : > { %762 = vst [vmem:[%s170_s19 + $0x4] sm:$0x1] %v761_v32 }
 0x120 PF: > { %s13_s12 = sadd.s32 1, %s1091_s12  }
 0x121   : > { %p10_p4 = scmp.ge.s32.totalorder %s13_s12, 4  }
 0x123   :  { %12 = sbr.rel (!%p10_p4) target bundleno = 1 (0x1), region = 64 }

// kernel: quantized_alexnet_forward.9
= control target key start
LH: loop header
LB: loop body
LE: loop exit
PB: predicated region body
PF: predicated region fallthrough
CT: control target
= control target key end

     0   :  { %14 = vsyncpa [#allocation3], 0  ;;  %s2213_s0 = inlined_call_operand.vmem [shape: bf16[2,15,256], index: 0, kind: input, shape index: {}]   ;;  %s2214_s1 = inlined_call_operand.vmem [shape: bf16[3,256,128], index: 1, kind: input, shape index: {}]   ;;  %s2215_s2 = inlined_call_operand.vmem [shape: f32[1,128], index: 2, kind: input, shape index: {}]   ;;  %s2216_s3 = inlined_call_operand.vmem [shape: bf16[128,128], index: 3, kind: input, shape index: {}]   ;;  %s2217_s4 = inlined_call_operand.vmem [shape: f32[1,128], index: 4, kind: input, shape index: {}]   ;;  %s2218_s5 = inlined_call_operand.vmem [shape: bf16[128,128], index: 5, kind: input, shape index: {}]   ;;  %s2219_s6 = inlined_call_operand.vmem [shape: f32[1,128], index: 6, kind: input, shape index: {}]   ;;  %s2220_s7 = inlined_call_operand.vmem [shape: bf16[128,128], index: 7, kind: input, shape index: {}]   ;;  %s2221_s8 = inlined_call_operand.vmem [shape: f32[1,128], index: 8, kind: input, shape index: {}]   ;;  %s2222_s9 = inlined_call_operand.hbm [shape: f32[2,1,128], index: 9, kind: output, shape index: {}]  }
   0x1   :  { %16 = vsyncpa [#allocation3 + $0x1], 0  ;;  %s1848_s30 = smov 0   ;;  %s1850_s10 = smov 0  }
   0x2   :  { %s1852_s11 = smov 0   ;;  %s1854_s12 = smov 0  }
   0x3 LB: > { %s1869_s13 = sadd.s32 4294967295, %s1793_s12   ;;  %s1305_s14 = sadd.s32 4294967294, %s1793_s12   ;;  %s1793_s12 = sphi %s1854_s12, %s2228_s12   ;;  %s1789_s11 = sphi %s1852_s11, %s2227_s11   ;;  %s1785_s10 = sphi %s1850_s10, %s2226_s10   ;;  %s1781_s30 = sphi %s1848_s30, %s2225_s30  }
   0x4   : > { %s1873_s15 = sadd.s32 1, %s1793_s12   ;;  %s223_s16 = sadd.s32 1, %s1789_s11 }
   0x5   : > { %s220_s17 = ssub.s32 %s1793_s12, %s1873_s15  ;;  %p233_p0 = scmp.ne.s32.totalorder %s1789_s11, %s1785_s10 }
   0x6   : > { %p221_p1 = scmp.eq.s32.totalorder %s220_s17, 0  ;;  %p234_p2 = scmp.eq.s32.totalorder %s1869_s13, 1 }
   0x7   : > { %p239_p3 = scmp.ne.s32.totalorder %s1785_s10, %s1781_s30  ;;  %p240_p4 = scmp.eq.s32.totalorder %s1305_s14, 1 }
   0x8   : > { %s1884_s18 = scalar_select %p221_p1, %s1789_s11, %s223_s16  }
   0x9   : > { %p1886_p5 = por %p234_p2, %p233_p0  ;;  %p1890_p6 = por %p240_p4, %p239_p3 }
   0xa   : > { %p1308_p7 = scmp.ge.s32.totalorder %s1793_s12, 1  ;;  %p290_p8 = scmp.lt.s32.totalorder %s1793_s12, 3 }
   0xc   : > { %p291_p9 = pnand %p1308_p7, %p290_p8 }
   0xd   : > { %p325_p10 = scmp.lt.s32.totalorder (!%p291_p9), %s1869_s13, 1  ;;  %s323_s23 = sand.u32 (!%p291_p9), 1, %s1785_s10  }
   0xe   : > { %294 = sbr.rel (%p291_p9) target bundleno = 916 (0x394), region = 56  ;;  %s1454_s26 = sshll.u32 (!%p291_p9), %s1869_s13, 4 }
   0xf   : > { %s324_s27 = scalar_lea.vmem (!%p291_p9), [#allocation2], %s323_s23  ;;  %s1238_s17 = scalar_lea.sflag (!%p291_p9), [#allocation3], %s323_s23 }
  0x13   : > { %v1652_v0 = vld [vmem:[%s2214_s1 + $0xf8] sm:$0xff]   ;;  %v1656_v4 = vld [vmem:[%s2214_s1 + $0xf0] sm:$0xff]   ;;  %v1660_v8 = vld [vmem:[%s2214_s1 + $0xe8] sm:$0xff]   ;;  %s326_s21 = scalar_select %p325_p10, %s1869_s13, 1  ;;  %vm1796_vm0 = vmmov 0   ;;  %vm907_vm1 = vcmask 1040384  }
  0x14   : > { %v1653_v1 = vld [vmem:[%s2214_s1 + $0x78] sm:$0xff]   ;;  %1458 = vmatprep.subr.bf16.mxu0 %v1652_v0  ;;  %v1657_v5 = vld [vmem:[%s2214_s1 + $0x70] sm:$0xff]   ;;  %v1661_v9 = vld [vmem:[%s2214_s1 + $0x68] sm:$0xff]   ;;  %s1797_s13 = smov [#allocation2]  }
  0x15   : > { %v1654_v2 = vld [vmem:[%s2214_s1 + $0xb8] sm:$0xff]   ;;  %1480 = vmatprep.subr.bf16.mxu1 %v1653_v1  ;;  %v1658_v6 = vld [vmem:[%s2214_s1 + $0xb0] sm:$0xff]   ;;  %v1662_v10 = vld [vmem:[%s2214_s1 + $0xa8] sm:$0xff]   ;;  %s1457_s14 = sshll.u32 %s326_s21, 4  ;;  %s1250_s21 = sshll.u32 %s324_s27, 4  ;;  %s2174_s21 = int_to_ptr.vmem [resolvable:$true] %s1250_s21 }
  0x16   : > { %v1655_v3 = vld [vmem:[%s2214_s1 + $0x38] sm:$0xff]   ;;  %1459 = vmatpush3.bf16.msra.mxu0 %v1654_v2  ;;  %v1659_v7 = vld [vmem:[%s2214_s1 + $0x30] sm:$0xff]   ;;  %v1663_v11 = vld [vmem:[%s2214_s1 + $0x28] sm:$0xff]   ;;  %s1994_s28 = scalar_lea.vmem %s2213_s0, %s1457_s14  ;;  %s1733_s14 = scalar_lea.vmem %s2174_s21, 16 }
  0x17   : > { %1481 = vmatpush3.bf16.msra.mxu1 %v1655_v3  ;;  %1460 = vmatprep.subr.bf16.mxu0 %v1656_v4  ;;  %v1664_v12 = vld [vmem:[%s2214_s1 + $0xe0] sm:$0xff]   ;;  %v1668_v16 = vld [vmem:[%s2214_s1 + $0xd8] sm:$0xff]   ;;  %v1672_v20 = vld [vmem:[%s2214_s1 + $0xd0] sm:$0xff]   ;;  %v1795_v3 = vmov 0.0   ;;  %p1734_p11 = scmp.ne.s32.totalorder %s2174_s21, %s1733_s14  ;;  %s1737_s22 = sshll.u32 %s1797_s13, 4  ;;  %s1738_s22 = int_to_ptr.vmem [resolvable:$false] %s1737_s22 }
  0x18   : > { %1482 = vmatprep.subr.bf16.mxu1 %v1657_v5  ;;  %v1665_v13 = vld [vmem:[%s2214_s1 + $0x60] sm:$0xff]   ;;  %v1669_v17 = vld [vmem:[%s2214_s1 + $0x58] sm:$0xff]   ;;  %v1673_v21 = vld [vmem:[%s2214_s1 + $0x50] sm:$0xff]   ;;  %s1739_s24 = scalar_lea.vmem %s1738_s22, 32  ;;  %p1740_p0 = scmp.lt.s32.totalorder %s2174_s21, %s1738_s22 }
  0x19   : > { %v1666_v14 = vld [vmem:[%s2214_s1 + $0xa0] sm:$0xff]   ;;  %v1670_v18 = vld [vmem:[%s2214_s1 + $0x98] sm:$0xff]   ;;  %v1674_v22 = vld [vmem:[%s2214_s1 + $0x90] sm:$0xff]   ;;  %p1735_p12 = pnand %p1734_p11, %p1886_p5  ;;  %p1741_p1 = scmp.lt.s32.totalorder %s1739_s24, %s1733_s14 }
  0x1a   : > { %1461 = vmatpush3.bf16.msra.mxu0 %v1658_v6  ;;  %v1667_v15 = vld [vmem:[%s2214_s1 + $0x20] sm:$0xff]   ;;  %v1671_v19 = vld [vmem:[%s2214_s1 + $0x18] sm:$0xff]   ;;  %v1675_v23 = vld [vmem:[%s2214_s1 + $0x10] sm:$0xff]  }
  0x1b   : > { %1483 = vmatpush3.bf16.msra.mxu1 %v1659_v7  ;;  %1462 = vmatprep.subr.bf16.mxu0 %v1660_v8  ;;  %v1676_v24 = vld [vmem:[%s2214_s1 + $0xc8] sm:$0xff]   ;;  %v1680_v28 = vld [vmem:[%s2214_s1 + $0xc0] sm:$0xff]   ;;  %v1690_v35 = vld [vmem:[%s2214_s1 + $0x178] sm:$0xff]   ;;  %p1736_p13 = pneg %p1735_p12  ;;  %p1742_p2 = por %p1741_p1, %p1740_p0 }
  0x1c   : > { %1484 = vmatprep.subr.bf16.mxu1 %v1661_v9  ;;  %v1677_v25 = vld [vmem:[%s2214_s1 + $0x48] sm:$0xff]   ;;  %v1681_v29 = vld [vmem:[%s2214_s1 + $0x40] sm:$0xff]   ;;  %v1691_v45 = vld [vmem:[%s2214_s1 + $0x138] sm:$0xff]  }
  0x1d   : > { %v1678_v26 = vld [vmem:[%s2214_s1 + $0x88] sm:$0xff]   ;;  %v1682_v30 = vld [vmem:[%s2214_s1 + $0x80] sm:$0xff]   ;;  %v1692_v48 = vld [vmem:[%s2214_s1 + $0x170] sm:$0xff]   ;;  %p1743_p3 = pnand %p1742_p2, %p1736_p13 }
  0x1e   : > { %1463 = vmatpush3.bf16.msra.mxu0 %v1662_v10  ;;  %v1679_v27 = vld [vmem:[%s2214_s1 + $0x8] sm:$0xff]   ;;  %v1683_v31 = vld [vmem:[%s2214_s1] sm:$0xff]   ;;  %v1693_v49 = vld [vmem:[%s2214_s1 + $0x130] sm:$0xff]  }
  0x1f   : > { %1485 = vmatpush3.bf16.msra.mxu1 %v1663_v11  ;;  %1464 = vmatprep.subr.bf16.mxu0 %v1664_v12  ;;  %v1684_v32 = vld [vmem:[%s1994_s28] ss:$8 sps:$4 sm:$0x3e]   ;;  %v1686_v33 = vld [vmem:[%s1994_s28 + $0x4] ss:$8 sps:$4 sm:$0x3e]  }
  0x20   : > { %1486 = vmatprep.subr.bf16.mxu1 %v1665_v13  ;;  %v1687_v34 = vld [vmem:[%s1994_s28] ss:$8 sps:$4 sm:$0x1f]   ;;  %v417_v36 = vshrl.u32 %v1686_v33, 16  ;;  %v420_v37 = vshll.u32 %v1686_v33, 16  ;;  %v409_v39 = vshrl.u32 %v1684_v32, 16 }
  0x21   : > { %v1689_v38 = vld [vmem:[%s1994_s28 + $0x4] ss:$8 sps:$4 sm:$0x1f]   ;;  %v412_v40 = vshll.u32 %v1684_v32, 16  ;;  %v1698_v54 = vld [vmem:[%s2214_s1 + $0x158] sm:$0xff]   ;;  %v1700_v57 = vld [vmem:[%s2214_s1 + $0x150] sm:$0xff]  }
  0x22   : > { %1465 = vmatpush3.bf16.msra.mxu0 %v1666_v14  ;;  %v419_v41 = vrot.slane %v417_v36, 1  ;;  %v422_v42 = vrot.slane %v420_v37, 2  ;;  %701 = vmatprep.mubr.bf16.mxu1 %v1689_v38  ;;  %v411_v43 = vrot.slane %v409_v39, 1  ;;  %v1694_v50 = vld [vmem:[%s2214_s1 + $0x168] sm:$0xff]   ;;  %v1696_v52 = vld [vmem:[%s2214_s1 + $0x160] sm:$0xff]   ;;  %v1699_v56 = vld [vmem:[%s2214_s1 + $0x118] sm:$0xff]  }
  0x23   : > { %1487 = vmatpush3.bf16.msra.mxu1 %v1667_v15  ;;  %1466 = vmatprep.subr.bf16.mxu0 %v1668_v16  ;;  %v414_v44 = vrot.slane %v412_v40, 2  ;;  %v1695_v51 = vld [vmem:[%s2214_s1 + $0x128] sm:$0xff]   ;;  %v1697_v53 = vld [vmem:[%s2214_s1 + $0x120] sm:$0xff]   ;;  %v1701_v59 = vld [vmem:[%s2214_s1 + $0x110] sm:$0xff]  }
  0x24   : > { %1488 = vmatprep.subr.bf16.mxu1 %v1669_v17  ;;  %v423_v46 = vor.u32 %v422_v42, %v419_v41  ;;  %v1708_v55 = vld [vmem:[%s1994_s28 + $0x4] ss:$8 sps:$4 sm:$0xf8]   ;;  %v1706_v63 = vld [vmem:[%s1994_s28] ss:$8 sps:$4 sm:$0xf8]   ;;  %s2172_s28 = scalar_lea.hbm %s2222_s9, %s1454_s26 }
  0x25   : > { %v415_v47 = vor.u32 %v414_v44, %v411_v43  ;;  %v754_v58 = vrot.slane %v1708_v55, 3  ;;  %v1702_v60 = vld [vmem:[%s2214_s1 + $0x148] sm:$0xff]   ;;  %v1704_v62 = vld [vmem:[%s2214_s1 + $0x140] sm:$0xff]   ;;  %v753_v1 = vrot.slane %v1706_v63, 3  ;;  %v1709_v2 = vld [vmem:[%s2216_s3 + $0x38] sm:$0xff]  }
  0x26   : > { %1467 = vmatpush3.bf16.msra.mxu0 %v1670_v18  ;;  %554 = vmatprep.mubr.bf16.mxu0 %v423_v46  ;;  %v1703_v61 = vld [vmem:[%s2214_s1 + $0x108] sm:$0xff]   ;;  %v1705_v0 = vld [vmem:[%s2214_s1 + $0x100] sm:$0xff]   ;;  %v1710_v4 = vld [vmem:[%s2216_s3 + $0x30] sm:$0xff]  }
  0x27   : > { %1489 = vmatpush3.bf16.msra.mxu1 %v1671_v19  ;;  %1468 = vmatprep.subr.bf16.mxu0 %v1672_v20  ;;  %v1711_v5 = vld [vmem:[%s2216_s3 + $0x28] sm:$0xff]   ;;  %v1712_v6 = vld [vmem:[%s2216_s3 + $0x20] sm:$0xff]   ;;  %v1713_v7 = vld [vmem:[%s2216_s3 + $0x18] sm:$0xff]  }
  0x28   : > { %1490 = vmatprep.subr.bf16.mxu1 %v1673_v21  ;;  %v1714_v8 = vld [vmem:[%s2216_s3 + $0x10] sm:$0xff]   ;;  %v1715_v9 = vld [vmem:[%s2216_s3 + $0x8] sm:$0xff]   ;;  %v1716_v10 = vld [vmem:[%s2216_s3] sm:$0xff]  }
  0x29   : > { %v1717_v11 = vld [vmem:[%s2218_s5 + $0x38] sm:$0xff]   ;;  %v1718_v12 = vld [vmem:[%s2218_s5 + $0x30] sm:$0xff]   ;;  %v1719_v13 = vld [vmem:[%s2218_s5 + $0x28] sm:$0xff]  }
  0x2a   : > { %1469 = vmatpush3.bf16.msra.mxu0 %v1674_v22  ;;  %v1720_v14 = vld [vmem:[%s2218_s5 + $0x20] sm:$0xff]   ;;  %v1721_v15 = vld [vmem:[%s2218_s5 + $0x18] sm:$0xff]   ;;  %v1722_v16 = vld [vmem:[%s2218_s5 + $0x10] sm:$0xff]  }
  0x2b   : > { %1491 = vmatpush3.bf16.msra.mxu1 %v1675_v23  ;;  %1470 = vmatprep.subr.bf16.mxu0 %v1676_v24  ;;  %v1429_v37 = vld [vmem:[%s2215_s2] ss:$0 sm:$0xff]  ;;  %v1725_v55 = vld [vmem:[%s2220_s7 + $0x38] sm:$0xff]  }
  0x2c   : > { %1492 = vmatprep.subr.bf16.mxu1 %v1677_v25 }
  0x2e   : > { %1471 = vmatpush3.bf16.msra.mxu0 %v1678_v26 }
  0x2f   : > { %1493 = vmatpush3.bf16.msra.mxu1 %v1679_v27  ;;  %1472 = vmatprep.subr.bf16.mxu0 %v1680_v28 }
  0x30   : > { %1494 = vmatprep.subr.bf16.mxu1 %v1681_v29 }
  0x32   : > { %1473 = vmatpush3.bf16.msra.mxu0 %v1682_v30 }
  0x33   : > { %1495 = vmatpush3.bf16.msra.mxu1 %v1683_v31  ;;  %1502 = vmatprep.subr.bf16.mxu0 %v1690_v35 }
  0x34   : > { %1551 = vmatprep.subr.bf16.mxu1 %v1795_v3 }
  0x35   : > { %555 = vmatmul.mubr.bf16.vlgmr.msra.gmra.mxu0 %v415_v47 }
  0x36   : > { %702 = vmatmul.mubr.bf16.vlgmr.msra.gmra.mxu1 %v1687_v34  ;;  %1503 = vmatpush3.bf16.msra.mxu0 %v1691_v45 }
  0x37   : > { %1504 = vmatprep.subr.bf16.mxu0 %v1692_v48  ;;  %885 = vmatprep.mubr.bf16.mxu0 %v754_v58  ;;  %v1728_v58 = vld [vmem:[%s2220_s7 + $0x20] sm:$0xff]  }
  0x38   : > { %1552 = vmatpush3.bf16.msra.mxu1 %v1709_v2  ;;  %1567 = vmatprep.mubr.msk.bf16.mxu1 %vm1796_vm0, %v1795_v3 }
  0x39   : > { %1553 = vmatprep.subr.bf16.mxu1 %v1795_v3 }
  0x3a   : > { %1505 = vmatpush3.bf16.msra.mxu0 %v1693_v49 }
  0x3b   : > { %1506 = vmatprep.subr.bf16.mxu0 %v1694_v50 }
  0x3c   : > { %1554 = vmatpush3.bf16.msra.mxu1 %v1710_v4 }
  0x3d   : > { %1555 = vmatprep.subr.bf16.mxu1 %v1795_v3 }
  0x3e   : > { %1507 = vmatpush3.bf16.msra.mxu0 %v1695_v51 }
  0x3f   : > { %1508 = vmatprep.subr.bf16.mxu0 %v1696_v52 }
  0x40   : > { %1556 = vmatpush3.bf16.msra.mxu1 %v1711_v5 }
  0x41   : > { %1557 = vmatprep.subr.bf16.mxu1 %v1795_v3 }
  0x42   : > { %1509 = vmatpush3.bf16.msra.mxu0 %v1697_v53  ;;  %v1723_v53 = vld [vmem:[%s2218_s5 + $0x8] sm:$0xff]  }
  0x43   : > { %1510 = vmatprep.subr.bf16.mxu0 %v1698_v54  ;;  %v1724_v54 = vld [vmem:[%s2218_s5] sm:$0xff]  }
  0x44   : > { %1558 = vmatpush3.bf16.msra.mxu1 %v1712_v6  ;;  %v1731_v6 = vld [vmem:[%s2220_s7 + $0x8] sm:$0xff]  }
  0x45   : > { %1559 = vmatprep.subr.bf16.mxu1 %v1795_v3 }
  0x46   : > { %1511 = vmatpush3.bf16.msra.mxu0 %v1699_v56  ;;  %v1726_v56 = vld [vmem:[%s2220_s7 + $0x30] sm:$0xff]  }
  0x47   : > { %1512 = vmatprep.subr.bf16.mxu0 %v1700_v57  ;;  %v1727_v57 = vld [vmem:[%s2220_s7 + $0x28] sm:$0xff]  }
  0x48   : > { %1560 = vmatpush3.bf16.msra.mxu1 %v1713_v7  ;;  %v1732_v7 = vld [vmem:[%s2220_s7] sm:$0xff]  }
  0x49   : > { %1561 = vmatprep.subr.bf16.mxu1 %v1795_v3 }
  0x4a   : > { %1513 = vmatpush3.bf16.msra.mxu0 %v1701_v59  ;;  %v1729_v59 = vld [vmem:[%s2220_s7 + $0x18] sm:$0xff]  }
  0x4b   : > { %1514 = vmatprep.subr.bf16.mxu0 %v1702_v60  ;;  %v1730_v60 = vld [vmem:[%s2220_s7 + $0x10] sm:$0xff]  }
  0x4c   : > { %1562 = vmatpush3.bf16.msra.mxu1 %v1714_v8  ;;  %v1040_v8 = vld [vmem:[%s2219_s6] sm:$0x1] }
  0x4d   : > { %1563 = vmatprep.subr.bf16.mxu1 %v1795_v3 }
  0x4e   : > { %1515 = vmatpush3.bf16.msra.mxu0 %v1703_v61  ;;  %v933_v61 = vld [vmem:[%s2217_s4] sm:$0x1] }
  0x4f   : > { %1516 = vmatprep.subr.bf16.mxu0 %v1704_v62 }
  0x50   : > { %1564 = vmatpush3.bf16.msra.mxu1 %v1715_v9 }
  0x51   : > { %1565 = vmatprep.subr.bf16.mxu1 %v1795_v3 }
  0x52   : > { %1517 = vmatpush3.bf16.msra.mxu0 %v1705_v0 }
  0x53   : > { %1571 = vmatprep.subr.bf16.mxu0 %v1795_v3 }
  0x54   : > { %1566 = vmatpush3.bf16.msra.mxu1 %v1716_v10 }
  0x55   : > { %886 = vmatmul.mubr.bf16.vlgmr.msra.gmra.mxu0 %v753_v1  ;;  %1591 = vmatprep.subr.bf16.mxu1 %v1795_v3 }
  0x56   : > { %1587 = vmatprep.mubr.msk.bf16.mxu0 %vm1796_vm0, %v1795_v3  ;;  %1572 = vmatpush3.bf16.msra.mxu0 %v1717_v11 }
  0x57   : > { %1573 = vmatprep.subr.bf16.mxu0 %v1795_v3 }
  0x5a   : > { %1574 = vmatpush3.bf16.msra.mxu0 %v1718_v12 }
  0x5b   : > { %1575 = vmatprep.subr.bf16.mxu0 %v1795_v3 }
  0x5e   : > { %1576 = vmatpush3.bf16.msra.mxu0 %v1719_v13 }
  0x5f   : > { %1577 = vmatprep.subr.bf16.mxu0 %v1795_v3 }
  0x62   : > { %1578 = vmatpush3.bf16.msra.mxu0 %v1720_v14 }
  0x63   : > { %1579 = vmatprep.subr.bf16.mxu0 %v1795_v3 }
  0x66   : > { %1580 = vmatpush3.bf16.msra.mxu0 %v1721_v15 }
  0x67   : > { %1581 = vmatprep.subr.bf16.mxu0 %v1795_v3 }
  0x6a   : > { %1582 = vmatpush3.bf16.msra.mxu0 %v1722_v16 }
  0x6b   : > { %1583 = vmatprep.subr.bf16.mxu0 %v1795_v3 }
  0x6e   : > { %1584 = vmatpush3.bf16.msra.mxu0 %v1723_v53 }
  0x6f   : > { %1585 = vmatprep.subr.bf16.mxu0 %v1795_v3 }
  0x72   : > { %1586 = vmatpush3.bf16.msra.mxu0 %v1724_v54 }
  0xf5   : > { %v1474_v17 = vpop.f32.mrf.mxu0 }
  0xf6   : > { %v1496_v18 = vpop.f32.mrf.mxu1 }
  0xf7   : > { %v1475_v19 = vpop.f32.mrf.mxu0 }
  0xf8   : > { %v1497_v20 = vpop.f32.mrf.mxu1  ;;  %v1476_v24 = vadd.f32 %v1475_v19, %v1474_v17 }
  0xf9   : > { %v1477_v21 = vpop.f32.mrf.mxu0  ;;  %v1498_v25 = vadd.f32 %v1497_v20, %v1496_v18 }
  0xfa   : > { %v1499_v22 = vpop.f32.mrf.mxu1 }
  0xfb   : > { %v1478_v23 = vpop.f32.mrf.mxu0  ;;  %v704_v32 = vadd.f32 %v1498_v25, %v1476_v24 }
  0xfc   : > { %v1500_v26 = vpop.f32.mrf.mxu1  ;;  %v1479_v29 = vadd.f32 %v1478_v23, %v1477_v21 }
  0xfd   : > { %v1501_v30 = vadd.f32 %v1500_v26, %v1499_v22 }
  0xff   : > { %v707_v36 = vadd.f32 %v1501_v30, %v1479_v29 }
 0x115   : > { %v1518_v27 = vpop.f32.mrf.mxu0 }
 0x117   : > { %v1519_v28 = vpop.f32.mrf.mxu0 }
 0x118   : > { %v1520_v31 = vadd.f32 %v1519_v28, %v1518_v27 }
 0x119   : > { %v1521_v33 = vpop.f32.mrf.mxu0 }
 0x11a   : > { %v894_v34 = vadd.f32 %v1520_v31, %v704_v32 }
 0x11b   : > { %v1522_v35 = vpop.f32.mrf.mxu0 }
 0x11c   : > { %v1523_v38 = vadd.f32 %v1522_v35, %v1521_v33  ;;  %v903_v40 = vadd.f32 %v1429_v37, %v894_v34 }
 0x11e   : > { %v895_v39 = vadd.f32 %v1523_v38, %v707_v36  ;;  %v905_v43 = vmax.f32 %v903_v40, 0.0 }
 0x120   : > { %v904_v41 = vadd.f32 %v1429_v37, %v895_v39 }
 0x122   : > { %v906_v42 = vmax.f32 %v904_v41, 0.0 }
 0x124   : > { %v908_v44 = vsel %vm907_vm1, %v906_v42, -inf }
 0x125   : > { %v909_v45 = vmax.f32 %v905_v43, %v908_v44 }
 0x127   : > { %v910_v46 = vrot.slane %v909_v45, 4 }
 0x129   : > { %v911_v47 = vmax.f32 %v909_v45, %v910_v46 }
 0x12b   : > { %v912_v48 = vrot.slane %v911_v47, 2 }
 0x12d   : > { %v913_v49 = vmax.f32 %v911_v47, %v912_v48 }
 0x12f   : > { %v914_v50 = vrot.slane %v913_v49, 1 }
 0x131   : > { %v915_v51 = vmax.f32 %v913_v49, %v914_v50 }
 0x133   : > { %v916_v52 = vpack.c.bf16 %v915_v51, %v915_v51 }
 0x135   : > { %1568 = vmatmul.mubr.bf16.vlgmr.msra.gmra.mxu1 %v916_v52 }
 0x136   : > { %1607 = vmatprep.mubr.msk.bf16.mxu1 %vm1796_vm0, %v1795_v3  ;;  %1592 = vmatpush3.bf16.msra.mxu1 %v1725_v55 }
 0x137   : > { %1593 = vmatprep.subr.bf16.mxu1 %v1795_v3 }
 0x13a   : > { %1594 = vmatpush3.bf16.msra.mxu1 %v1726_v56 }
 0x13b   : > { %1595 = vmatprep.subr.bf16.mxu1 %v1795_v3 }
 0x13e   : > { %1596 = vmatpush3.bf16.msra.mxu1 %v1727_v57 }
 0x13f   : > { %1597 = vmatprep.subr.bf16.mxu1 %v1795_v3 }
 0x142   : > { %1598 = vmatpush3.bf16.msra.mxu1 %v1728_v58 }
 0x143   : > { %1599 = vmatprep.subr.bf16.mxu1 %v1795_v3 }
 0x146   : > { %1600 = vmatpush3.bf16.msra.mxu1 %v1729_v59 }
 0x147   : > { %1601 = vmatprep.subr.bf16.mxu1 %v1795_v3 }
 0x14a   : > { %1602 = vmatpush3.bf16.msra.mxu1 %v1730_v60 }
 0x14b   : > { %1603 = vmatprep.subr.bf16.mxu1 %v1795_v3 }
 0x14e   : > { %1604 = vmatpush3.bf16.msra.mxu1 %v1731_v6 }
 0x14f   : > { %1605 = vmatprep.subr.bf16.mxu1 %v1795_v3  ;;  %v1147_v3 = vld [vmem:[%s2221_s8] sm:$0x1] }
 0x152   : > { %1606 = vmatpush3.bf16.msra.mxu1 %v1732_v7 }
 0x1f5   : > { %v1016_v62 = vpop.f32.mrf.mxu1 }
 0x1f6   : > { %v1017_v63 = vadd.f32 %v1016_v62, %v933_v61 }
 0x1f7   : > { %v1569_v0 = vpop.f32.mrf.mxu1 }
 0x1f8   : > { %v1022_v1 = vmax.f32 %v1017_v63, 0.0 }
 0x1f9   : > { %v1019_v2 = vpop.f32.mrf.mxu1 }
 0x1fa   : > { %v1023_v4 = vpack.c.bf16 %v1022_v1, %v1022_v1 }
 0x1fb   : > { %v1570_v5 = vpop.f32.mrf.mxu1 }
 0x1fc   : > { %1588 = vmatmul.mubr.bf16.vlgmr.msra.gmra.mxu0 %v1023_v4 }
 0x2bc   : > { %v1123_v9 = vpop.f32.mrf.mxu0 }
 0x2bd   : > { %v1124_v10 = vadd.f32 %v1123_v9, %v1040_v8 }
 0x2be   : > { %v1589_v11 = vpop.f32.mrf.mxu0 }
 0x2bf   : > { %v1129_v12 = vmax.f32 %v1124_v10, 0.0 }
 0x2c0   : > { %v1126_v13 = vpop.f32.mrf.mxu0 }
 0x2c1   : > { %v1130_v14 = vpack.c.bf16 %v1129_v12, %v1129_v12 }
 0x2c2   : > { %v1590_v15 = vpop.f32.mrf.mxu0 }
 0x2c3   : > { %1608 = vmatmul.mubr.bf16.vlgmr.msra.gmra.mxu1 %v1130_v14 }
 0x383   : > { %v1230_v16 = vpop.f32.mrf.mxu1 }
 0x384   : > { %v1231_v17 = vadd.f32 %v1230_v16, %v1147_v3 }
 0x385   : > { %v1609_v18 = vpop.f32.mrf.mxu1 }
 0x386   : > { %1236 = vst [vmem:[%s324_s27] sm:$0x1] %v1231_v17 }
 0x387   : > { %v1233_v19 = vpop.f32.mrf.mxu1 }
 0x388   : > { %1746 = shalt.err (!%p1743_p3)
}
 0x389   : > { %s1747_s25 = scalar_lea.hbm %s2172_s28, 16  ;;  %s1751_s27 = scalar_lea.hbm %s2222_s9, 32 }
 0x38a   : > { %p1748_p4 = scmp.ne.s32.totalorder %s2172_s28, %s1747_s25  ;;  %p1752_p9 = scmp.lt.s32.totalorder %s2172_s28, %s2222_s9 }
 0x38b   : > { %p1753_p10 = scmp.lt.s32.totalorder %s1751_s27, %s1747_s25 }
 0x38c   : > { %p1749_p7 = pnand %p1748_p4, %p1886_p5 }
 0x38d   : > { %p1754_p11 = por %p1753_p10, %p1752_p9 }
 0x38e   : > { %p1750_p8 = pneg %p1749_p7 }
 0x390   : > { %p1755_p12 = pnand %p1754_p11, %p1750_p8 }
 0x392   : > { %1758 = shalt.err (!%p1755_p12)
}
 0x393   : > { %1611 = dma.vmem_to_hbm [thread:$0]  (%p1886_p5), %s2174_s21, 16, %s2172_s28, %s1238_s17   ;;  %v1610_v20 = vpop.f32.mrf.mxu1 }
 0x394 PF: > { %p1617_p13 = scmp.ge.s32.totalorder %s1793_s12, 2  ;;  %s1262_s14 = sand.u32 1, %s1781_s30  }
 0x395   : > { %s1263_s13 = scalar_lea.sflag [#allocation3], %s1262_s14 }
 0x396   : > { %p1614_p0 = pnand %p1617_p13, %p1890_p6 }
 0x398   : > { %p1615_p1 = pneg %p1614_p0 }
 0x39a   : > { %1776 = dma.done.wait (%p1615_p1), %s1263_s13, 16  }
 0x39b   : > { %1778 = vsyncadd (%p1615_p1), %s1263_s13, 4294967280  ;;  %p19_p2 = scmp.ge.s32.totalorder %s1873_s15, 4   ;;  %s2225_s30 = smov %s1785_s10 }
 0x39c   : > { %s2226_s10 = smov %s1789_s11  ;;  %s2227_s11 = smov %s1884_s18 }
 0x39d   : > { %s2228_s12 = smov %s1873_s15  ;;  %21 = sbr.rel (!%p19_p2) target bundleno = 3 (0x3), region = 93 }
 0x3a2   :  { %1267 = vsyncpa [#allocation3], 1 }
 0x3a3   :  { %1269 = vsyncpa [#allocation3 + $0x1], 1 }

</bundles_post_ra>
